<compile_context>
chip_gen: v5e
topology: v5e:2x2
jax: 0.10.0
libtpu: 0.0.40
codegen_flags: <defaults>
</compile_context>

<pallas_src>
import jax
import jax.numpy as jnp
from jax import lax
from jax.experimental import pallas as pl
from jax.experimental.pallas import tpu as pltpu

_LPAD = 8  # left spatial pad (multiple of the 8-sublane tile -> aligned slices)


def _round_up(x, m):
    return ((x + m - 1) // m) * m


def _vmem_limit_bytes():
    """Per-generation VMEM budget: ~80% of physical, capped below the 128 MiB parts."""
    cap = 64 * 1024 * 1024
    try:
        info = pltpu.get_tpu_info()
        c = int(getattr(info, "vmem_capacity_bytes", 0) or 0)
        if c > 0:
            cap = c
    except Exception:
        pass
    return int(min(cap * 0.8, 112 * 1024 * 1024))


def _make_resblock_kernel(H, W, Cp, th, Wd, res_scale, use_bf16_mxu):
    """Fused ResBlock tile kernel.

    xp_hbm : (N, Hp+4, Wd, Cp) zero-padded input image, left in HBM (pl.ANY)
    w*_ref : (3, 3*Cp, Cp)  per-dy weights with the 3 dx taps stacked along K
    b*_ref : (1, Cp)
    o_ref  : (th, W, Cp)    output tile
    xbuf   : (th+4, Wd, Cp) VMEM scratch: halo window for this tile
    sem    : (1,) DMA semaphore
    """
    R2 = th + 2            # conv1 intermediate rows (tile + 1-row halo for conv2)
    R4 = th + 4            # input halo rows
    M4 = R4 * Wd
    M2 = R2 * Wd
    MT = th * Wd
    f32 = jnp.float32

    def mm(lhs, rhs):
        if use_bf16_mxu:
            lhs = lhs.astype(jnp.bfloat16)
        return jnp.dot(lhs, rhs, preferred_element_type=f32)

    def tap_cat(flat2d, m):
        # (m, Cp) -> (m, 3*Cp): lanes [0:Cp)   = rows shifted down by 1 (dx = 0 tap)
        #                       lanes [Cp:2Cp) = unshifted              (dx = 1 tap)
        #                       lanes [2Cp:)   = rows shifted up by 1   (dx = 2 tap)
        left = pltpu.roll(flat2d, shift=1, axis=0)
        right = pltpu.roll(flat2d, shift=m - 1, axis=0)
        return jnp.concatenate([left, flat2d, right], axis=-1)

    def kernel(xp_hbm, w1_ref, b1_ref, w2_ref, b2_ref, o_ref, xbuf, sem):
        n = pl.program_id(0)
        h = pl.program_id(1)
        row0 = h * th

        # ---- fetch this tile's (th+4)-row halo window: HBM -> VMEM ------------------
        cp = pltpu.make_async_copy(xp_hbm.at[n, pl.ds(row0, R4)], xbuf, sem.at[0])
        cp.start()
        cp.wait()
        x_full = xbuf[...]                                     # (R4, Wd, Cp) f32

        # ---- conv1 (+bias, ReLU): 3 matmuls with K = 3*Cp ---------------------------
        xcat = tap_cat(x_full.reshape(M4, Cp), M4)             # (M4, 3Cp)
        y = mm(xcat[0 * Wd:0 * Wd + M2, :], w1_ref[0])         # dy = 0
        y = y + mm(xcat[1 * Wd:1 * Wd + M2, :], w1_ref[1])     # dy = 1
        y = y + mm(xcat[2 * Wd:2 * Wd + M2, :], w1_ref[2])     # dy = 2
        y = y.reshape(R2, Wd, Cp) + b1_ref[...]

        # Zero every position outside conv1's valid output range: those positions are
        # exactly conv2's zero padding (rows above/below the image, columns outside
        # [_LPAD, _LPAD + W)), plus the roll-wrap garbage columns.
        r_ids = lax.broadcasted_iota(jnp.int32, (R2, Wd, 1), 0)
        c_ids = lax.broadcasted_iota(jnp.int32, (R2, Wd, 1), 1)
        g_row = r_ids + (row0 - 1)                             # global image row
        valid = (g_row >= 0) & (g_row < H) & (c_ids >= _LPAD) & (c_ids < _LPAD + W)
        y1 = jnp.where(valid, jnp.maximum(y, 0.0), 0.0)        # (R2, Wd, Cp)

        # ---- conv2 (+bias) * res_scale + residual -----------------------------------
        ycat = tap_cat(y1.reshape(M2, Cp), M2)                 # (M2, 3Cp)
        acc = mm(ycat[0 * Wd:0 * Wd + MT, :], w2_ref[0])
        acc = acc + mm(ycat[1 * Wd:1 * Wd + MT, :], w2_ref[1])
        acc = acc + mm(ycat[2 * Wd:2 * Wd + MT, :], w2_ref[2])

        acc = acc.reshape(th, Wd, Cp)[:, _LPAD:_LPAD + W, :]   # aligned (offset 8) slice
        res = x_full[2:2 + th, _LPAD:_LPAD + W, :]             # aligned residual window
        out = (acc + b2_ref[...]) * jnp.float32(res_scale) + res
        o_ref[...] = out.astype(o_ref.dtype)                   # single store per tile

    return kernel


def resblock_forward(x_nchw, w1_oihw, b1, w2_oihw, b2, res_scale=1.0, *,
                     h_tile=32, use_bf16_mxu=False):
    """ResBlock forward. Inputs follow PyTorch conventions (NCHW input, OIHW weights)."""
    N, C, H, W = x_nchw.shape
    assert w1_oihw.shape == (C, C, 3, 3) and w2_oihw.shape == (C, C, 3, 3)

    Cp = _round_up(C, 128)                  # lane-dense channels (MXU / stores)
    Wd = _round_up(W + _LPAD + 2, 8)        # frame width: left pad 8, right pad >= 2
    th = max(1, min(h_tile, H))
    nH = -(-H // th)
    Hp = nH * th                            # padded H so every output block is full

    x = jnp.transpose(x_nchw, (0, 2, 3, 1)).astype(jnp.float32)     # NHWC
    # Single fused pad: 2-row halo top, (2 + Hp-H)-row halo bottom, 8-col left halo,
    # right cols up to Wd, and channel padding to Cp.
    xp = jnp.pad(x, ((0, 0), (2, 2 + Hp - H), (_LPAD, Wd - W - _LPAD), (0, Cp - C)))

    w_dtype = jnp.bfloat16 if use_bf16_mxu else jnp.float32

    def prep_w(w):
        w = jnp.transpose(w, (2, 3, 1, 0)).astype(jnp.float32)       # OIHW -> HWIO
        w = jnp.pad(w, ((0, 0), (0, 0), (0, Cp - C), (0, Cp - C)))   # (3, 3, Cp, Cp)
        return w.reshape(3, 3 * Cp, Cp).astype(w_dtype)              # dx folded into K

    w1c, w2c = prep_w(w1_oihw), prep_w(w2_oihw)
    b1p = jnp.pad(b1.astype(jnp.float32), (0, Cp - C)).reshape(1, Cp)
    b2p = jnp.pad(b2.astype(jnp.float32), (0, Cp - C)).reshape(1, Cp)

    kernel = _make_resblock_kernel(H, W, Cp, th, Wd, float(res_scale), use_bf16_mxu)

    out = pl.pallas_call(
        kernel,
        out_shape=jax.ShapeDtypeStruct((N, Hp, W, Cp), jnp.float32),
        grid_spec=pltpu.PrefetchScalarGridSpec(
            num_scalar_prefetch=0,
            grid=(N, nH),
            in_specs=[
                # padded image: stays in HBM, halo windows DMA'd manually per tile
                pl.BlockSpec(memory_space=pl.ANY),
                # weights / biases: constant index_map -> fetched once, stay resident
                pl.BlockSpec((3, 3 * Cp, Cp), lambda n, h: (0, 0, 0)),
                pl.BlockSpec((1, Cp), lambda n, h: (0, 0)),
                pl.BlockSpec((3, 3 * Cp, Cp), lambda n, h: (0, 0, 0)),
                pl.BlockSpec((1, Cp), lambda n, h: (0, 0)),
            ],
            out_specs=pl.BlockSpec((None, th, W, Cp), lambda n, h: (n, h, 0, 0)),
            scratch_shapes=[
                pltpu.VMEM((th + 4, Wd, Cp), jnp.float32),   # halo window buffer
                pltpu.SemaphoreType.DMA((1,)),               # halo DMA semaphore
            ],
        ),
        compiler_params=pltpu.CompilerParams(
            dimension_semantics=("parallel", "parallel"),
            vmem_limit_bytes=_vmem_limit_bytes(),
        ),
    )(xp, w1c, b1p, w2c, b2p)

    out = out[:, :H, :, :C]                                          # drop H / channel pad
    return jnp.transpose(out, (0, 3, 1, 2)).astype(x_nchw.dtype)     # back to NCHW


def _reference(x_nchw, w1, b1, w2, b2, res_scale):
    """Pure-JAX reference (matches torch semantics) for correctness checking."""
    x = jnp.transpose(x_nchw, (0, 2, 3, 1)).astype(jnp.float32)
    dn = ("NHWC", "HWIO", "NHWC")
    w1h = jnp.transpose(w1, (2, 3, 1, 0)).astype(jnp.float32)
    w2h = jnp.transpose(w2, (2, 3, 1, 0)).astype(jnp.float32)
    y = lax.conv_general_dilated(x, w1h, (1, 1), "SAME", dimension_numbers=dn) + b1
    y = jnp.maximum(y, 0.0)
    y = lax.conv_general_dilated(y, w2h, (1, 1), "SAME", dimension_numbers=dn) + b2
    y = y * res_scale + x
    return jnp.transpose(y, (0, 3, 1, 2))


if __name__ == "__main__":
    key = jax.random.PRNGKey(0)

    def make_case(k, N, C, H, W):
        kx, kw1, kb1, kw2, kb2 = jax.random.split(k, 5)
        bound = 1.0 / ((C * 9) ** 0.5)
        x = jax.random.normal(kx, (N, C, H, W), jnp.float32)
        w1 = jax.random.uniform(kw1, (C, C, 3, 3), jnp.float32, -bound, bound)
        b1 = jax.random.uniform(kb1, (C,), jnp.float32, -bound, bound)
        w2 = jax.random.uniform(kw2, (C, C, 3, 3), jnp.float32, -bound, bound)
        b2 = jax.random.uniform(kb2, (C,), jnp.float32, -bound, bound)
        return x, w1, b1, w2, b2

    k1, k2, k3 = jax.random.split(key, 3)

    # Case 1: module defaults (res_scale=1); h_tile=8 -> grid (2, 2), exercises the
    # H tiling, halo DMA windows, and top/bottom boundary masking.
    x, w1, b1, w2, b2 = make_case(k1, 2, 4, 16, 16)
    out = jax.block_until_ready(resblock_forward(x, w1, b1, w2, b2, 1.0, h_tile=8))
    ref = jax.block_until_ready(_reference(x, w1, b1, w2, b2, 1.0))
    assert out.shape == x.shape, out.shape
    err = float(jnp.max(jnp.abs(out - ref)))
    assert jnp.allclose(out, ref, atol=1e-4, rtol=1e-4), err

    # Case 2: odd shapes, H NOT divisible by the tile (partial last tile), res_scale=0.5.
    x, w1, b1, w2, b2 = make_case(k2, 1, 3, 10, 12)
    out = jax.block_until_ready(resblock_forward(x, w1, b1, w2, b2, 0.5, h_tile=4))
    ref = jax.block_until_ready(_reference(x, w1, b1, w2, b2, 0.5))
    err = float(jnp.max(jnp.abs(out - ref)))
    assert jnp.allclose(out, ref, atol=1e-4, rtol=1e-4), err

    # Case 3: bf16 MXU path (looser tolerance by construction).
    x, w1, b1, w2, b2 = make_case(k3, 1, 4, 16, 16)
    out = jax.block_until_ready(
        resblock_forward(x, w1, b1, w2, b2, 1.0, h_tile=8, use_bf16_mxu=True))
    ref = jax.block_until_ready(_reference(x, w1, b1, w2, b2, 1.0))
    err = float(jnp.max(jnp.abs(out - ref)))
    assert jnp.allclose(out, ref, atol=2e-1, rtol=2e-1), err

    print("KERNEL_OK")
</pallas_src>

<mosaic_0001>
module attributes {stable_mosaic.version = 11 : i64} {
  func.func @kernel(%arg0: i32, %arg1: i32, %arg2: memref<2x20x32x128xf32, #tpu.memory_space<any>>, %arg3: memref<3x384x128xf32, #tpu.memory_space<vmem>>, %arg4: memref<1x128xf32, #tpu.memory_space<vmem>>, %arg5: memref<3x384x128xf32, #tpu.memory_space<vmem>>, %arg6: memref<1x128xf32, #tpu.memory_space<vmem>>, %arg7: memref<1x8x16x128xf32, #tpu.memory_space<vmem>>, %arg8: memref<12x32x128xf32, #tpu.memory_space<vmem>>, %arg9: memref<1x!tpu.dma_semaphore, #tpu.memory_space<semaphore_mem>>) attributes {dimension_semantics = [#tpu.dimension_semantics<parallel>, #tpu.dimension_semantics<parallel>], iteration_bounds = array<i64: 2, 2>, scalar_prefetch = 0 : i64, scratch_operands = 2 : i64, tpu.core_type = #tpu.core_type<tc>, window_params = [{}, {pipeline_mode = #tpu.pipeline_mode<synchronous>, transform_indices = @transform_1, window_bounds = array<i64: 3, 384, 128>}, {pipeline_mode = #tpu.pipeline_mode<synchronous>, transform_indices = @transform_2, window_bounds = array<i64: 1, 128>}, {pipeline_mode = #tpu.pipeline_mode<synchronous>, transform_indices = @transform_3, window_bounds = array<i64: 3, 384, 128>}, {pipeline_mode = #tpu.pipeline_mode<synchronous>, transform_indices = @transform_4, window_bounds = array<i64: 1, 128>}, {transform_indices = @transform_5, window_bounds = array<i64: 1, 8, 16, 128>}]} {
    %c8_i32 = arith.constant 8 : i32
    %0 = arith.muli %arg1, %c8_i32 : i32
    %c0_i32 = arith.constant 0 : i32
    %c0_i32_0 = arith.constant 0 : i32
    %c0_i32_1 = arith.constant 0 : i32
    %1 = tpu.memref_slice %arg2[%arg0, %0, %c0_i32_0, %c0_i32_1] : memref<2x20x32x128xf32, #tpu.memory_space<any>> -> memref<1x12x32x128xf32, #tpu.memory_space<any>>
    %2 = tpu.memref_squeeze %1 : memref<1x12x32x128xf32, #tpu.memory_space<any>> -> memref<12x32x128xf32, #tpu.memory_space<any>>
    %3 = tpu.memref_slice %arg9[%c0_i32] : memref<1x!tpu.dma_semaphore, #tpu.memory_space<semaphore_mem>> -> memref<1x!tpu.dma_semaphore, #tpu.memory_space<semaphore_mem>>
    %4 = tpu.memref_squeeze %3 : memref<1x!tpu.dma_semaphore, #tpu.memory_space<semaphore_mem>> -> memref<!tpu.dma_semaphore, #tpu.memory_space<semaphore_mem>>
    tpu.enqueue_dma source(%2 : memref<12x32x128xf32, #tpu.memory_space<any>>) target(%arg8 : memref<12x32x128xf32, #tpu.memory_space<vmem>>) target_semaphore(%4 : memref<!tpu.dma_semaphore, #tpu.memory_space<semaphore_mem>>)
    %c0_i32_2 = arith.constant 0 : i32
    %c0_i32_3 = arith.constant 0 : i32
    %c0_i32_4 = arith.constant 0 : i32
    %5 = tpu.memref_slice %arg2[%arg0, %0, %c0_i32_3, %c0_i32_4] : memref<2x20x32x128xf32, #tpu.memory_space<any>> -> memref<1x12x32x128xf32, #tpu.memory_space<any>>
    %6 = tpu.memref_squeeze %5 : memref<1x12x32x128xf32, #tpu.memory_space<any>> -> memref<12x32x128xf32, #tpu.memory_space<any>>
    %7 = tpu.memref_slice %arg9[%c0_i32_2] : memref<1x!tpu.dma_semaphore, #tpu.memory_space<semaphore_mem>> -> memref<1x!tpu.dma_semaphore, #tpu.memory_space<semaphore_mem>>
    %8 = tpu.memref_squeeze %7 : memref<1x!tpu.dma_semaphore, #tpu.memory_space<semaphore_mem>> -> memref<!tpu.dma_semaphore, #tpu.memory_space<semaphore_mem>>
    tpu.wait_dma2 semaphore(%8 : memref<!tpu.dma_semaphore, #tpu.memory_space<semaphore_mem>>) src(%6 : memref<12x32x128xf32, #tpu.memory_space<any>>) dst(%arg8 : memref<12x32x128xf32, #tpu.memory_space<vmem>>)
    %c0 = arith.constant 0 : index
    %c0_5 = arith.constant 0 : index
    %c0_6 = arith.constant 0 : index
    %9 = vector.load %arg8[%c0, %c0_5, %c0_6] : memref<12x32x128xf32, #tpu.memory_space<vmem>>, vector<12x32x128xf32>
    %10 = vector.shape_cast %9 : vector<12x32x128xf32> to vector<384x128xf32>
    %c1_i32 = arith.constant 1 : i32
    %11 = tpu.dynamic_rotate %10 by %c1_i32 dim 0 : vector<384x128xf32>, i32 -> vector<384x128xf32>
    %c383_i32 = arith.constant 383 : i32
    %12 = tpu.dynamic_rotate %10 by %c383_i32 dim 0 : vector<384x128xf32>, i32 -> vector<384x128xf32>
    %13 = tpu.concatenate %11, %10, %12 in 1 : vector<384x128xf32>, vector<384x128xf32>, vector<384x128xf32> -> vector<384x384xf32>
    %14 = vector.extract_strided_slice %13 {offsets = [0, 0], sizes = [320, 384], strides = [1, 1]} : vector<384x384xf32> to vector<320x384xf32>
    %c0_7 = arith.constant 0 : index
    %c0_8 = arith.constant 0 : index
    %c0_9 = arith.constant 0 : index
    %15 = vector.load %arg3[%c0_7, %c0_8, %c0_9] : memref<3x384x128xf32, #tpu.memory_space<vmem>>, vector<1x384x128xf32>
    %16 = vector.shape_cast %15 : vector<1x384x128xf32> to vector<384x128xf32>
    %cst = arith.constant dense<0.000000e+00> : vector<320x128xf32>
    %17 = tpu.matmul %14, %16, %cst {dimension_numbers = #tpu.dot_dimension_numbers<[1], [0], [0], [1], [0, 0, 1, 1], [], []>} : vector<320x384xf32>, vector<384x128xf32>, vector<320x128xf32> -> vector<320x128xf32>
    %18 = vector.extract_strided_slice %13 {offsets = [32, 0], sizes = [320, 384], strides = [1, 1]} : vector<384x384xf32> to vector<320x384xf32>
    %c1 = arith.constant 1 : index
    %c0_10 = arith.constant 0 : index
    %c0_11 = arith.constant 0 : index
    %19 = vector.load %arg3[%c1, %c0_10, %c0_11] : memref<3x384x128xf32, #tpu.memory_space<vmem>>, vector<1x384x128xf32>
    %20 = vector.shape_cast %19 : vector<1x384x128xf32> to vector<384x128xf32>
    %cst_12 = arith.constant dense<0.000000e+00> : vector<320x128xf32>
    %21 = tpu.matmul %18, %20, %cst_12 {dimension_numbers = #tpu.dot_dimension_numbers<[1], [0], [0], [1], [0, 0, 1, 1], [], []>} : vector<320x384xf32>, vector<384x128xf32>, vector<320x128xf32> -> vector<320x128xf32>
    %22 = arith.addf %17, %21 : vector<320x128xf32>
    %23 = vector.extract_strided_slice %13 {offsets = [64, 0], sizes = [320, 384], strides = [1, 1]} : vector<384x384xf32> to vector<320x384xf32>
    %c2 = arith.constant 2 : index
    %c0_13 = arith.constant 0 : index
    %c0_14 = arith.constant 0 : index
    %24 = vector.load %arg3[%c2, %c0_13, %c0_14] : memref<3x384x128xf32, #tpu.memory_space<vmem>>, vector<1x384x128xf32>
    %25 = vector.shape_cast %24 : vector<1x384x128xf32> to vector<384x128xf32>
    %cst_15 = arith.constant dense<0.000000e+00> : vector<320x128xf32>
    %26 = tpu.matmul %23, %25, %cst_15 {dimension_numbers = #tpu.dot_dimension_numbers<[1], [0], [0], [1], [0, 0, 1, 1], [], []>} : vector<320x384xf32>, vector<384x128xf32>, vector<320x128xf32> -> vector<320x128xf32>
    %27 = arith.addf %22, %26 : vector<320x128xf32>
    %28 = vector.shape_cast %27 : vector<320x128xf32> to vector<10x32x128xf32>
    %c0_16 = arith.constant 0 : index
    %c0_17 = arith.constant 0 : index
    %29 = vector.load %arg4[%c0_16, %c0_17] : memref<1x128xf32, #tpu.memory_space<vmem>>, vector<1x128xf32>
    %30 = vector.shape_cast %29 : vector<1x128xf32> to vector<1x1x128xf32>
    %31 = vector.broadcast %30 : vector<1x1x128xf32> to vector<10x32x128xf32>
    %32 = arith.addf %28, %31 : vector<10x32x128xf32>
    %33 = tpu.iota {dimensions = array<i32: 0>} : vector<10x32x1xi32>
    %34 = tpu.iota {dimensions = array<i32: 1>} : vector<10x32x1xi32>
    %c1_i32_18 = arith.constant 1 : i32
    %35 = arith.subi %0, %c1_i32_18 : i32
    %36 = vector.broadcast %35 : i32 to vector<10x32x1xi32>
    %37 = arith.addi %33, %36 : vector<10x32x1xi32>
    %c0_i32_19 = arith.constant 0 : i32
    %38 = vector.broadcast %c0_i32_19 : i32 to vector<10x32x1xi32>
    %39 = arith.cmpi sge, %37, %38 : vector<10x32x1xi32>
    %c16_i32 = arith.constant 16 : i32
    %40 = vector.broadcast %c16_i32 : i32 to vector<10x32x1xi32>
    %41 = arith.cmpi slt, %37, %40 : vector<10x32x1xi32>
    %42 = arith.andi %39, %41 : vector<10x32x1xi1>
    %c8_i32_20 = arith.constant 8 : i32
    %43 = vector.broadcast %c8_i32_20 : i32 to vector<10x32x1xi32>
    %44 = arith.cmpi sge, %34, %43 : vector<10x32x1xi32>
    %45 = arith.andi %42, %44 : vector<10x32x1xi1>
    %c24_i32 = arith.constant 24 : i32
    %46 = vector.broadcast %c24_i32 : i32 to vector<10x32x1xi32>
    %47 = arith.cmpi slt, %34, %46 : vector<10x32x1xi32>
    %48 = arith.andi %45, %47 : vector<10x32x1xi1>
    %cst_21 = arith.constant 0.000000e+00 : f32
    %49 = vector.broadcast %cst_21 : f32 to vector<10x32x128xf32>
    %50 = arith.maximumf %32, %49 : vector<10x32x128xf32>
    %cst_22 = arith.constant 0.000000e+00 : f32
    %51 = vector.shape_cast %48 : vector<10x32x1xi1> to vector<10x32x1xi1>
    %52 = vector.broadcast %51 : vector<10x32x1xi1> to vector<10x32x128xi1>
    %53 = vector.broadcast %cst_22 : f32 to vector<10x32x128xf32>
    %54 = arith.select %52, %50, %53 : vector<10x32x128xi1>, vector<10x32x128xf32>
    %55 = vector.shape_cast %54 : vector<10x32x128xf32> to vector<320x128xf32>
    %c1_i32_23 = arith.constant 1 : i32
    %56 = tpu.dynamic_rotate %55 by %c1_i32_23 dim 0 : vector<320x128xf32>, i32 -> vector<320x128xf32>
    %c319_i32 = arith.constant 319 : i32
    %57 = tpu.dynamic_rotate %55 by %c319_i32 dim 0 : vector<320x128xf32>, i32 -> vector<320x128xf32>
    %58 = tpu.concatenate %56, %55, %57 in 1 : vector<320x128xf32>, vector<320x128xf32>, vector<320x128xf32> -> vector<320x384xf32>
    %59 = vector.extract_strided_slice %58 {offsets = [0, 0], sizes = [256, 384], strides = [1, 1]} : vector<320x384xf32> to vector<256x384xf32>
    %c0_24 = arith.constant 0 : index
    %c0_25 = arith.constant 0 : index
    %c0_26 = arith.constant 0 : index
    %60 = vector.load %arg5[%c0_24, %c0_25, %c0_26] : memref<3x384x128xf32, #tpu.memory_space<vmem>>, vector<1x384x128xf32>
    %61 = vector.shape_cast %60 : vector<1x384x128xf32> to vector<384x128xf32>
    %cst_27 = arith.constant dense<0.000000e+00> : vector<256x128xf32>
    %62 = tpu.matmul %59, %61, %cst_27 {dimension_numbers = #tpu.dot_dimension_numbers<[1], [0], [0], [1], [0, 0, 1, 1], [], []>} : vector<256x384xf32>, vector<384x128xf32>, vector<256x128xf32> -> vector<256x128xf32>
    %63 = vector.extract_strided_slice %58 {offsets = [32, 0], sizes = [256, 384], strides = [1, 1]} : vector<320x384xf32> to vector<256x384xf32>
    %c1_28 = arith.constant 1 : index
    %c0_29 = arith.constant 0 : index
    %c0_30 = arith.constant 0 : index
    %64 = vector.load %arg5[%c1_28, %c0_29, %c0_30] : memref<3x384x128xf32, #tpu.memory_space<vmem>>, vector<1x384x128xf32>
    %65 = vector.shape_cast %64 : vector<1x384x128xf32> to vector<384x128xf32>
    %cst_31 = arith.constant dense<0.000000e+00> : vector<256x128xf32>
    %66 = tpu.matmul %63, %65, %cst_31 {dimension_numbers = #tpu.dot_dimension_numbers<[1], [0], [0], [1], [0, 0, 1, 1], [], []>} : vector<256x384xf32>, vector<384x128xf32>, vector<256x128xf32> -> vector<256x128xf32>
    %67 = arith.addf %62, %66 : vector<256x128xf32>
    %68 = vector.extract_strided_slice %58 {offsets = [64, 0], sizes = [256, 384], strides = [1, 1]} : vector<320x384xf32> to vector<256x384xf32>
    %c2_32 = arith.constant 2 : index
    %c0_33 = arith.constant 0 : index
    %c0_34 = arith.constant 0 : index
    %69 = vector.load %arg5[%c2_32, %c0_33, %c0_34] : memref<3x384x128xf32, #tpu.memory_space<vmem>>, vector<1x384x128xf32>
    %70 = vector.shape_cast %69 : vector<1x384x128xf32> to vector<384x128xf32>
    %cst_35 = arith.constant dense<0.000000e+00> : vector<256x128xf32>
    %71 = tpu.matmul %68, %70, %cst_35 {dimension_numbers = #tpu.dot_dimension_numbers<[1], [0], [0], [1], [0, 0, 1, 1], [], []>} : vector<256x384xf32>, vector<384x128xf32>, vector<256x128xf32> -> vector<256x128xf32>
    %72 = arith.addf %67, %71 : vector<256x128xf32>
    %73 = vector.shape_cast %72 : vector<256x128xf32> to vector<8x32x128xf32>
    %74 = vector.extract_strided_slice %73 {offsets = [0, 8, 0], sizes = [8, 16, 128], strides = [1, 1, 1]} : vector<8x32x128xf32> to vector<8x16x128xf32>
    %75 = vector.extract_strided_slice %9 {offsets = [2, 8, 0], sizes = [8, 16, 128], strides = [1, 1, 1]} : vector<12x32x128xf32> to vector<8x16x128xf32>
    %c0_36 = arith.constant 0 : index
    %c0_37 = arith.constant 0 : index
    %76 = vector.load %arg6[%c0_36, %c0_37] : memref<1x128xf32, #tpu.memory_space<vmem>>, vector<1x128xf32>
    %77 = vector.shape_cast %76 : vector<1x128xf32> to vector<1x1x128xf32>
    %78 = vector.broadcast %77 : vector<1x1x128xf32> to vector<8x16x128xf32>
    %79 = arith.addf %74, %78 : vector<8x16x128xf32>
    %cst_38 = arith.constant 1.000000e+00 : f32
    %80 = vector.broadcast %cst_38 : f32 to vector<8x16x128xf32>
    %81 = arith.mulf %79, %80 : vector<8x16x128xf32>
    %82 = arith.addf %81, %75 : vector<8x16x128xf32>
    %c0_39 = arith.constant 0 : index
    %c0_40 = arith.constant 0 : index
    %c0_41 = arith.constant 0 : index
    %c0_42 = arith.constant 0 : index
    %83 = vector.load %arg7[%c0_39, %c0_40, %c0_41, %c0_42] : memref<1x8x16x128xf32, #tpu.memory_space<vmem>>, vector<1x8x16x128xf32>
    %84 = vector.shape_cast %83 : vector<1x8x16x128xf32> to vector<8x16x128xf32>
    %85 = vector.shape_cast %82 : vector<8x16x128xf32> to vector<1x8x16x128xf32>
    tpu.vector_store %arg7[%c0_39, %c0_40, %c0_41, %c0_42], %85 {strides = array<i32>} : memref<1x8x16x128xf32, #tpu.memory_space<vmem>>, vector<1x8x16x128xf32>,
    return
  }
  func.func @transform_1(%arg0: i32, %arg1: i32) -> (i32, i32, i32) {
    %c0_i32 = arith.constant 0 : i32
    %c0_i32_0 = arith.constant 0 : i32
    %c0_i32_1 = arith.constant 0 : i32
    %c0_i32_2 = arith.constant 0 : i32
    return %c0_i32, %c0_i32_0, %c0_i32_1 : i32, i32, i32
  }
  func.func @transform_2(%arg0: i32, %arg1: i32) -> (i32, i32) {
    %c0_i32 = arith.constant 0 : i32
    %c0_i32_0 = arith.constant 0 : i32
    %c0_i32_1 = arith.constant 0 : i32
    return %c0_i32, %c0_i32_0 : i32, i32
  }
  func.func @transform_3(%arg0: i32, %arg1: i32) -> (i32, i32, i32) {
    %c0_i32 = arith.constant 0 : i32
    %c0_i32_0 = arith.constant 0 : i32
    %c0_i32_1 = arith.constant 0 : i32
    %c0_i32_2 = arith.constant 0 : i32
    return %c0_i32, %c0_i32_0, %c0_i32_1 : i32, i32, i32
  }
  func.func @transform_4(%arg0: i32, %arg1: i32) -> (i32, i32) {
    %c0_i32 = arith.constant 0 : i32
    %c0_i32_0 = arith.constant 0 : i32
    %c0_i32_1 = arith.constant 0 : i32
    return %c0_i32, %c0_i32_0 : i32, i32
  }
  func.func @transform_5(%arg0: i32, %arg1: i32) -> (i32, i32, i32, i32) {
    %c0_i32 = arith.constant 0 : i32
    %c0_i32_0 = arith.constant 0 : i32
    %c0_i32_1 = arith.constant 0 : i32
    return %arg0, %arg1, %c0_i32, %c0_i32_0 : i32, i32, i32, i32
  }
}

</mosaic_0001>

<bundles_post_ra>
// kernel: tpu_custom_call.1
= control target key start
LH: loop header
LB: loop body
LE: loop exit
PB: predicated region body
PF: predicated region fallthrough
CT: control target
= control target key end

     0   :  { %s6842_s0 = inlined_call_operand.hbm [shape: f32[2,20,32,128], index: 0, kind: input, shape index: {}]   ;;  %s6843_s1 = inlined_call_operand.hbm [shape: f32[3,384,128], index: 1, kind: input, shape index: {}]   ;;  %s6844_s2 = inlined_call_operand.vmem [shape: f32[1,128], index: 2, kind: input, shape index: {}]   ;;  %s6845_s3 = inlined_call_operand.hbm [shape: f32[3,384,128], index: 3, kind: input, shape index: {}]   ;;  %s6846_s4 = inlined_call_operand.vmem [shape: f32[1,128], index: 4, kind: input, shape index: {}]   ;;  %s6847_s5 = inlined_call_operand.hbm [shape: f32[2,16,16,128], index: 5, kind: output, shape index: {}]  }
   0x1   :  { %7024 = sst [smem:[#allocation137_spill]] %s6843_s1 }
   0x2   :  { %7025 = sst [smem:[#allocation138_spill]] %s6845_s3 }
   0x3   :  { %10 = vsyncpa [#allocation5], 0 }
   0x4   :  { %11 = vsyncpa [#allocation8], 0 }
   0x5   :  { %12 = vsyncpa [#allocation6], 0 }
   0x6   :  { %14 = vsyncpa [#allocation6 + $0x1], 0  ;;  %s4114_s18 = smov 0   ;;  %s4116_s19 = smov 0  }
   0x7   :  { %s4118_s20 = smov 0   ;;  %s4120_s21 = smov 0  }
   0x8   :  { %s4122_s22 = smov 0   ;;  %s4124_s23 = smov 0  }
   0x9   :  { %s4126_s24 = smov 0   ;;  %s4128_s25 = smov 0  }
   0xa LB: > { %7026 = sst [smem:[#allocation18_spill]] %s4070_s24  ;;  %s3609_s26 = sadd.s32 4294967295, %s4074_s25   ;;  %s4074_s25 = sphi %s4128_s25, %s20_s25   ;;  %s4070_s24 = sphi %s4126_s24, %s7529_s24   ;;  %s4066_s23 = sphi %s4124_s23, %s7534_s23   ;;  %s4062_s22 = sphi %s4122_s22, %s7527_s22   ;;  %s4058_s21 = sphi %s4120_s21, %s7533_s21   ;;  %s4054_s20 = sphi %s4118_s20, %s7532_s20   ;;  %s4050_s19 = sphi %s4116_s19, %s7531_s19   ;;  %s4046_s18 = sphi %s4114_s18, %s7530_s18  }
   0xb   : > { %s3610_s27 = sadd.s32 4294967294, %s4074_s25   ;;  %s29_s28 = sadd.s32 1, %s4066_s23 }
   0xc   : > { %s32_s29 = sadd.s32 1, %s4070_s24  ;;  %p30_p0 = scmp.ge.s32.totalorder %s29_s28, 2 }
   0xd   : > { %s125_s30 = sadd.s32 1, %s4054_s20  ;;  %p135_p1 = scmp.ne.s32.totalorder %s4054_s20, %s4050_s19 }
   0xe   : > { %p136_p2 = scmp.eq.s32.totalorder %s3609_s26, 3  ;;  %s7536_s28 = smov (%p30_p0, %s29_s28), 0 }
   0xf   : > { %7027 = sst [smem:[#allocation19_spill]] %s7536_s28  ;;  %s7538_s29 = smov (!%p30_p0, %s32_s29), %s4070_s24 }
  0x10   : > { %s121_s6 = ssub.s32 %s4066_s23, %s7536_s28  ;;  %p4166_p3 = por %p136_p2, %p135_p1 }
  0x11   : > { %p34_p4 = scmp.ge.s32.totalorder %s7538_s29, 2  ;;  %p141_p5 = scmp.ne.s32.totalorder %s4050_s19, %s4046_s18 }
  0x12   : > { %p142_p6 = scmp.eq.s32.totalorder %s3610_s27, 3  ;;  %p3611_p7 = scmp.ge.s32.totalorder %s4074_s25, 1 }
  0x13   : > { %s7540_s29 = smov (%p34_p4, %s7538_s29), 0  ;;  %p149_p9 = scmp.lt.s32.totalorder %s4074_s25, 5 }
  0x14   : > { %7029 = sst [smem:[#allocation20_spill]] %s7540_s29  ;;  %p4175_p8 = por %p142_p6, %p141_p5 }
  0x15   : > { %s120_s9 = ssub.s32 %s4070_s24, %s7540_s29  ;;  %p4182_p10 = pnand %p3611_p7, %p149_p9 }
  0x16   : > { %s122_s10 = sor.u32 %s121_s6, %s120_s9  ;;  %p4186_p12 = scmp.eq.s32.totalorder %s3609_s26, 0 }
  0x17   : > { %p123_p11 = scmp.eq.s32.totalorder %s122_s10, 0  ;;  %p3737_p13 = pneg %p4182_p10 }
  0x18   : > { %s7033_s1 = sld [smem:[#allocation137_spill]]  ;;  %s4076_s17 = smov [#allocation4]  }
  0x19   : > { %s4196_s16 = scalar_select %p123_p11, %s4054_s20, %s125_s30  }
  0x1a   : > { %s162_s27 = sshll.u32 %s4076_s17, 4  ;;  %p3738_p0 = pnand %p4186_p12, %p3737_p13  ;;  %s163_s27 = int_to_ptr.vmem [resolvable:$true] %s162_s27 }
  0x1b   : > { %s4077_s6 = smov 128   ;;  %s4078_s26 = smov 8  }
  0x1c   : > { %s7034_s3 = sld [smem:[#allocation138_spill]]  ;;  %s4079_s28 = smov [#allocation7]  }
  0x1d   : > { %s179_s24 = sshll.u32 %s4079_s28, 4  ;;  %s180_s24 = int_to_ptr.vmem [resolvable:$true] %s179_s24 }
  0x1e   : > { %s160_s15 = sshll.u32 %s7033_s1, 4  ;;  %s161_s15 = int_to_ptr.hbm [resolvable:$true] %s160_s15 }
  0x1f   : > { %3740 = dma.hbm_to_vmem [thread:$0]  (!%p3738_p0), %s161_s15, 18432, %s163_s27, [#allocation5], %s4077_s6, %s4077_s6, %s4078_s26  }
  0x20   : > { %198 = sbr.rel (%p4182_p10) target bundleno = 1872 (0x750), region = 36 }
  0x22   : > { %s177_s29 = sshll.u32 %s7034_s3, 4  ;;  %s178_s29 = int_to_ptr.hbm [resolvable:$true] %s177_s29 }
  0x23   : > { %3743 = dma.hbm_to_vmem [thread:$0]  (!%p3738_p0), %s178_s29, 18432, %s180_s24, [#allocation8], %s4077_s6, %s4077_s6, %s4078_s26  }
  0x25   : > { %4031 = dma.done.wait (%p4186_p12), [#allocation5], 18432  }
  0x26   : > { %4033 = vsyncadd (%p4186_p12), [#allocation5], 4294948864 }
  0x27   : > { %4035 = dma.done.wait (%p4186_p12), [#allocation8], 18432  }
  0x28   : > { %4037 = vsyncadd (%p4186_p12), [#allocation8], 4294948864  ;;  %s6851_s24 = sand.u32 1, %s4050_s19   ;;  %s3677_s30 = sshll.u32 %s4058_s21, 8 }
  0x29   : > { %s3617_s29 = sshll.u32 %s6851_s24, 7  ;;  %s228_s11 = smul.u32 640, %s4062_s22 }
  0x2a   : > { %s4080_s14 = smov [#allocation2]   ;;  %s3950_s24 = scalar_lea.hbm %s6842_s0, 1280 }
  0x2b   : > { %s229_s13 = sadd.s32 %s3677_s30, %s228_s11  ;;  %s240_s15 = sshll.u32 %s4080_s14, 4  ;;  %s241_s15 = int_to_ptr.vmem [resolvable:$true] %s240_s15 }
  0x2c   : > { %s230_s6 = scalar_lea.hbm %s6842_s0, %s229_s13 }
  0x2d   : > { %s238_s12 = sshll.u32 %s230_s6, 4  ;;  %s239_s12 = int_to_ptr.hbm [resolvable:$true] %s238_s12 }
  0x2e   : > { %s3946_s26 = sshra.s32 %s239_s12, 4  ;;  %s3947_s26 = int_to_ptr.hbm [resolvable:$true] %s3946_s26 }
  0x2f   : > { %s3948_s9 = scalar_lea.hbm %s3947_s26, 384  ;;  %p3951_p2 = scmp.lt.s32.totalorder %s3947_s26, %s6842_s0 }
  0x30   : > { %p3949_p1 = scmp.ne.s32.totalorder %s3947_s26, %s3948_s9  ;;  %p3952_p4 = scmp.lt.s32.totalorder %s3950_s24, %s3948_s9 }
  0x32   : > { %p3953_p5 = por %p3952_p4, %p3951_p2 }
  0x34   : > { %p3954_p6 = pnand %p3953_p5, %p3949_p1 }
  0x36   : > { %3957 = shalt.err (!%p3954_p6)  }
  0x37   : > { %243 = dma.hbm_to_vmem [thread:$0]  %s239_s12, 6144, %s241_s15, [#allocation3] }
  0x38   : > { %s4228_s30 = scalar_lea.vmem [#allocation9], %s3617_s29 }
  0x39   : > { %4038 = dma.done.wait [#allocation3], 6144 }
  0x3a   : > { %4039 = vsyncadd [#allocation3], 4294961152  ;;  %v556_v0 = vld [vmem:[#allocation4 + $0x1f8] sm:$0xff]  ;;  %v555_v2 = vld [vmem:[#allocation4 + $0x1f0] sm:$0xff]  ;;  %v344_v22 = vlaneseq  ;;  %s7242_s24 = sshll.u32 %s4058_s21, 3  ;;  %s3678_s15 = sshll.u32 %s4058_s21, 4 }
  0x3b   : > { %v4230_v1 = vld [vmem:[#allocation4 + $0x278] sm:$0xff]  ;;  %589 = vmatpush.msra.mxu0 %v556_v0  ;;  %3679 = vmatpush.msra.mxu3 %v556_v0  ;;  %v4232_v3 = vld [vmem:[#allocation4 + $0x270] sm:$0xff]  ;;  %v554_v4 = vld [vmem:[#allocation4 + $0x1e8] sm:$0xff]  ;;  %s3620_s28 = sadd.s32 4294967295, %s7242_s24  ;;  %s3672_s17 = sshll.u32 %s4062_s22, 5 }
  0x3c   : > { %726 = vmatpush.msra.mxu1 %v4230_v1  ;;  %v4235_v5 = vld [vmem:[#allocation4 + $0x268] sm:$0xff]  ;;  %v553_v6 = vld [vmem:[#allocation4 + $0x1e0] sm:$0xff]  ;;  %v552_v8 = vld [vmem:[#allocation4 + $0x1d8] sm:$0xff]  ;;  %v4272_v30 = vshrl.u32 %v344_v22, 7  ;;  %s3507_s27 = sadd.s32 %s3678_s15, %s3672_s17  ;;  %s3510_s26 = sshll.u32 %s4228_s30, 4  ;;  %s3511_s26 = int_to_ptr.vmem [resolvable:$true] %s3510_s26 }
  0x3d   : > { %590 = vmatpush.msra.mxu0 %v555_v2  ;;  %3680 = vmatpush.msra.mxu3 %v555_v2  ;;  %v4238_v7 = vld [vmem:[#allocation4 + $0x260] sm:$0xff]  ;;  %v4241_v9 = vld [vmem:[#allocation4 + $0x258] sm:$0xff]  ;;  %v551_v10 = vld [vmem:[#allocation4 + $0x1d0] sm:$0xff]  ;;  %s3673_s6 = sshll.u32 %s3507_s27, 3  ;;  %s7526_s10 = sand.u32 1, %s4050_s19  }
  0x3e   : > { %727 = vmatpush.msra.mxu1 %v4232_v3  ;;  %v4244_v11 = vld [vmem:[#allocation4 + $0x250] sm:$0xff]  ;;  %v550_v12 = vld [vmem:[#allocation4 + $0x1c8] sm:$0xff]  ;;  %v549_v14 = vld [vmem:[#allocation4 + $0x1c0] sm:$0xff]  ;;  %7035 = vst [vmem:[#allocation21_spill] sm:$0xff] %v4272_v30  ;;  %vm346_vm0 = vcmp.lt.s32.totalorder %v4272_v30, 1  ;;  %vm443_vm1 = vcmp.lt.s32.totalorder %v4272_v30, 7  ;;  %s3509_s22 = scalar_lea.hbm %s6847_s5, %s3673_s6 }
  0x3f   : > { %591 = vmatpush.msra.mxu0 %v554_v4  ;;  %3681 = vmatpush.msra.mxu3 %v554_v4  ;;  %v4247_v13 = vld [vmem:[#allocation4 + $0x248] sm:$0xff]  ;;  %v4250_v15 = vld [vmem:[#allocation4 + $0x2f8] sm:$0xff]  ;;  %v4252_v16 = vld [vmem:[#allocation4 + $0x240] sm:$0xff]  ;;  %s3512_s9 = sshll.u32 %s3509_s22, 4  ;;  %s3495_s1 = scalar_lea.sflag [#allocation6], %s7526_s10  ;;  %s3513_s9 = int_to_ptr.hbm [resolvable:$true] %s3512_s9 }
  0x40   : > { %728 = vmatpush.msra.mxu1 %v4235_v5  ;;  %v548_v17 = vld [vmem:[#allocation4 + $0x1b8] sm:$0xff]  ;;  %3711 = vmatpush.msra.mxu2 %v4250_v15  ;;  %v547_v19 = vld [vmem:[#allocation4 + $0x1b0] sm:$0xff]  ;;  %v546_v21 = vld [vmem:[#allocation4 + $0x1a8] sm:$0xff]  ;;  %s3984_s3 = sshra.s32 %s3513_s9, 4  ;;  %s3990_s11 = scalar_lea.hbm %s6847_s5, 512  ;;  %s3985_s3 = int_to_ptr.hbm [resolvable:$true] %s3984_s3 }
  0x41   : > { %592 = vmatpush.msra.mxu0 %v553_v6  ;;  %3682 = vmatpush.msra.mxu3 %v553_v6  ;;  %v4256_v18 = vld [vmem:[#allocation4 + $0x238] sm:$0xff]  ;;  %v4259_v20 = vld [vmem:[#allocation4 + $0x230] sm:$0xff]  ;;  %v4262_v24 = vld [vmem:[#allocation4 + $0x228] sm:$0xff]  ;;  %s3986_s24 = scalar_lea.hbm %s3985_s3, 128  ;;  %p3991_p11 = scmp.lt.s32.totalorder %s3985_s3, %s6847_s5 }
  0x42   : > { %729 = vmatpush.msra.mxu1 %v4238_v7  ;;  %v587_v23 = vld [vmem:[#allocation4 + $0x2f0] sm:$0xff]  ;;  %v545_v25 = vld [vmem:[#allocation4 + $0x1a0] sm:$0xff]  ;;  %v544_v27 = vld [vmem:[#allocation4 + $0x198] sm:$0xff]  ;;  %p3987_p7 = scmp.ne.s32.totalorder %s3985_s3, %s3986_s24  ;;  %p3992_p12 = scmp.lt.s32.totalorder %s3990_s11, %s3986_s24 }
  0x43   : > { %593 = vmatpush.msra.mxu0 %v552_v8  ;;  %3683 = vmatpush.msra.mxu3 %v552_v8  ;;  %v4265_v26 = vld [vmem:[#allocation4 + $0x220] sm:$0xff]  ;;  %v4268_v28 = vld [vmem:[#allocation2 + $0x18] sm:$0xff]  ;;  %v543_v34 = vld [vmem:[#allocation4 + $0x190] sm:$0xff] }
  0x44   : > { %730 = vmatpush.msra.mxu1 %v4241_v9  ;;  %3712 = vmatpush.msra.mxu2 %v587_v23  ;;  %v4270_v29 = vld [vmem:[#allocation2 + $0x20] sm:$0xff]  ;;  %v4274_v31 = vld [vmem:[#allocation4 + $0x218] sm:$0xff]  ;;  %v4281_v35 = vld [vmem:[#allocation4 + $0x210] sm:$0xff]  ;;  %v6855_v36 = vrot.slane %v4268_v28, 7  ;;  %p3988_p9 = pnand %p3987_p7, %p4166_p3  ;;  %p3993_p13 = por %p3992_p12, %p3991_p11 }
  0x45   : > { %594 = vmatpush.msra.mxu0 %v551_v10  ;;  %3684 = vmatpush.msra.mxu3 %v551_v10  ;;  %v4276_v32 = vld [vmem:[#allocation2 + $0x138] sm:$0xff]  ;;  %v4278_v33 = vld [vmem:[#allocation2 + $0x140] sm:$0xff]  ;;  %v300_v37 = vrot.slane %v4270_v29, 7  ;;  %v542_v38 = vld [vmem:[#allocation4 + $0x188] sm:$0xff] }
  0x46   : > { %731 = vmatpush.msra.mxu1 %v4244_v11  ;;  %v6854_v39 = vrot.slane %v4276_v32, 7  ;;  %v336_v40 = vrot.slane %v4278_v33, 7  ;;  %v4289_v41 = vld [vmem:[#allocation4 + $0x208] sm:$0xff]  ;;  %v541_v42 = vld [vmem:[#allocation4 + $0x180] sm:$0xff]  ;;  %v4329_v53 = vld [vmem:[#allocation2 + $0x30] sm:$0xff]  ;;  %p3989_p10 = pneg %p3988_p9 }
  0x47   : > { %595 = vmatpush.msra.mxu0 %v550_v12  ;;  %3685 = vmatpush.msra.mxu3 %v550_v12  ;;  %v4292_v43 = vld [vmem:[#allocation4 + $0x200] sm:$0xff]  ;;  %v4298_v44 = vsel %vm346_vm0, %v6855_v36, %v300_v37  ;;  %v4307_v46 = vld [vmem:[#allocation2 + $0x28] sm:$0xff]  ;;  %v4331_v54 = vld [vmem:[#allocation2 + $0x150] sm:$0xff]  ;;  %v302_v55 = vrot.slane %v4329_v53, 7 }
  0x48   : > { %732 = vmatpush.msra.mxu1 %v4247_v13  ;;  %v4305_v45 = vsel %vm346_vm0, %v6854_v39, %v336_v40  ;;  %v4309_v47 = vld [vmem:[#allocation2 + $0x148] sm:$0xff]  ;;  %v301_v48 = vrot.slane %v4307_v46, 7  ;;  %v338_v56 = vrot.slane %v4331_v54, 7  ;;  %v4350_v59 = vld [vmem:[#allocation2 + $0x38] sm:$0xff]  ;;  %v585_v62 = vld [vmem:[#allocation4 + $0x2e0] sm:$0xff]  ;;  %p3994_p0 = pnand %p3993_p13, %p3989_p10 }
  0x49   : > { %596 = vmatpush.msra.mxu0 %v549_v14  ;;  %3686 = vmatpush.msra.mxu3 %v549_v14  ;;  %7036 = vst [vmem:[#allocation22_spill] sm:$0xff] %v4305_v45  ;;  %v586_v49 = vld [vmem:[#allocation4 + $0x2e8] sm:$0xff]  ;;  %v337_v50 = vrot.slane %v4309_v47, 7  ;;  %v4352_v60 = vld [vmem:[#allocation2 + $0x158] sm:$0xff]  ;;  %v303_v61 = vrot.slane %v4350_v59, 7  ;;  %v4373_v4 = vld [vmem:[#allocation2 + $0x40] sm:$0xff] }
  0x4a   : > { %733 = vmatpush.msra.mxu1 %v4252_v16  ;;  %3713 = vmatpush.msra.mxu2 %v586_v49  ;;  %v4322_v51 = vsel %vm346_vm0, %v300_v37, %v301_v48  ;;  %v4343_v57 = vsel %vm346_vm0, %v301_v48, %v302_v55  ;;  %v584_v63 = vld [vmem:[#allocation4 + $0x2d8] sm:$0xff]  ;;  %v6852_v0 = vrot.slane %v4352_v60, 7  ;;  %v304_v6 = vrot.slane %v4373_v4, 7  ;;  %v4387_v10 = vld [vmem:[#allocation2 + $0xf0] sm:$0xff]  ;;  %v578_v14 = vld [vmem:[#allocation4 + $0x2a8] sm:$0xff] }
  0x4b   : > { %597 = vmatpush.msra.mxu0 %v548_v17  ;;  %3687 = vmatpush.msra.mxu3 %v548_v17  ;;  %v4327_v52 = vsel %vm346_vm0, %v336_v40, %v337_v50  ;;  %v4348_v58 = vsel %vm346_vm0, %v337_v50, %v338_v56  ;;  %v4364_v2 = vsel %vm346_vm0, %v302_v55, %v303_v61  ;;  %v580_v8 = vld [vmem:[#allocation4 + $0x2b8] sm:$0xff]  ;;  %v579_v12 = vld [vmem:[#allocation4 + $0x2b0] sm:$0xff]  ;;  %v4445_v48 = vld [vmem:[#allocation2 + $0x108] sm:$0xff] }
  0x4c   : > { %734 = vmatpush.msra.mxu1 %v4256_v18  ;;  %7037 = vst [vmem:[#allocation23_spill] sm:$0xff] %v4327_v52  ;;  %3714 = vmatpush.msra.mxu2 %v585_v62  ;;  %v576_v17 = vld [vmem:[#allocation4 + $0x298] sm:$0xff]  ;;  %v4450_v50 = vld [vmem:[#allocation2 + $0xa8] sm:$0xff]  ;;  %v504_v39 = vld [vmem:[#allocation4 + $0x60] sm:$0xff] }
  0x4d   : > { %598 = vmatpush.msra.mxu0 %v547_v19  ;;  %3688 = vmatpush.msra.mxu3 %v547_v19  ;;  %7038 = vst [vmem:[#allocation24_spill] sm:$0xff] %v4348_v58  ;;  %v4402_v19 = vld [vmem:[#allocation2 + $0x50] sm:$0xff]  ;;  %v4406_v22 = vld [vmem:[#allocation2 + $0x98] sm:$0xff]  ;;  %v416_v55 = vrot.slane %v4450_v50, 1  ;;  %v4525_v36 = vld [vmem:[#allocation2 + $0x128] sm:$0xff] }
  0x4e   : > { %735 = vmatpush.msra.mxu1 %v4259_v20  ;;  %3715 = vmatpush.msra.mxu2 %v584_v63  ;;  %v4427_v37 = vld [vmem:[#allocation2 + $0x58] sm:$0xff] }
  0x4f   : > { %599 = vmatpush.msra.mxu0 %v546_v21  ;;  %3689 = vmatpush.msra.mxu3 %v546_v21  ;;  %v4404_v21 = vld [vmem:[#allocation2 + $0x90] sm:$0xff]  ;;  %7042 = vst [vmem:[#allocation28_spill] sm:$0xff] %v4427_v37 }
  0x50   : > { %736 = vmatpush.msra.mxu1 %v4262_v24  ;;  %7040 = vst [vmem:[#allocation26_spill] sm:$0xff] %v4404_v21 }
  0x51   : > { %600 = vmatpush.msra.mxu0 %v545_v25  ;;  %3690 = vmatpush.msra.mxu3 %v545_v25  ;;  %v306_v25 = vrot.slane %v4402_v19, 7 }
  0x52   : > { %737 = vmatpush.msra.mxu1 %v4265_v26 }
  0x53   : > { %601 = vmatpush.msra.mxu0 %v544_v27  ;;  %3691 = vmatpush.msra.mxu3 %v544_v27  ;;  %v573_v27 = vld [vmem:[#allocation4 + $0x280] sm:$0xff] }
  0x54   : > { %738 = vmatpush.msra.mxu1 %v4274_v31 }
  0x55   : > { %602 = vmatpush.msra.mxu0 %v543_v34  ;;  %3692 = vmatpush.msra.mxu3 %v543_v34 }
  0x56   : > { %739 = vmatpush.msra.mxu1 %v4281_v35 }
  0x57   : > { %603 = vmatpush.msra.mxu0 %v542_v38  ;;  %3693 = vmatpush.msra.mxu3 %v542_v38  ;;  %v4430_v38 = vld [vmem:[#allocation2 + $0xa0] sm:$0xff] }
  0x58   : > { %740 = vmatpush.msra.mxu1 %v4289_v41  ;;  %v415_v40 = vrot.slane %v4430_v38, 1 }
  0x59   : > { %604 = vmatpush.msra.mxu0 %v541_v42  ;;  %3694 = vmatpush.msra.mxu3 %v541_v42 }
  0x5a   : > { %741 = vmatpush.msra.mxu1 %v4292_v43  ;;  %605 = vmatmul.f32.vlgmr.msra.gmra.mxu0 %v4298_v44 }
  0x5b   : > { %713 = vmatmul.f32.vlgmr.msra.gmra.mxu3 %v4305_v45  ;;  %742 = vmatmul.f32.vlgmr.msra.gmra.mxu1 %v4270_v29  ;;  %v4545_v45 = vld [vmem:[#allocation2 + $0x130] sm:$0xff] }
  0x5c   : > { %863 = vmatpush.msrb.mxu0 %v4250_v15  ;;  %3695 = vmatpush.msrb.mxu3 %v4230_v1  ;;  %v583_v1 = vld [vmem:[#allocation4 + $0x2d0] sm:$0xff]  ;;  %v577_v15 = vld [vmem:[#allocation4 + $0x2a0] sm:$0xff] }
  0x5d   : > { %3716 = vmatpush.msra.mxu2 %v583_v1 }
  0x5e   : > { %3696 = vmatpush.msrb.mxu3 %v4232_v3  ;;  %864 = vmatpush.msrb.mxu0 %v587_v23  ;;  %v4371_v3 = vsel %vm346_vm0, %v338_v56, %v6852_v0  ;;  %v6853_v23 = vrot.slane %v4404_v21, 1 }
  0x5f   : > { %7039 = vst [vmem:[#allocation25_spill] sm:$0xff] %v4371_v3 }
  0x60   : > { %3697 = vmatpush.msrb.mxu3 %v4235_v5  ;;  %865 = vmatpush.msrb.mxu0 %v586_v49  ;;  %v582_v5 = vld [vmem:[#allocation4 + $0x2c8] sm:$0xff]  ;;  %v4447_v49 = vld [vmem:[#allocation2 + $0x60] sm:$0xff] }
  0x61   : > { %3717 = vmatpush.msra.mxu2 %v582_v5  ;;  %7044 = vst [vmem:[#allocation30_spill] sm:$0xff] %v4447_v49  ;;  %v308_v56 = vrot.slane %v4447_v49, 7 }
  0x62   : > { %3698 = vmatpush.msrb.mxu3 %v4238_v7  ;;  %608 = vmatmul.f32.gmra.mxu0 %v4322_v51  ;;  %v581_v7 = vld [vmem:[#allocation4 + $0x2c0] sm:$0xff] }
  0x63   : > { %716 = vmatmul.f32.gmra.mxu3 %v4327_v52  ;;  %745 = vmatmul.f32.gmra.mxu1 %v4307_v46 }
  0x64   : > { %3699 = vmatpush.msrb.mxu3 %v4241_v9  ;;  %866 = vmatpush.msrb.mxu0 %v585_v62  ;;  %v4384_v9 = vsel %vm346_vm0, %v303_v61, %v304_v6  ;;  %v4459_v61 = vsel %vm443_vm1, %v415_v40, %v416_v55 }
  0x65   : > { %3718 = vmatpush.msra.mxu2 %v581_v7  ;;  %7045 = vst [vmem:[#allocation31_spill] sm:$0xff] %v4459_v61 }
  0x66   : > { %3700 = vmatpush.msrb.mxu3 %v4244_v11  ;;  %867 = vmatpush.msrb.mxu0 %v584_v63  ;;  %v4389_v11 = vld [vmem:[#allocation2 + $0x48] sm:$0xff]  ;;  %v4465_v63 = vld [vmem:[#allocation2 + $0x110] sm:$0xff] }
  0x67   : > { %3719 = vmatpush.msra.mxu2 %v580_v8 }
  0x68   : > { %3701 = vmatpush.msrb.mxu3 %v4247_v13  ;;  %868 = vmatpush.msrb.mxu0 %v583_v1  ;;  %v305_v13 = vrot.slane %v4389_v11, 7  ;;  %v4467_v1 = vld [vmem:[#allocation2 + $0x68] sm:$0xff] }
  0x69   : > { %3720 = vmatpush.msra.mxu2 %v579_v12  ;;  %7046 = vst [vmem:[#allocation32_spill] sm:$0xff] %v4467_v1 }
  0x6a   : > { %3702 = vmatpush.msrb.mxu3 %v4252_v16  ;;  %611 = vmatmul.f32.gmra.mxu0 %v4343_v57  ;;  %v4398_v16 = vsel %vm346_vm0, %v304_v6, %v305_v13  ;;  %v4423_v34 = vsel %vm346_vm0, %v305_v13, %v306_v25  ;;  %v4485_v13 = vld [vmem:[#allocation2 + $0x118] sm:$0xff] }
  0x6b   : > { %719 = vmatmul.f32.gmra.mxu3 %v4348_v58  ;;  %748 = vmatmul.f32.gmra.mxu1 %v4329_v53  ;;  %v4530_v58 = vld [vmem:[#allocation2 + $0xc8] sm:$0xff] }
  0x6c   : > { %3703 = vmatpush.msrb.mxu3 %v4256_v18  ;;  %869 = vmatpush.msrb.mxu0 %v582_v5  ;;  %v4400_v18 = vld [vmem:[#allocation2 + $0xf8] sm:$0xff]  ;;  %v4470_v5 = vld [vmem:[#allocation2 + $0xb0] sm:$0xff] }
  0x6d   : > { %3721 = vmatpush.msra.mxu2 %v578_v14  ;;  %v417_v6 = vrot.slane %v4470_v5, 1 }
  0x6e   : > { %3704 = vmatpush.msrb.mxu3 %v4259_v20  ;;  %870 = vmatpush.msrb.mxu0 %v581_v7  ;;  %v575_v20 = vld [vmem:[#allocation4 + $0x290] sm:$0xff]  ;;  %v309_v7 = vrot.slane %v4467_v1, 7 }
  0x6f   : > { %3722 = vmatpush.msra.mxu2 %v577_v15 }
  0x70   : > { %3705 = vmatpush.msrb.mxu3 %v4262_v24  ;;  %871 = vmatpush.msrb.mxu0 %v580_v8  ;;  %v414_v24 = vrot.slane %v4406_v22, 1  ;;  %v4479_v8 = vsel %vm443_vm1, %v416_v55, %v417_v6 }
  0x71   : > { %3723 = vmatpush.msra.mxu2 %v576_v17  ;;  %7047 = vst [vmem:[#allocation33_spill] sm:$0xff] %v4479_v8 }
  0x72   : > { %3706 = vmatpush.msrb.mxu3 %v4265_v26  ;;  %614 = vmatmul.f32.gmra.mxu0 %v4364_v2  ;;  %v574_v26 = vld [vmem:[#allocation4 + $0x288] sm:$0xff]  ;;  %v4439_v42 = vsel %vm443_vm1, %v414_v24, %v415_v40  ;;  %v4510_v40 = vld [vmem:[#allocation2 + $0xc0] sm:$0xff] }
  0x73   : > { %722 = vmatmul.f32.gmra.mxu3 %v4371_v3  ;;  %751 = vmatmul.f32.gmra.mxu1 %v4350_v59  ;;  %7043 = vst [vmem:[#allocation29_spill] sm:$0xff] %v4439_v42  ;;  %v4527_v3 = vld [vmem:[#allocation2 + $0x80] sm:$0xff] }
  0x74   : > { %3707 = vmatpush.msrb.mxu3 %v4274_v31  ;;  %872 = vmatpush.msrb.mxu0 %v579_v12  ;;  %v4419_v31 = vsel %vm443_vm1, %v6853_v23, %v414_v24  ;;  %v4483_v12 = vsel %vm346_vm0, %v308_v56, %v309_v7  ;;  %7052 = vst [vmem:[#allocation38_spill] sm:$0xff] %v4527_v3 }
  0x75   : > { %3724 = vmatpush.msra.mxu2 %v575_v20  ;;  %7041 = vst [vmem:[#allocation27_spill] sm:$0xff] %v4419_v31 }
  0x76   : > { %3708 = vmatpush.msrb.mxu3 %v4281_v35  ;;  %873 = vmatpush.msrb.mxu0 %v578_v14  ;;  %v4425_v35 = vld [vmem:[#allocation2 + $0x100] sm:$0xff]  ;;  %v4487_v14 = vld [vmem:[#allocation2 + $0x70] sm:$0xff] }
  0x77   : > { %3725 = vmatpush.msra.mxu2 %v574_v26  ;;  %7048 = vst [vmem:[#allocation34_spill] sm:$0xff] %v4487_v14 }
  0x78   : > { %3709 = vmatpush.msrb.mxu3 %v4289_v41  ;;  %874 = vmatpush.msrb.mxu0 %v577_v15  ;;  %v307_v41 = vrot.slane %v4427_v37, 7  ;;  %v4490_v15 = vld [vmem:[#allocation2 + $0xb8] sm:$0xff] }
  0x79   : > { %3726 = vmatpush.msra.mxu2 %v573_v27 }
  0x7a   : > { %3710 = vmatpush.msrb.mxu3 %v4292_v43  ;;  %617 = vmatmul.f32.gmra.mxu0 %v4384_v9  ;;  %v4443_v43 = vsel %vm346_vm0, %v306_v25, %v307_v41  ;;  %v4463_v62 = vsel %vm346_vm0, %v307_v41, %v308_v56  ;;  %v419_v41 = vrot.slane %v4510_v40, 1  ;;  %v507_v56 = vld [vmem:[#allocation4 + $0x78] sm:$0xff] }
  0x7b   : > { %754 = vmatmul.f32.gmra.mxu1 %v4373_v4  ;;  %820 = vmatmul.f32.vlgmr.msrb.gmra.mxu3 %v4387_v10 }
  0x7c   : > { %875 = vmatpush.msrb.mxu0 %v576_v17  ;;  %921 = vmatmul.f32.vlgmr.msra.gmra.mxu2 %v4419_v31  ;;  %v418_v17 = vrot.slane %v4490_v15, 1  ;;  %v492_v31 = vld [vmem:[#allocation4] sm:$0xff] }
  0x7d   : > { %1000 = vmatpush.msra.mxu3 %v507_v56  ;;  %v503_v56 = vld [vmem:[#allocation4 + $0x58] sm:$0xff] }
  0x7e   : > { %876 = vmatpush.msrb.mxu0 %v575_v20  ;;  %v310_v20 = vrot.slane %v4487_v14, 7  ;;  %v4499_v24 = vsel %vm443_vm1, %v417_v6, %v418_v17  ;;  %v506_v6 = vld [vmem:[#allocation4 + $0x70] sm:$0xff]  ;;  %v4519_v0 = vsel %vm443_vm1, %v418_v17, %v419_v41  ;;  %v420_v17 = vrot.slane %v4530_v58, 1 }
  0x7f   : > { %7049 = vst [vmem:[#allocation35_spill] sm:$0xff] %v4499_v24  ;;  %1001 = vmatpush.msra.mxu3 %v506_v6  ;;  %v502_v6 = vld [vmem:[#allocation4 + $0x50] sm:$0xff] }
  0x80   : > { %877 = vmatpush.msrb.mxu0 %v574_v26  ;;  %v4503_v25 = vsel %vm346_vm0, %v309_v7, %v310_v20  ;;  %v4505_v26 = vld [vmem:[#allocation2 + $0x120] sm:$0xff]  ;;  %v505_v7 = vld [vmem:[#allocation4 + $0x68] sm:$0xff]  ;;  %7051 = vst [vmem:[#allocation37_spill] sm:$0xff] %v4519_v0 }
  0x81   : > { %1002 = vmatpush.msra.mxu3 %v505_v7  ;;  %v4539_v7 = vsel %vm443_vm1, %v419_v41, %v420_v17 }
  0x82   : > { %620 = vmatmul.f32.gmra.mxu0 %v4398_v16  ;;  %7053 = vst [vmem:[#allocation39_spill] sm:$0xff] %v4539_v7 }
  0x83   : > { %757 = vmatmul.f32.gmra.mxu1 %v4389_v11  ;;  %823 = vmatmul.f32.gmra.mxu3 %v4400_v18 }
  0x84   : > { %878 = vmatpush.msrb.mxu0 %v573_v27  ;;  %924 = vmatmul.f32.gmra.mxu2 %v4439_v42  ;;  %v4507_v27 = vld [vmem:[#allocation2 + $0x78] sm:$0xff] }
  0x85   : > { %7050 = vst [vmem:[#allocation36_spill] sm:$0xff] %v4507_v27  ;;  %v311_v55 = vrot.slane %v4507_v27, 7  ;;  %1003 = vmatpush.msra.mxu3 %v504_v39  ;;  %v501_v39 = vld [vmem:[#allocation4 + $0x48] sm:$0xff]  ;;  %v4566_v42 = vld [vmem:[#allocation2 + $0xd8] sm:$0xff] }
  0x87   : > { %v4523_v23 = vsel %vm346_vm0, %v310_v20, %v311_v55  ;;  %v312_v20 = vrot.slane %v4527_v3, 7  ;;  %1004 = vmatpush.msra.mxu3 %v503_v56  ;;  %v499_v56 = vld [vmem:[#allocation4 + $0x38] sm:$0xff] }
  0x89   : > { %1005 = vmatpush.msra.mxu3 %v502_v6  ;;  %v4543_v52 = vsel %vm346_vm0, %v311_v55, %v312_v20  ;;  %v498_v6 = vld [vmem:[#allocation4 + $0x30] sm:$0xff] }
  0x8a   : > { %623 = vmatmul.f32.gmra.mxu0 %v4423_v34 }
  0x8b   : > { %760 = vmatmul.f32.gmra.mxu1 %v4402_v19  ;;  %826 = vmatmul.f32.gmra.mxu3 %v4425_v35 }
  0x8c   : > { %927 = vmatmul.f32.gmra.mxu2 %v4459_v61  ;;  %1006 = vmatpush.msra.mxu3 %v501_v39  ;;  %v496_v61 = vld [vmem:[#allocation4 + $0x20] sm:$0xff] }
  0x92   : > { %626 = vmatmul.f32.gmra.mxu0 %v4443_v43 }
  0x93   : > { %763 = vmatmul.f32.gmra.mxu1 %v4427_v37  ;;  %829 = vmatmul.f32.gmra.mxu3 %v4445_v48 }
  0x94   : > { %930 = vmatmul.f32.gmra.mxu2 %v4479_v8  ;;  %v4550_v8 = vld [vmem:[#allocation2 + $0xd0] sm:$0xff] }
  0x95   : > { %v421_v41 = vrot.slane %v4550_v8, 1 }
  0x97   : > { %v4559_v39 = vsel %vm443_vm1, %v420_v17, %v421_v41  ;;  %v314_v17 = vrot.slane %v4404_v21, 7 }
  0x98   : > { %7055 = vst [vmem:[#allocation41_spill] sm:$0xff] %v4559_v39 }
  0x9a   : > { %629 = vmatmul.f32.gmra.mxu0 %v4463_v62 }
  0x9b   : > { %766 = vmatmul.f32.gmra.mxu1 %v4447_v49  ;;  %832 = vmatmul.f32.gmra.mxu3 %v4465_v63  ;;  %v4661_v49 = vld [vmem:[#allocation2 + $0x8] sm:$0xff] }
  0x9c   : > { %933 = vmatmul.f32.gmra.mxu2 %v4499_v24  ;;  %v500_v24 = vld [vmem:[#allocation4 + $0x40] sm:$0xff]  ;;  %7068 = vst [vmem:[#allocation54_spill] sm:$0xff] %v4661_v49 }
  0x9d   : > { %1007 = vmatpush.msra.mxu3 %v500_v24  ;;  %v497_v24 = vld [vmem:[#allocation4 + $0x28] sm:$0xff] }
  0x9f   : > { %1008 = vmatpush.msra.mxu3 %v499_v56  ;;  %v422_v56 = vrot.slane %v4566_v42, 1 }
  0xa1   : > { %1009 = vmatpush.msra.mxu3 %v498_v6  ;;  %v494_v6 = vld [vmem:[#allocation4 + $0x10] sm:$0xff] }
  0xa2   : > { %632 = vmatmul.f32.gmra.mxu0 %v4483_v12 }
  0xa3   : > { %769 = vmatmul.f32.gmra.mxu1 %v4467_v1  ;;  %835 = vmatmul.f32.gmra.mxu3 %v4485_v13 }
  0xa4   : > { %936 = vmatmul.f32.gmra.mxu2 %v4519_v0  ;;  %v4547_v0 = vld [vmem:[#allocation2 + $0x88] sm:$0xff]  ;;  %1010 = vmatpush.msra.mxu3 %v497_v24  ;;  %v4575_v24 = vsel %vm443_vm1, %v421_v41, %v422_v56  ;;  %v315_v41 = vrot.slane %v4406_v22, 7 }
  0xa5   : > { %7054 = vst [vmem:[#allocation40_spill] sm:$0xff] %v4547_v0  ;;  %v313_v55 = vrot.slane %v4547_v0, 7 }
  0xa6   : > { %1011 = vmatpush.msra.mxu3 %v496_v61  ;;  %7056 = vst [vmem:[#allocation42_spill] sm:$0xff] %v4575_v24  ;;  %v493_v61 = vld [vmem:[#allocation4 + $0x8] sm:$0xff] }
  0xaa   : > { %635 = vmatmul.f32.gmra.mxu0 %v4503_v25 }
  0xab   : > { %772 = vmatmul.f32.gmra.mxu1 %v4487_v14  ;;  %838 = vmatmul.f32.gmra.mxu3 %v4505_v26 }
  0xac   : > { %939 = vmatmul.f32.gmra.mxu2 %v4539_v7  ;;  %v4563_v7 = vsel %vm346_vm0, %v312_v20, %v313_v55  ;;  %v495_v20 = vld [vmem:[#allocation4 + $0x18] sm:$0xff] }
  0xad   : > { %1012 = vmatpush.msra.mxu3 %v495_v20 }
  0xaf   : > { %1013 = vmatpush.msra.mxu3 %v494_v6  ;;  %v4595_v6 = vsel %vm346_vm0, %v314_v17, %v315_v41 }
  0xb1   : > { %1014 = vmatpush.msra.mxu3 %v493_v61  ;;  %v4598_v61 = vld [vmem:[#allocation2 + $0xe8] sm:$0xff] }
  0xb2   : > { %638 = vmatmul.f32.gmra.mxu0 %v4523_v23 }
  0xb3   : > { %775 = vmatmul.f32.gmra.mxu1 %v4507_v27  ;;  %841 = vmatmul.f32.gmra.mxu3 %v4525_v36  ;;  %v4631_v27 = vld [vmem:[#allocation2] sm:$0xff] }
  0xb4   : > { %942 = vmatmul.f32.gmra.mxu2 %v4559_v39  ;;  %v4579_v39 = vsel %vm346_vm0, %v313_v55, %v314_v17  ;;  %1015 = vmatpush.msra.mxu3 %v492_v31  ;;  %v424_v31 = vrot.slane %v4598_v61, 1  ;;  %7062 = vst [vmem:[#allocation48_spill] sm:$0xff] %v4631_v27 }
  0xba   : > { %641 = vmatmul.f32.gmra.mxu0 %v4543_v52 }
  0xbb   : > { %778 = vmatmul.f32.gmra.mxu1 %v4527_v3  ;;  %844 = vmatmul.f32.gmra.mxu3 %v4545_v45  ;;  %v317_v3 = vrot.slane %v4450_v50, 7 }
  0xbc   : > { %945 = vmatmul.f32.gmra.mxu2 %v4575_v24  ;;  %v316_v24 = vrot.slane %v4430_v38, 7 }
  0xc2   : > { %644 = vmatmul.f32.gmra.mxu0 %v4563_v7 }
  0xc3   : > { %781 = vmatmul.f32.gmra.mxu1 %v4547_v0  ;;  %847 = vmatmul.f32.gmra.mxu3 %v4276_v32  ;;  %v4582_v0 = vld [vmem:[#allocation2 + $0xe0] sm:$0xff] }
  0xc4   : > { %v423_v20 = vrot.slane %v4582_v0, 1 }
  0xc6   : > { %v4591_v55 = vsel %vm443_vm1, %v422_v56, %v423_v20  ;;  %v4607_v56 = vsel %vm443_vm1, %v423_v20, %v424_v31 }
  0xc7   : > { %7057 = vst [vmem:[#allocation43_spill] sm:$0xff] %v4591_v55  ;;  %948 = vmatmul.f32.gmra.mxu2 %v4591_v55  ;;  %v4611_v55 = vsel %vm346_vm0, %v315_v41, %v316_v24 }
  0xc8   : > { %7058 = vst [vmem:[#allocation44_spill] sm:$0xff] %v4607_v56 }
  0xca   : > { %647 = vmatmul.f32.gmra.mxu0 %v4579_v39 }
  0xcb   : > { %784 = vmatmul.f32.gmra.mxu1 %v4404_v21  ;;  %850 = vmatmul.f32.gmra.mxu3 %v4278_v33 }
  0xcf   : > { %951 = vmatmul.f32.gmra.mxu2 %v4607_v56 }
  0xd2   : > { %650 = vmatmul.f32.gmra.mxu0 %v4595_v6 }
  0xd3   : > { %787 = vmatmul.f32.gmra.mxu1 %v4406_v22  ;;  %853 = vmatmul.f32.gmra.mxu3 %v4309_v47  ;;  %v425_v22 = vrot.slane %v4387_v10, 1 }
  0xd7   : > { %v606_v17 = vpop.f32.mrf.mxu0 }
  0xd8   : > { %v743_v21 = vpop.f32.mrf.mxu1  ;;  %v4621_v17 = vsel %vm443_vm1, %v424_v31, %v425_v22  ;;  %v318_v31 = vrot.slane %v4470_v5, 7 }
  0xd9   : > { %7059 = vst [vmem:[#allocation45_spill] sm:$0xff] %v4621_v17  ;;  %v4627_v21 = vsel %vm346_vm0, %v316_v24, %v317_v3  ;;  %954 = vmatmul.f32.gmra.mxu2 %v4621_v17  ;;  %v296_v24 = vrot.slane %v4631_v27, 7 }
  0xda   : > { %653 = vmatmul.f32.gmra.mxu0 %v4611_v55  ;;  %v4653_v1 = vsel %vm346_vm0, %v317_v3, %v318_v31  ;;  %v319_v3 = vrot.slane %v4490_v15, 7 }
  0xdb   : > { %790 = vmatmul.f32.gmra.mxu1 %v4430_v38  ;;  %856 = vmatmul.f32.gmra.mxu3 %v4331_v54  ;;  %v4633_v38 = vld [vmem:[#allocation2 + $0x178] sm:$0xff] }
  0xdc   : > { %7063 = vst [vmem:[#allocation49_spill] sm:$0xff] %v4633_v38 }
  0xde   : > { %v714_v20 = vpop.f32.mrf.mxu3 }
  0xdf   : > { %v4623_v41 = vpop.f32.mrf.mxu0  ;;  %v426_v20 = vrot.slane %v4400_v18, 1 }
  0xe0   : > { %7060 = vst [vmem:[#allocation46_spill] sm:$0xff] %v4623_v41  ;;  %v4629_v56 = vpop.f32.mrf.mxu1 }
  0xe1   : > { %7061 = vst [vmem:[#allocation47_spill] sm:$0xff] %v4629_v56  ;;  %v6893_v56 = vrot.slane %v4633_v38, 7  ;;  %v4647_v14 = vsel %vm443_vm1, %v425_v22, %v426_v20  ;;  %v427_v22 = vrot.slane %v4425_v35, 1  ;;  %v4677_v38 = vsel %vm346_vm0, %v318_v31, %v319_v3 }
  0xe2   : > { %656 = vmatmul.f32.gmra.mxu0 %v4627_v21  ;;  %7065 = vst [vmem:[#allocation51_spill] sm:$0xff] %v4647_v14  ;;  %957 = vmatmul.f32.gmra.mxu2 %v4647_v14 }
  0xe3   : > { %793 = vmatmul.f32.gmra.mxu1 %v4450_v50  ;;  %859 = vmatmul.f32.gmra.mxu3 %v4352_v60  ;;  %v394_v27 = vsel %vm346_vm0, %v6893_v56, %v296_v24  ;;  %v4673_v56 = vsel %vm443_vm1, %v426_v20, %v427_v22 }
  0xe4   : > { %7070 = vst [vmem:[#allocation56_spill] sm:$0xff] %v4673_v56 }
  0xe6   : > { %v4643_v41 = vpop.f32.mrf.mxu3 }
  0xe7   : > { %7064 = vst [vmem:[#allocation50_spill] sm:$0xff] %v4643_v41  ;;  %v4649_v17 = vpop.f32.mrf.mxu0  ;;  %v297_v41 = vrot.slane %v4661_v49, 7 }
  0xe8   : > { %7066 = vst [vmem:[#allocation52_spill] sm:$0xff] %v4649_v17  ;;  %v4655_v50 = vpop.f32.mrf.mxu1 }
  0xe9   : > { %7067 = vst [vmem:[#allocation53_spill] sm:$0xff] %v4655_v50 }
  0xea   : > { %659 = vmatmul.f32.gmra.mxu0 %v4653_v1  ;;  %960 = vmatmul.f32.gmra.mxu2 %v4673_v56 }
  0xeb   : > { %796 = vmatmul.f32.gmra.mxu1 %v4470_v5  ;;  %1016 = vmatmul.f32.vlgmr.msra.gmra.mxu3 %v394_v27  ;;  %v393_v5 = vsel %vm346_vm0, %v296_v24, %v297_v41  ;;  %v4681_v27 = vld [vmem:[#allocation2 + $0x10] sm:$0xff] }
  0xec   : > { %v298_v20 = vrot.slane %v4681_v27, 7 }
  0xee   : > { %v4669_v50 = vpop.f32.mrf.mxu3  ;;  %v392_v37 = vsel %vm346_vm0, %v297_v41, %v298_v20 }
  0xef   : > { %7069 = vst [vmem:[#allocation55_spill] sm:$0xff] %v4669_v50  ;;  %v615_v17 = vpop.f32.mrf.mxu0  ;;  %v428_v50 = vrot.slane %v4445_v48, 1 }
  0xf0   : > { %v752_v14 = vpop.f32.mrf.mxu1  ;;  %v320_v17 = vrot.slane %v4510_v40, 7 }
  0xf1   : > { %v4691_v14 = vsel %vm443_vm1, %v427_v22, %v428_v50  ;;  %v321_v22 = vrot.slane %v4530_v58, 7 }
  0xf2   : > { %662 = vmatmul.f32.gmra.mxu0 %v4677_v38  ;;  %v4695_v56 = vsel %vm346_vm0, %v319_v3, %v320_v17  ;;  %963 = vmatmul.f32.gmra.mxu2 %v4691_v14 }
  0xf3   : > { %799 = vmatmul.f32.gmra.mxu1 %v4490_v15  ;;  %1019 = vmatmul.f32.gmra.mxu3 %v393_v5  ;;  %7071 = vst [vmem:[#allocation57_spill] sm:$0xff] %v4695_v56  ;;  %v429_v15 = vrot.slane %v4465_v63, 1  ;;  %v4714_v41 = vsel %vm346_vm0, %v320_v17, %v321_v22 }
  0xf4   : > { %7074 = vst [vmem:[#allocation60_spill] sm:$0xff] %v4714_v41 }
  0xf5   : > { %v4708_v3 = vsel %vm443_vm1, %v428_v50, %v429_v15  ;;  %v322_v50 = vrot.slane %v4550_v8, 7 }
  0xf6   : > { %v723_v31 = vpop.f32.mrf.mxu3 }
  0xf7   : > { %v618_v24 = vpop.f32.mrf.mxu0 }
  0xf8   : > { %v755_v49 = vpop.f32.mrf.mxu1  ;;  %v7076_v24 = vrot.slane %v4268_v28, 7 }
  0xfa   : > { %665 = vmatmul.f32.gmra.mxu0 %v4695_v56  ;;  %966 = vmatmul.f32.gmra.mxu2 %v4708_v3 }
  0xfb   : > { %802 = vmatmul.f32.gmra.mxu1 %v4510_v40  ;;  %1022 = vmatmul.f32.gmra.mxu3 %v392_v37  ;;  %v391_v37 = vsel %vm346_vm0, %v298_v20, %v7076_v24  ;;  %v430_v40 = vrot.slane %v4485_v13, 1  ;;  %v4735_v20 = vsel %vm346_vm0, %v321_v22, %v322_v50 }
  0xfc   : > { %7078 = vst [vmem:[#allocation63_spill] sm:$0xff] %v4735_v20 }
  0xfe   : > { %v4704_v5 = vpop.f32.mrf.mxu3 }
  0xff   : > { %7072 = vst [vmem:[#allocation58_spill] sm:$0xff] %v4704_v5  ;;  %v4710_v49 = vpop.f32.mrf.mxu0  ;;  %v4729_v5 = vsel %vm443_vm1, %v429_v15, %v430_v40  ;;  %v323_v15 = vrot.slane %v4566_v42, 7 }
 0x100   : > { %7073 = vst [vmem:[#allocation59_spill] sm:$0xff] %v4710_v49  ;;  %v4716_v31 = vpop.f32.mrf.mxu1 }
 0x101   : > { %7075 = vst [vmem:[#allocation61_spill] sm:$0xff] %v4716_v31 }
 0x102   : > { %668 = vmatmul.f32.gmra.mxu0 %v4714_v41  ;;  %969 = vmatmul.f32.gmra.mxu2 %v4729_v5 }
 0x103   : > { %805 = vmatmul.f32.gmra.mxu1 %v4530_v58  ;;  %1025 = vmatmul.f32.gmra.mxu3 %v391_v37  ;;  %v431_v58 = vrot.slane %v4505_v26, 1  ;;  %v4745_v37 = vpop.f32.mrf.mxu2 }
 0x105   : > { %v4749_v22 = vsel %vm443_vm1, %v430_v40, %v431_v58 }
 0x106   : > { %v824_v17 = vpop.f32.mrf.mxu3 }
 0x107   : > { %v4731_v28 = vpop.f32.mrf.mxu0 }
 0x108   : > { %7077 = vst [vmem:[#allocation62_spill] sm:$0xff] %v4731_v28  ;;  %v4737_v24 = vpop.f32.mrf.mxu1  ;;  %v4753_v28 = vsel %vm346_vm0, %v322_v50, %v323_v15 }
 0x109   : > { %7079 = vst [vmem:[#allocation64_spill] sm:$0xff] %v4737_v24 }
 0x10a   : > { %671 = vmatmul.f32.gmra.mxu0 %v4735_v20  ;;  %7080 = vst [vmem:[#allocation65_spill] sm:$0xff] %v4753_v28  ;;  %972 = vmatmul.f32.gmra.mxu2 %v4749_v22 }
 0x10b   : > { %808 = vmatmul.f32.gmra.mxu1 %v4550_v8  ;;  %1028 = vmatmul.f32.gmra.mxu3 %v4298_v44  ;;  %v432_v44 = vrot.slane %v4525_v36, 1  ;;  %v324_v8 = vrot.slane %v4582_v0, 7  ;;  %v925_v40 = vpop.f32.mrf.mxu2 }
 0x10d   : > { %v4765_v50 = vsel %vm443_vm1, %v431_v58, %v432_v44 }
 0x10e   : > { %v827_v17 = vpop.f32.mrf.mxu3  ;;  %7082 = vst [vmem:[#allocation67_spill] sm:$0xff] %v4765_v50 }
 0x10f   : > { %v627_v24 = vpop.f32.mrf.mxu0 }
 0x110   : > { %v764_v31 = vpop.f32.mrf.mxu1  ;;  %v4769_v24 = vsel %vm346_vm0, %v323_v15, %v324_v8 }
 0x111   : > { %7083 = vst [vmem:[#allocation68_spill] sm:$0xff] %v4769_v24 }
 0x112   : > { %674 = vmatmul.f32.gmra.mxu0 %v4753_v28  ;;  %975 = vmatmul.f32.gmra.mxu2 %v4765_v50 }
 0x113   : > { %811 = vmatmul.f32.gmra.mxu1 %v4566_v42  ;;  %1031 = vmatmul.f32.gmra.mxu3 %v4322_v51  ;;  %v433_v51 = vrot.slane %v4545_v45, 1  ;;  %v325_v42 = vrot.slane %v4598_v61, 7  ;;  %v928_v58 = vpop.f32.mrf.mxu2 }
 0x115   : > { %v4781_v15 = vsel %vm443_vm1, %v432_v44, %v433_v51 }
 0x116   : > { %v4761_v17 = vpop.f32.mrf.mxu3  ;;  %7085 = vst [vmem:[#allocation70_spill] sm:$0xff] %v4781_v15 }
 0x117   : > { %7081 = vst [vmem:[#allocation66_spill] sm:$0xff] %v4761_v17  ;;  %v630_v31 = vpop.f32.mrf.mxu0 }
 0x118   : > { %v767_v49 = vpop.f32.mrf.mxu1  ;;  %v4787_v31 = vsel %vm346_vm0, %v324_v8, %v325_v42 }
 0x119   : > { %7087 = vst [vmem:[#allocation72_spill] sm:$0xff] %v4787_v31 }
 0x11a   : > { %677 = vmatmul.f32.gmra.mxu0 %v4769_v24  ;;  %978 = vmatmul.f32.gmra.mxu2 %v4781_v15 }
 0x11b   : > { %814 = vmatmul.f32.gmra.mxu1 %v4582_v0  ;;  %1034 = vmatmul.f32.gmra.mxu3 %v4343_v57  ;;  %v434_v57 = vrot.slane %v4276_v32, 1  ;;  %v326_v0 = vrot.slane %v4387_v10, 7  ;;  %v4797_v44 = vpop.f32.mrf.mxu2  ;;  %v327_v10 = vrot.slane %v4400_v18, 7  ;;  %v328_v18 = vrot.slane %v4425_v35, 7 }
 0x11c   : > { %7089 = vst [vmem:[#allocation74_spill] sm:$0xff] %v4797_v44  ;;  %v329_v35 = vrot.slane %v4445_v48, 7  ;;  %v330_v48 = vrot.slane %v4465_v63, 7  ;;  %v331_v63 = vrot.slane %v4485_v13, 7 }
 0x11d   : > { %v4801_v8 = vsel %vm443_vm1, %v433_v51, %v434_v57  ;;  %v4824_v44 = vsel %vm346_vm0, %v326_v0, %v327_v10 }
 0x11e   : > { %v4777_v40 = vpop.f32.mrf.mxu3  ;;  %7090 = vst [vmem:[#allocation75_spill] sm:$0xff] %v4801_v8 }
 0x11f   : > { %7084 = vst [vmem:[#allocation69_spill] sm:$0xff] %v4777_v40  ;;  %v4783_v49 = vpop.f32.mrf.mxu0 }
 0x120   : > { %7086 = vst [vmem:[#allocation71_spill] sm:$0xff] %v4783_v49  ;;  %v4789_v17 = vpop.f32.mrf.mxu1 }
 0x121   : > { %7088 = vst [vmem:[#allocation73_spill] sm:$0xff] %v4789_v17  ;;  %v4807_v17 = vsel %vm346_vm0, %v325_v42, %v326_v0 }
 0x122   : > { %680 = vmatmul.f32.gmra.mxu0 %v4787_v31  ;;  %7092 = vst [vmem:[#allocation77_spill] sm:$0xff] %v4807_v17  ;;  %981 = vmatmul.f32.gmra.mxu2 %v4801_v8 }
 0x123   : > { %817 = vmatmul.f32.gmra.mxu1 %v4598_v61  ;;  %1037 = vmatmul.f32.gmra.mxu3 %v4364_v2  ;;  %v435_v2 = vrot.slane %v4278_v33, 1  ;;  %v4816_v61 = vpop.f32.mrf.mxu2  ;;  %v436_v33 = vrot.slane %v4309_v47, 1  ;;  %v437_v47 = vrot.slane %v4331_v54, 1  ;;  %v6904_v54 = vrot.slane %v4352_v60, 1 }
 0x124   : > { %7094 = vst [vmem:[#allocation79_spill] sm:$0xff] %v4816_v61 }
 0x126   : > { %v836_v58 = vpop.f32.mrf.mxu3 }
 0x127   : > { %v4803_v40 = vpop.f32.mrf.mxu0  ;;  %v4820_v58 = vsel %vm443_vm1, %v434_v57, %v435_v2  ;;  %v4835_v57 = vsel %vm443_vm1, %v435_v2, %v436_v33  ;;  %v4850_v2 = vsel %vm443_vm1, %v436_v33, %v437_v47 }
 0x128   : > { %7091 = vst [vmem:[#allocation76_spill] sm:$0xff] %v4803_v40  ;;  %v4809_v49 = vpop.f32.mrf.mxu1 }
 0x129   : > { %7093 = vst [vmem:[#allocation78_spill] sm:$0xff] %v4809_v49 }
 0x12a   : > { %683 = vmatmul.f32.gmra.mxu0 %v4807_v17  ;;  %7095 = vst [vmem:[#allocation80_spill] sm:$0xff] %v4820_v58  ;;  %984 = vmatmul.f32.gmra.mxu2 %v4820_v58 }
 0x12b   : > { %1040 = vmatmul.f32.gmra.mxu3 %v4384_v9  ;;  %7097 = vst [vmem:[#allocation82_spill] sm:$0xff] %v4835_v57 }
 0x12c   : > { %7099 = vst [vmem:[#allocation84_spill] sm:$0xff] %v4850_v2 }
 0x12e   : > { %v839_v51 = vpop.f32.mrf.mxu3 }
 0x12f   : > { %v639_v42 = vpop.f32.mrf.mxu0  ;;  %v937_v51 = vpop.f32.mrf.mxu2 }
 0x130   : > { %v776_v49 = vpop.f32.mrf.mxu1 }
 0x131   : > { %v4839_v49 = vsel %vm346_vm0, %v327_v10, %v328_v18 }
 0x132   : > { %686 = vmatmul.f32.gmra.mxu0 %v4824_v44  ;;  %987 = vmatmul.f32.gmra.mxu2 %v4835_v57 }
 0x133   : > { %1043 = vmatmul.f32.gmra.mxu3 %v4398_v16 }
 0x136   : > { %v4831_v61 = vpop.f32.mrf.mxu3 }
 0x137   : > { %7096 = vst [vmem:[#allocation81_spill] sm:$0xff] %v4831_v61  ;;  %v642_v0 = vpop.f32.mrf.mxu0  ;;  %v940_v51 = vpop.f32.mrf.mxu2 }
 0x138   : > { %v779_v42 = vpop.f32.mrf.mxu1  ;;  %v4856_v0 = vsel %vm346_vm0, %v328_v18, %v329_v35  ;;  %v4871_v18 = vsel %vm443_vm1, %v437_v47, %v6904_v54 }
 0x139   : > { %7103 = vst [vmem:[#allocation88_spill] sm:$0xff] %v4871_v18 }
 0x13a   : > { %689 = vmatmul.f32.gmra.mxu0 %v4839_v49  ;;  %990 = vmatmul.f32.gmra.mxu2 %v4850_v2  ;;  %v4877_v2 = vsel %vm346_vm0, %v329_v35, %v330_v48 }
 0x13b   : > { %1046 = vmatmul.f32.gmra.mxu3 %v4423_v34 }
 0x13e   : > { %v4846_v61 = vpop.f32.mrf.mxu3 }
 0x13f   : > { %7098 = vst [vmem:[#allocation83_spill] sm:$0xff] %v4846_v61  ;;  %v4852_v10 = vpop.f32.mrf.mxu0  ;;  %v4865_v33 = vpop.f32.mrf.mxu2 }
 0x140   : > { %7100 = vst [vmem:[#allocation85_spill] sm:$0xff] %v4852_v10  ;;  %v4858_v42 = vpop.f32.mrf.mxu1 }
 0x141   : > { %7101 = vst [vmem:[#allocation86_spill] sm:$0xff] %v4858_v42 }
 0x142   : > { %692 = vmatmul.f32.gmra.mxu0 %v4856_v0  ;;  %7102 = vst [vmem:[#allocation87_spill] sm:$0xff] %v4865_v33  ;;  %993 = vmatmul.f32.gmra.mxu2 %v4871_v18  ;;  %v4889_v33 = vsel %vm346_vm0, %v330_v48, %v331_v63  ;;  %v332_v18 = vrot.slane %v4505_v26, 7  ;;  %v333_v48 = vrot.slane %v4525_v36, 7  ;;  %v334_v36 = vrot.slane %v4545_v45, 7 }
 0x143   : > { %1049 = vmatmul.f32.gmra.mxu3 %v4443_v43 }
 0x144   : > { %v4898_v13 = vsel %vm346_vm0, %v331_v63, %v332_v18  ;;  %v522_v63 = vld [vmem:[#allocation4 + $0xf0] sm:$0xff] }
 0x146   : > { %v848_v51 = vpop.f32.mrf.mxu3 }
 0x147   : > { %v4873_v61 = vpop.f32.mrf.mxu0  ;;  %v4885_v51 = vpop.f32.mrf.mxu2 }
 0x148   : > { %v4879_v57 = vpop.f32.mrf.mxu1  ;;  %7104 = vst [vmem:[#allocation89_spill] sm:$0xff] %v4885_v51 }
 0x14a   : > { %695 = vmatmul.f32.gmra.mxu0 %v4877_v2 }
 0x14b   : > { %1052 = vmatmul.f32.gmra.mxu3 %v4463_v62 }
 0x14e   : > { %v851_v47 = vpop.f32.mrf.mxu3 }
 0x14f   : > { %v651_v54 = vpop.f32.mrf.mxu0  ;;  %v949_v42 = vpop.f32.mrf.mxu2  ;;  %v523_v47 = vld [vmem:[#allocation4 + $0xf8] sm:$0xff] }
 0x150   : > { %v788_v35 = vpop.f32.mrf.mxu1  ;;  %1137 = vmatpush.msra.mxu0 %v523_v47 }
 0x152   : > { %698 = vmatmul.f32.gmra.mxu0 %v4889_v33 }
 0x153   : > { %1055 = vmatmul.f32.gmra.mxu3 %v4483_v12  ;;  %1138 = vmatpush.msra.mxu0 %v522_v63 }
 0x156   : > { %v4894_v10 = vpop.f32.mrf.mxu3 }
 0x157   : > { %7105 = vst [vmem:[#allocation90_spill] sm:$0xff] %v4894_v10  ;;  %v654_v40 = vpop.f32.mrf.mxu0  ;;  %v952_v35 = vpop.f32.mrf.mxu2  ;;  %v521_v10 = vld [vmem:[#allocation4 + $0xe8] sm:$0xff] }
 0x158   : > { %v791_v54 = vpop.f32.mrf.mxu1  ;;  %v4909_v40 = vsel %vm346_vm0, %v332_v18, %v333_v48  ;;  %1139 = vmatpush.msra.mxu0 %v521_v10  ;;  %v400_v10 = vrot.slane %v4307_v46, 1 }
 0x15a   : > { %701 = vmatmul.f32.gmra.mxu0 %v4898_v13 }
 0x15b   : > { %1058 = vmatmul.f32.gmra.mxu3 %v4503_v25 }
 0x15e   : > { %v4903_v51 = vpop.f32.mrf.mxu3 }
 0x15f   : > { %7106 = vst [vmem:[#allocation91_spill] sm:$0xff] %v4903_v51  ;;  %v4905_v26 = vpop.f32.mrf.mxu0  ;;  %v4916_v54 = vpop.f32.mrf.mxu2  ;;  %v4922_v51 = vsel %vm346_vm0, %v333_v48, %v334_v36 }
 0x160   : > { %7107 = vst [vmem:[#allocation92_spill] sm:$0xff] %v4905_v26  ;;  %v4911_v42 = vpop.f32.mrf.mxu1 }
 0x161   : > { %7108 = vst [vmem:[#allocation93_spill] sm:$0xff] %v4911_v42 }
 0x162   : > { %704 = vmatmul.f32.gmra.mxu0 %v4909_v40  ;;  %7109 = vst [vmem:[#allocation94_spill] sm:$0xff] %v4916_v54 }
 0x163   : > { %1061 = vmatmul.f32.gmra.mxu3 %v4523_v23 }
 0x166   : > { %v860_v47 = vpop.f32.mrf.mxu3 }
 0x167   : > { %v4918_v35 = vpop.f32.mrf.mxu0  ;;  %v4928_v42 = vpop.f32.mrf.mxu2  ;;  %v7113_v47 = vrot.slane %v4276_v32, 7 }
 0x168   : > { %7110 = vst [vmem:[#allocation95_spill] sm:$0xff] %v4918_v35  ;;  %v4924_v18 = vpop.f32.mrf.mxu1  ;;  %v520_v35 = vld [vmem:[#allocation4 + $0xe0] sm:$0xff] }
 0x169   : > { %7111 = vst [vmem:[#allocation96_spill] sm:$0xff] %v4924_v18  ;;  %v4934_v54 = vsel %vm346_vm0, %v334_v36, %v7113_v47  ;;  %1140 = vmatpush.msra.mxu0 %v520_v35  ;;  %v6906_v18 = vrot.slane %v4270_v29, 1  ;;  %v401_v47 = vrot.slane %v4329_v53, 1  ;;  %v517_v53 = vld [vmem:[#allocation4 + $0xc8] sm:$0xff] }
 0x16a   : > { %707 = vmatmul.f32.gmra.mxu0 %v4922_v51  ;;  %7112 = vst [vmem:[#allocation97_spill] sm:$0xff] %v4928_v42 }
 0x16b   : > { %1064 = vmatmul.f32.gmra.mxu3 %v4543_v52  ;;  %v4946_v36 = vsel %vm443_vm1, %v6906_v18, %v400_v10 }
 0x16e   : > { %v1017_v45 = vpop.f32.mrf.mxu3 }
 0x16f   : > { %v663_v63 = vpop.f32.mrf.mxu0  ;;  %v961_v42 = vpop.f32.mrf.mxu2 }
 0x170   : > { %v800_v48 = vpop.f32.mrf.mxu1  ;;  %v519_v63 = vld [vmem:[#allocation4 + $0xd8] sm:$0xff] }
 0x171   : > { %1141 = vmatpush.msra.mxu0 %v519_v63  ;;  %v518_v48 = vld [vmem:[#allocation4 + $0xd0] sm:$0xff]  ;;  %v402_v63 = vrot.slane %v4350_v59, 1  ;;  %v516_v59 = vld [vmem:[#allocation4 + $0xc0] sm:$0xff] }
 0x172   : > { %710 = vmatmul.f32.gmra.mxu0 %v4934_v54 }
 0x173   : > { %1067 = vmatmul.f32.gmra.mxu3 %v4563_v7  ;;  %1142 = vmatpush.msra.mxu0 %v518_v48 }
 0x175   : > { %1143 = vmatpush.msra.mxu0 %v517_v53 }
 0x176   : > { %v4940_v45 = vpop.f32.mrf.mxu3 }
 0x177   : > { %7114 = vst [vmem:[#allocation98_spill] sm:$0xff] %v4940_v45  ;;  %v666_v32 = vpop.f32.mrf.mxu0  ;;  %v964_v46 = vpop.f32.mrf.mxu2  ;;  %1144 = vmatpush.msra.mxu0 %v516_v59 }
 0x178   : > { %v803_v35 = vpop.f32.mrf.mxu1  ;;  %v4957_v32 = vsel %vm443_vm1, %v400_v10, %v401_v47  ;;  %v4970_v10 = vsel %vm443_vm1, %v401_v47, %v402_v63 }
 0x17a   : > { %879 = vmatmul.f32.vlgmr.msrb.gmra.mxu0 %v4946_v36 }
 0x17b   : > { %1070 = vmatmul.f32.gmra.mxu3 %v4579_v39 }
 0x17e   : > { %v4951_v42 = vpop.f32.mrf.mxu3 }
 0x17f   : > { %7115 = vst [vmem:[#allocation99_spill] sm:$0xff] %v4951_v42  ;;  %v4953_v26 = vpop.f32.mrf.mxu0  ;;  %v4964_v35 = vpop.f32.mrf.mxu2 }
 0x180   : > { %7116 = vst [vmem:[#allocation100_spill] sm:$0xff] %v4953_v26  ;;  %v4959_v18 = vpop.f32.mrf.mxu1 }
 0x181   : > { %7117 = vst [vmem:[#allocation101_spill] sm:$0xff] %v4959_v18  ;;  %v403_v18 = vrot.slane %v4373_v4, 1 }
 0x182   : > { %882 = vmatmul.f32.gmra.mxu0 %v4957_v32  ;;  %7118 = vst [vmem:[#allocation102_spill] sm:$0xff] %v4964_v35 }
 0x183   : > { %1073 = vmatmul.f32.gmra.mxu3 %v4595_v6  ;;  %v4981_v35 = vsel %vm443_vm1, %v402_v63, %v403_v18 }
 0x186   : > { %v1026_v46 = vpop.f32.mrf.mxu3 }
 0x187   : > { %v4966_v42 = vpop.f32.mrf.mxu0  ;;  %v4977_v26 = vpop.f32.mrf.mxu2 }
 0x188   : > { %7119 = vst [vmem:[#allocation103_spill] sm:$0xff] %v4966_v42  ;;  %v4972_v48 = vpop.f32.mrf.mxu1  ;;  %v515_v42 = vld [vmem:[#allocation4 + $0xb8] sm:$0xff] }
 0x189   : > { %7120 = vst [vmem:[#allocation104_spill] sm:$0xff] %v4972_v48  ;;  %v404_v48 = vrot.slane %v4389_v11, 1  ;;  %1145 = vmatpush.msra.mxu0 %v515_v42  ;;  %v1427_v42 = vld [vmem:[#allocation4 + $0x378] sm:$0xff] }
 0x18a   : > { %885 = vmatmul.f32.gmra.mxu0 %v4970_v10  ;;  %7121 = vst [vmem:[#allocation105_spill] sm:$0xff] %v4977_v26  ;;  %1460 = vmatpush.msrb.mxu2 %v1427_v42 }
 0x18b   : > { %1076 = vmatmul.f32.gmra.mxu3 %v4611_v55  ;;  %v4990_v59 = vsel %vm443_vm1, %v403_v18, %v404_v48  ;;  %v513_v18 = vld [vmem:[#allocation4 + $0xa8] sm:$0xff] }
 0x18e   : > { %v1029_v53 = vpop.f32.mrf.mxu3 }
 0x18f   : > { %v675_v46 = vpop.f32.mrf.mxu0  ;;  %v973_v45 = vpop.f32.mrf.mxu2  ;;  %v514_v53 = vld [vmem:[#allocation4 + $0xb0] sm:$0xff] }
 0x190   : > { %v812_v47 = vpop.f32.mrf.mxu1  ;;  %1146 = vmatpush.msra.mxu0 %v514_v53  ;;  %v405_v46 = vrot.slane %v4402_v19, 1  ;;  %v7125_v53 = vld [vmem:[#allocation28_spill] sm:$0xff] }
 0x191   : > { %v539_v19 = vld [vmem:[#allocation4 + $0x178] sm:$0xff] }
 0x192   : > { %888 = vmatmul.f32.gmra.mxu0 %v4981_v35  ;;  %1274 = vmatpush.msrb.mxu1 %v539_v19  ;;  %v511_v19 = vld [vmem:[#allocation4 + $0x98] sm:$0xff] }
 0x193   : > { %1079 = vmatmul.f32.gmra.mxu3 %v4627_v21  ;;  %1147 = vmatpush.msra.mxu0 %v513_v18  ;;  %v7128_v18 = vld [vmem:[#allocation30_spill] sm:$0xff] }
 0x194   : > { %v407_v42 = vrot.slane %v7128_v18, 1  ;;  %v7130_v18 = vld [vmem:[#allocation32_spill] sm:$0xff] }
 0x196   : > { %v4986_v4 = vpop.f32.mrf.mxu3 }
 0x197   : > { %7122 = vst [vmem:[#allocation106_spill] sm:$0xff] %v4986_v4  ;;  %v678_v26 = vpop.f32.mrf.mxu0  ;;  %v976_v11 = vpop.f32.mrf.mxu2  ;;  %v512_v4 = vld [vmem:[#allocation4 + $0xa0] sm:$0xff] }
 0x198   : > { %v815_v63 = vpop.f32.mrf.mxu1  ;;  %v5001_v26 = vsel %vm443_vm1, %v404_v48, %v405_v46  ;;  %1148 = vmatpush.msra.mxu0 %v512_v4  ;;  %v537_v4 = vld [vmem:[#allocation4 + $0x168] sm:$0xff] }
 0x199   : > { %v406_v63 = vrot.slane %v7125_v53, 1 }
 0x19a   : > { %891 = vmatmul.f32.gmra.mxu0 %v4990_v59 }
 0x19b   : > { %1082 = vmatmul.f32.gmra.mxu3 %v4653_v1  ;;  %v5012_v48 = vsel %vm443_vm1, %v405_v46, %v406_v63  ;;  %1149 = vmatpush.msra.mxu0 %v511_v19  ;;  %v538_v46 = vld [vmem:[#allocation4 + $0x170] sm:$0xff] }
 0x19c   : > { %1275 = vmatpush.msrb.mxu1 %v538_v46  ;;  %v534_v46 = vld [vmem:[#allocation4 + $0x150] sm:$0xff] }
 0x19e   : > { %v4995_v47 = vpop.f32.mrf.mxu3  ;;  %1276 = vmatpush.msrb.mxu1 %v537_v4  ;;  %v533_v4 = vld [vmem:[#allocation4 + $0x148] sm:$0xff] }
 0x19f   : > { %7123 = vst [vmem:[#allocation107_spill] sm:$0xff] %v4995_v47  ;;  %v4997_v45 = vpop.f32.mrf.mxu0  ;;  %v5006_v11 = vpop.f32.mrf.mxu2 }
 0x1a0   : > { %7124 = vst [vmem:[#allocation108_spill] sm:$0xff] %v4997_v45 }
 0x1a1   : > { %7126 = vst [vmem:[#allocation28_spill] sm:$0xff] %v5006_v11  ;;  %v1426_v11 = vld [vmem:[#allocation4 + $0x370] sm:$0xff] }
 0x1a2   : > { %894 = vmatmul.f32.gmra.mxu0 %v5001_v26  ;;  %1461 = vmatpush.msrb.mxu2 %v1426_v11 }
 0x1a3   : > { %1085 = vmatmul.f32.gmra.mxu3 %v4677_v38 }
 0x1a6   : > { %v1038_v47 = vpop.f32.mrf.mxu3 }
 0x1a7   : > { %v5008_v45 = vpop.f32.mrf.mxu0  ;;  %v5017_v53 = vpop.f32.mrf.mxu2 }
 0x1a8   : > { %7127 = vst [vmem:[#allocation109_spill] sm:$0xff] %v5008_v45  ;;  %v5021_v45 = vsel %vm443_vm1, %v406_v63, %v407_v42  ;;  %v510_v63 = vld [vmem:[#allocation4 + $0x90] sm:$0xff] }
 0x1a9   : > { %7129 = vst [vmem:[#allocation30_spill] sm:$0xff] %v5017_v53  ;;  %v408_v53 = vrot.slane %v7130_v18, 1  ;;  %1150 = vmatpush.msra.mxu0 %v510_v63 }
 0x1aa   : > { %897 = vmatmul.f32.gmra.mxu0 %v5012_v48 }
 0x1ab   : > { %1088 = vmatmul.f32.gmra.mxu3 %v4695_v56  ;;  %v5030_v19 = vsel %vm443_vm1, %v407_v42, %v408_v53  ;;  %v531_v42 = vld [vmem:[#allocation4 + $0x138] sm:$0xff] }
 0x1ac   : > { %v1459_v56 = vld [vmem:[#allocation4 + $0x478] sm:$0xff] }
 0x1ae   : > { %v1041_v58 = vpop.f32.mrf.mxu3 }
 0x1af   : > { %v687_v47 = vpop.f32.mrf.mxu0  ;;  %v536_v58 = vld [vmem:[#allocation4 + $0x160] sm:$0xff]  ;;  %v985_v8 = vpop.f32.mrf.mxu2 }
 0x1b0   : > { %1277 = vmatpush.msrb.mxu1 %v536_v58  ;;  %v535_v47 = vld [vmem:[#allocation4 + $0x158] sm:$0xff]  ;;  %v7132_v8 = vld [vmem:[#allocation34_spill] sm:$0xff] }
 0x1b1   : > { %v409_v18 = vrot.slane %v7132_v8, 1  ;;  %v1425_v58 = vld [vmem:[#allocation4 + $0x368] sm:$0xff] }
 0x1b2   : > { %900 = vmatmul.f32.gmra.mxu0 %v5021_v45  ;;  %1278 = vmatpush.msrb.mxu1 %v535_v47  ;;  %v529_v8 = vld [vmem:[#allocation4 + $0x128] sm:$0xff] }
 0x1b3   : > { %1091 = vmatmul.f32.gmra.mxu3 %v4714_v41  ;;  %v509_v41 = vld [vmem:[#allocation4 + $0x88] sm:$0xff]  ;;  %1462 = vmatpush.msrb.mxu2 %v1425_v58  ;;  %v1443_v58 = vld [vmem:[#allocation4 + $0x3f8] sm:$0xff] }
 0x1b4   : > { %1279 = vmatpush.msrb.mxu1 %v534_v46  ;;  %1151 = vmatpush.msra.mxu0 %v509_v41  ;;  %v5041_v46 = vsel %vm443_vm1, %v408_v53, %v409_v18 }
 0x1b5   : > { %1597 = vmatpush.msrb.mxu3 %v1443_v58 }
 0x1b6   : > { %v5026_v15 = vpop.f32.mrf.mxu3  ;;  %1280 = vmatpush.msrb.mxu1 %v533_v4  ;;  %v530_v4 = vld [vmem:[#allocation4 + $0x130] sm:$0xff] }
 0x1b7   : > { %7131 = vst [vmem:[#allocation32_spill] sm:$0xff] %v5026_v15  ;;  %v690_v11 = vpop.f32.mrf.mxu0  ;;  %v532_v15 = vld [vmem:[#allocation4 + $0x140] sm:$0xff]  ;;  %v988_v47 = vpop.f32.mrf.mxu2 }
 0x1b8   : > { %1281 = vmatpush.msrb.mxu1 %v532_v15  ;;  %v7135_v15 = vld [vmem:[#allocation36_spill] sm:$0xff]  ;;  %v508_v47 = vld [vmem:[#allocation4 + $0x80] sm:$0xff] }
 0x1b9   : > { %v410_v41 = vrot.slane %v7135_v15, 1  ;;  %1152 = vmatpush.msra.mxu0 %v508_v47  ;;  %v7137_v15 = vld [vmem:[#allocation48_spill] sm:$0xff]  ;;  %v7138_v47 = vld [vmem:[#allocation54_spill] sm:$0xff] }
 0x1ba   : > { %903 = vmatmul.f32.gmra.mxu0 %v5030_v19  ;;  %1282 = vmatpush.msrb.mxu1 %v531_v42  ;;  %v527_v42 = vld [vmem:[#allocation4 + $0x118] sm:$0xff]  ;;  %v6920_v58 = vrot.slane %v7137_v15, 1 }
 0x1bb   : > { %1094 = vmatmul.f32.gmra.mxu3 %v4735_v20  ;;  %v1424_v20 = vld [vmem:[#allocation4 + $0x360] sm:$0xff]  ;;  %1734 = vmatpush.msrb.mxu0 %v1459_v56  ;;  %v7140_v56 = vld [vmem:[#allocation40_spill] sm:$0xff] }
 0x1bc   : > { %1283 = vmatpush.msrb.mxu1 %v530_v4  ;;  %v5050_v4 = vsel %vm443_vm1, %v409_v18, %v410_v41  ;;  %1463 = vmatpush.msrb.mxu2 %v1424_v20  ;;  %v524_v18 = vld [vmem:[#allocation4 + $0x100] sm:$0xff] }
 0x1be   : > { %v5035_v11 = vpop.f32.mrf.mxu3  ;;  %1284 = vmatpush.msrb.mxu1 %v529_v8  ;;  %v526_v8 = vld [vmem:[#allocation4 + $0x110] sm:$0xff] }
 0x1bf   : > { %7133 = vst [vmem:[#allocation34_spill] sm:$0xff] %v5035_v11  ;;  %v5037_v63 = vpop.f32.mrf.mxu0  ;;  %v528_v11 = vld [vmem:[#allocation4 + $0x120] sm:$0xff] }
 0x1c0   : > { %7134 = vst [vmem:[#allocation110_spill] sm:$0xff] %v5037_v63  ;;  %1285 = vmatpush.msrb.mxu1 %v528_v11  ;;  %v396_v11 = vrot.slane %v7138_v47, 1 }
 0x1c2   : > { %906 = vmatmul.f32.gmra.mxu0 %v5041_v46  ;;  %1286 = vmatpush.msrb.mxu1 %v527_v42  ;;  %v490_v42 = vsel %vm443_vm1, %v6920_v58, %v396_v11 }
 0x1c3   : > { %1097 = vmatmul.f32.gmra.mxu3 %v4753_v28  ;;  %v525_v28 = vld [vmem:[#allocation4 + $0x108] sm:$0xff] }
 0x1c4   : > { %1287 = vmatpush.msrb.mxu1 %v526_v8 }
 0x1c6   : > { %v1050_v63 = vpop.f32.mrf.mxu3  ;;  %1288 = vmatpush.msrb.mxu1 %v525_v28  ;;  %v397_v28 = vrot.slane %v4681_v27, 1 }
 0x1c7   : > { %v5046_v53 = vpop.f32.mrf.mxu0  ;;  %v7139_v63 = vld [vmem:[#allocation38_spill] sm:$0xff] }
 0x1c8   : > { %7136 = vst [vmem:[#allocation36_spill] sm:$0xff] %v5046_v53  ;;  %v411_v53 = vrot.slane %v7139_v63, 1  ;;  %1289 = vmatpush.msrb.mxu1 %v524_v18  ;;  %v412_v63 = vrot.slane %v7140_v56, 1  ;;  %v489_v58 = vsel %vm443_vm1, %v396_v11, %v397_v28  ;;  %v3827_v56 = vld [vmem:[#allocation2 + $0x18] sm:$0xff] }
 0x1c9   : > { %1290 = vmatmul.f32.vlgmr.msrb.gmra.mxu1 %v490_v42 }
 0x1ca   : > { %909 = vmatmul.f32.gmra.mxu0 %v5050_v4  ;;  %v5063_v50 = vsel %vm443_vm1, %v410_v41, %v411_v53  ;;  %v5075_v41 = vsel %vm443_vm1, %v411_v53, %v412_v63 }
 0x1cb   : > { %1100 = vmatmul.f32.gmra.mxu3 %v4769_v24  ;;  %v1423_v24 = vld [vmem:[#allocation4 + $0x358] sm:$0xff] }
 0x1cc   : > { %1464 = vmatpush.msrb.mxu2 %v1423_v24 }
 0x1ce   : > { %v1053_v20 = vpop.f32.mrf.mxu3 }
 0x1cf   : > { %v699_v8 = vpop.f32.mrf.mxu0  ;;  %v1442_v20 = vld [vmem:[#allocation4 + $0x3f0] sm:$0xff] }
 0x1d0   : > { %1598 = vmatpush.msrb.mxu3 %v1442_v20  ;;  %v786_v8 = vadd.f32 %v4879_v57, %v4873_v61  ;;  %v7143_v20 = vld [vmem:[#allocation26_spill] sm:$0xff]  ;;  %v1458_v57 = vld [vmem:[#allocation4 + $0x470] sm:$0xff] }
 0x1d1   : > { %1293 = vmatmul.f32.gmra.mxu1 %v489_v58  ;;  %1735 = vmatpush.msrb.mxu0 %v1458_v57  ;;  %v1440_v57 = vld [vmem:[#allocation4 + $0x3e0] sm:$0xff] }
 0x1d2   : > { %912 = vmatmul.f32.gmra.mxu0 %v5063_v50  ;;  %v923_v58 = vadd.f32 %v4745_v37, %v786_v8  ;;  %v7145_v37 = vrot.slane %v4270_v29, 1  ;;  %v1457_v29 = vld [vmem:[#allocation4 + $0x468] sm:$0xff] }
 0x1d3   : > { %1103 = vmatmul.f32.gmra.mxu3 %v4787_v31  ;;  %v398_v31 = vrot.slane %v3827_v56, 1  ;;  %1736 = vmatpush.msrb.mxu0 %v1457_v29  ;;  %v3830_v29 = vld [vmem:[#allocation2 + $0x30] sm:$0xff] }
 0x1d5   : > { %v488_v24 = vsel %vm443_vm1, %v397_v28, %v398_v31  ;;  %v487_v28 = vsel %vm443_vm1, %v398_v31, %v7145_v37 }
 0x1d6   : > { %v5071_v18 = vpop.f32.mrf.mxu3 }
 0x1d7   : > { %7141 = vst [vmem:[#allocation54_spill] sm:$0xff] %v5071_v18  ;;  %v702_v42 = vpop.f32.mrf.mxu0  ;;  %v7144_v18 = vrot.slane %v7143_v20, 1  ;;  %v1420_v20 = vld [vmem:[#allocation4 + $0x340] sm:$0xff] }
 0x1d9   : > { %1296 = vmatmul.f32.gmra.mxu1 %v488_v24  ;;  %v5092_v61 = vsel %vm443_vm1, %v412_v63, %v7144_v18  ;;  %v1441_v63 = vld [vmem:[#allocation4 + $0x3e8] sm:$0xff] }
 0x1da   : > { %915 = vmatmul.f32.gmra.mxu0 %v5075_v41  ;;  %1599 = vmatpush.msrb.mxu3 %v1441_v63  ;;  %v1421_v18 = vld [vmem:[#allocation4 + $0x348] sm:$0xff] }
 0x1db   : > { %1106 = vmatmul.f32.gmra.mxu3 %v4807_v17  ;;  %v1422_v17 = vld [vmem:[#allocation4 + $0x350] sm:$0xff] }
 0x1dc   : > { %1465 = vmatpush.msrb.mxu2 %v1422_v17  ;;  %1600 = vmatpush.msrb.mxu3 %v1440_v57 }
 0x1de   : > { %v1059_v11 = vpop.f32.mrf.mxu3  ;;  %1466 = vmatpush.msrb.mxu2 %v1421_v18 }
 0x1df   : > { %v5084_v53 = vadd.f32 %v1059_v11, %v923_v58  ;;  %v5086_v42 = vpop.f32.mrf.mxu0 }
 0x1e0   : > { %7142 = vst [vmem:[#allocation38_spill] sm:$0xff] %v5086_v42  ;;  %1467 = vmatpush.msrb.mxu2 %v1420_v20 }
 0x1e1   : > { %1299 = vmatmul.f32.gmra.mxu1 %v487_v28  ;;  %v1419_v28 = vld [vmem:[#allocation4 + $0x338] sm:$0xff] }
 0x1e2   : > { %918 = vmatmul.f32.gmra.mxu0 %v5092_v61  ;;  %1468 = vmatpush.msrb.mxu2 %v1419_v28 }
 0x1e3   : > { %1109 = vmatmul.f32.gmra.mxu3 %v4824_v44 }
 0x1e6   : > { %v1062_v8 = vpop.f32.mrf.mxu3 }
 0x1e7   : > { %v5100_v24 = vpop.f32.mrf.mxu0  ;;  %v3828_v8 = vld [vmem:[#allocation2 + $0x20] sm:$0xff] }
 0x1e8   : > { %7146 = vst [vmem:[#allocation40_spill] sm:$0xff] %v5100_v24 }
 0x1e9   : > { %1302 = vmatmul.f32.gmra.mxu1 %v4946_v36 }
 0x1ea   : > { %1153 = vmatmul.f32.vlgmr.msra.gmra.mxu0 %v7137_v15  ;;  %v1436_v15 = vld [vmem:[#allocation4 + $0x3c0] sm:$0xff] }
 0x1eb   : > { %1112 = vmatmul.f32.gmra.mxu3 %v4839_v49 }
 0x1ee   : > { %v1065_v17 = vpop.f32.mrf.mxu3 }
 0x1ef   : > { %v711_v58 = vpop.f32.mrf.mxu0  ;;  %v1439_v17 = vld [vmem:[#allocation4 + $0x3d8] sm:$0xff] }
 0x1f0   : > { %1601 = vmatpush.msrb.mxu3 %v1439_v17  ;;  %v1418_v58 = vld [vmem:[#allocation4 + $0x330] sm:$0xff] }
 0x1f1   : > { %1305 = vmatmul.f32.gmra.mxu1 %v4957_v32  ;;  %v1456_v32 = vld [vmem:[#allocation4 + $0x460] sm:$0xff]  ;;  %1469 = vmatpush.msrb.mxu2 %v1418_v58  ;;  %v1454_v17 = vld [vmem:[#allocation4 + $0x450] sm:$0xff] }
 0x1f2   : > { %1156 = vmatmul.f32.gmra.mxu0 %v7138_v47  ;;  %v1416_v58 = vld [vmem:[#allocation4 + $0x320] sm:$0xff] }
 0x1f3   : > { %1115 = vmatmul.f32.gmra.mxu3 %v4856_v0  ;;  %1737 = vmatpush.msrb.mxu0 %v1456_v32  ;;  %v1417_v32 = vld [vmem:[#allocation4 + $0x328] sm:$0xff] }
 0x1f4   : > { %1470 = vmatpush.msrb.mxu2 %v1417_v32  ;;  %v5147_v32 = vld [vmem:[#allocation2 + $0x50] sm:$0xff] }
 0x1f6   : > { %v5107_v31 = vpop.f32.mrf.mxu3  ;;  %1471 = vmatpush.msrb.mxu2 %v1416_v58  ;;  %v1453_v58 = vld [vmem:[#allocation4 + $0x448] sm:$0xff] }
 0x1f7   : > { %7147 = vst [vmem:[#allocation26_spill] sm:$0xff] %v5107_v31  ;;  %v880_v11 = vpop.f32.mrf.mxu0 }
 0x1f8   : > { %v1455_v11 = vld [vmem:[#allocation4 + $0x458] sm:$0xff] }
 0x1f9   : > { %1308 = vmatmul.f32.gmra.mxu1 %v4970_v10  ;;  %1738 = vmatpush.msrb.mxu0 %v1455_v11 }
 0x1fa   : > { %1159 = vmatmul.f32.gmra.mxu0 %v4681_v27 }
 0x1fb   : > { %1118 = vmatmul.f32.gmra.mxu3 %v4877_v2  ;;  %1739 = vmatpush.msrb.mxu0 %v1454_v17 }
 0x1fd   : > { %1740 = vmatpush.msrb.mxu0 %v1453_v58 }
 0x1fe   : > { %v5112_v36 = vpop.f32.mrf.mxu3 }
 0x1ff   : > { %7148 = vst [vmem:[#allocation111_spill] sm:$0xff] %v5112_v36  ;;  %v5115_v47 = vpop.f32.mrf.mxu0  ;;  %v1452_v36 = vld [vmem:[#allocation4 + $0x440] sm:$0xff] }
 0x200   : > { %7149 = vst [vmem:[#allocation112_spill] sm:$0xff] %v5115_v47  ;;  %1741 = vmatpush.msrb.mxu0 %v1452_v36  ;;  %v1434_v36 = vld [vmem:[#allocation4 + $0x3b0] sm:$0xff] }
 0x201   : > { %1311 = vmatmul.f32.gmra.mxu1 %v4981_v35  ;;  %v7169_v47 = vld [vmem:[#allocation31_spill] sm:$0xff] }
 0x202   : > { %1162 = vmatmul.f32.gmra.mxu0 %v3827_v56  ;;  %v3829_v56 = vld [vmem:[#allocation2 + $0x28] sm:$0xff] }
 0x203   : > { %1121 = vmatmul.f32.gmra.mxu3 %v4889_v33 }
 0x206   : > { %v1074_v37 = vpop.f32.mrf.mxu3 }
 0x207   : > { %v5119_v27 = vpop.f32.mrf.mxu0  ;;  %v3831_v37 = vld [vmem:[#allocation2 + $0x38] sm:$0xff] }
 0x208   : > { %7150 = vst [vmem:[#allocation113_spill] sm:$0xff] %v5119_v27  ;;  %v7167_v27 = vrot.slane %v4352_v60, 1 }
 0x209   : > { %1314 = vmatmul.f32.gmra.mxu1 %v4990_v59 }
 0x20a   : > { %1165 = vmatmul.f32.gmra.mxu0 %v3828_v8  ;;  %v1438_v8 = vld [vmem:[#allocation4 + $0x3d0] sm:$0xff] }
 0x20b   : > { %1124 = vmatmul.f32.gmra.mxu3 %v4898_v13 }
 0x20c   : > { %1602 = vmatpush.msrb.mxu3 %v1438_v8  ;;  %v1415_v8 = vld [vmem:[#allocation4 + $0x318] sm:$0xff] }
 0x20d   : > { %1472 = vmatpush.msrb.mxu2 %v1415_v8  ;;  %v5163_v8 = vld [vmem:[#allocation2 + $0x60] sm:$0xff] }
 0x20e   : > { %v1077_v10 = vpop.f32.mrf.mxu3 }
 0x20f   : > { %v889_v63 = vpop.f32.mrf.mxu0 }
 0x210   : > { %v5137_v63 = vld [vmem:[#allocation2 + $0x40] sm:$0xff] }
 0x211   : > { %1317 = vmatmul.f32.gmra.mxu1 %v5001_v26 }
 0x212   : > { %1168 = vmatmul.f32.gmra.mxu0 %v3829_v56 }
 0x213   : > { %1127 = vmatmul.f32.gmra.mxu3 %v4909_v40 }
 0x216   : > { %v5124_v35 = vpop.f32.mrf.mxu3 }
 0x217   : > { %7151 = vst [vmem:[#allocation114_spill] sm:$0xff] %v5124_v35  ;;  %v892_v18 = vpop.f32.mrf.mxu0  ;;  %v1413_v35 = vld [vmem:[#allocation4 + $0x308] sm:$0xff] }
 0x219   : > { %1320 = vmatmul.f32.gmra.mxu1 %v5012_v48 }
 0x21a   : > { %1171 = vmatmul.f32.gmra.mxu0 %v3830_v29  ;;  %v5141_v29 = vld [vmem:[#allocation2 + $0x48] sm:$0xff] }
 0x21b   : > { %1130 = vmatmul.f32.gmra.mxu3 %v4922_v51 }
 0x21e   : > { %v5128_v20 = vpop.f32.mrf.mxu3 }
 0x21f   : > { %7152 = vst [vmem:[#allocation115_spill] sm:$0xff] %v5128_v20  ;;  %v5131_v57 = vpop.f32.mrf.mxu0 }
 0x220   : > { %7153 = vst [vmem:[#allocation116_spill] sm:$0xff] %v5131_v57 }
 0x221   : > { %1323 = vmatmul.f32.gmra.mxu1 %v5021_v45 }
 0x222   : > { %1174 = vmatmul.f32.gmra.mxu0 %v3831_v37 }
 0x223   : > { %1133 = vmatmul.f32.gmra.mxu3 %v4934_v54 }
 0x226   : > { %v1086_v28 = vpop.f32.mrf.mxu3 }
 0x227   : > { %v5135_v10 = vpop.f32.mrf.mxu0  ;;  %v1437_v28 = vld [vmem:[#allocation4 + $0x3c8] sm:$0xff] }
 0x228   : > { %7154 = vst [vmem:[#allocation117_spill] sm:$0xff] %v5135_v10  ;;  %1603 = vmatpush.msrb.mxu3 %v1437_v28  ;;  %v1414_v28 = vld [vmem:[#allocation4 + $0x310] sm:$0xff]  ;;  %v5188_v10 = vld [vmem:[#allocation2 + $0x160] sm:$0xff] }
 0x229   : > { %1326 = vmatmul.f32.gmra.mxu1 %v5030_v19  ;;  %1473 = vmatpush.msrb.mxu2 %v1414_v28 }
 0x22a   : > { %1177 = vmatmul.f32.gmra.mxu0 %v5137_v63  ;;  %1604 = vmatpush.msrb.mxu3 %v1436_v15 }
 0x22b   : > { %1474 = vmatpush.msrb.mxu2 %v1413_v35  ;;  %v1412_v35 = vld [vmem:[#allocation4 + $0x300] sm:$0xff] }
 0x22d   : > { %1475 = vmatpush.msrb.mxu2 %v1412_v35 }
 0x22e   : > { %v1089_v56 = vpop.f32.mrf.mxu3 }
 0x22f   : > { %v901_v18 = vpop.f32.mrf.mxu0 }
 0x230   : > { %v5155_v18 = vld [vmem:[#allocation2 + $0x58] sm:$0xff] }
 0x231   : > { %1329 = vmatmul.f32.gmra.mxu1 %v5041_v46 }
 0x232   : > { %1180 = vmatmul.f32.gmra.mxu0 %v5141_v29 }
 0x236   : > { %v5144_v11 = vpop.f32.mrf.mxu3 }
 0x237   : > { %7155 = vst [vmem:[#allocation118_spill] sm:$0xff] %v5144_v11  ;;  %v904_v37 = vpop.f32.mrf.mxu0 }
 0x238   : > { %v5158_v37 = vpop.f32.mrf.mxu1 }
 0x239   : > { %1332 = vmatmul.f32.gmra.mxu1 %v5050_v4  ;;  %7158 = vst [vmem:[#allocation121_spill] sm:$0xff] %v5158_v37  ;;  %v5167_v37 = vld [vmem:[#allocation2 + $0x68] sm:$0xff] }
 0x23a   : > { %1183 = vmatmul.f32.gmra.mxu0 %v5147_v32 }
 0x23e   : > { %v5150_v56 = vpop.f32.mrf.mxu3 }
 0x23f   : > { %7156 = vst [vmem:[#allocation119_spill] sm:$0xff] %v5150_v56  ;;  %v5153_v17 = vpop.f32.mrf.mxu0 }
 0x240   : > { %7157 = vst [vmem:[#allocation120_spill] sm:$0xff] %v5153_v17  ;;  %v1433_v17 = vld [vmem:[#allocation4 + $0x3a8] sm:$0xff] }
 0x241   : > { %1335 = vmatmul.f32.gmra.mxu1 %v5063_v50 }
 0x242   : > { %1186 = vmatmul.f32.gmra.mxu0 %v5155_v18 }
 0x246   : > { %v1098_v24 = vpop.f32.mrf.mxu3  ;;  %v1291_v56 = vpop.f32.mrf.mxu1 }
 0x247   : > { %v5161_v42 = vpop.f32.mrf.mxu0  ;;  %v7164_v56 = vld [vmem:[#allocation27_spill] sm:$0xff] }
 0x248   : > { %7159 = vst [vmem:[#allocation122_spill] sm:$0xff] %v5161_v42  ;;  %v5185_v42 = vld [vmem:[#allocation2 + $0x78] sm:$0xff] }
 0x249   : > { %1338 = vmatmul.f32.gmra.mxu1 %v5075_v41 }
 0x24a   : > { %1189 = vmatmul.f32.gmra.mxu0 %v5163_v8 }
 0x24e   : > { %v1101_v11 = vpop.f32.mrf.mxu3  ;;  %v5170_v24 = vpop.f32.mrf.mxu1 }
 0x24f   : > { %v913_v20 = vpop.f32.mrf.mxu0  ;;  %7160 = vst [vmem:[#allocation123_spill] sm:$0xff] %v5170_v24  ;;  %v5175_v11 = vld [vmem:[#allocation2 + $0x70] sm:$0xff]  ;;  %v1431_v24 = vld [vmem:[#allocation4 + $0x398] sm:$0xff] }
 0x251   : > { %1341 = vmatmul.f32.gmra.mxu1 %v5092_v61 }
 0x252   : > { %1192 = vmatmul.f32.gmra.mxu0 %v5167_v37 }
 0x256   : > { %v5172_v58 = vpop.f32.mrf.mxu3  ;;  %v5178_v15 = vpop.f32.mrf.mxu1 }
 0x257   : > { %7161 = vst [vmem:[#allocation124_spill] sm:$0xff] %v5172_v58  ;;  %v916_v28 = vpop.f32.mrf.mxu0  ;;  %v1435_v58 = vld [vmem:[#allocation4 + $0x3b8] sm:$0xff] }
 0x258   : > { %7162 = vst [vmem:[#allocation125_spill] sm:$0xff] %v5178_v15  ;;  %1605 = vmatpush.msrb.mxu3 %v1435_v58  ;;  %v1432_v58 = vld [vmem:[#allocation4 + $0x3a0] sm:$0xff] }
 0x259   : > { %1344 = vmatmul.f32.gmra.mxu1 %v7164_v56 }
 0x25a   : > { %1195 = vmatmul.f32.gmra.mxu0 %v5175_v11  ;;  %1606 = vmatpush.msrb.mxu3 %v1434_v36 }
 0x25c   : > { %1607 = vmatpush.msrb.mxu3 %v1433_v17  ;;  %v1451_v17 = vld [vmem:[#allocation4 + $0x438] sm:$0xff] }
 0x25d   : > { %1742 = vmatpush.msrb.mxu0 %v1451_v17  ;;  %v2471_v17 = vld [vmem:[#allocation7 + $0x1f8] sm:$0xff] }
 0x25e   : > { %v5180_v20 = vpop.f32.mrf.mxu3  ;;  %v1300_v28 = vpop.f32.mrf.mxu1  ;;  %1608 = vmatpush.msrb.mxu3 %v1432_v58  ;;  %2504 = vmatpush.msra.mxu1 %v2471_v17 }
 0x25f   : > { %7163 = vst [vmem:[#allocation126_spill] sm:$0xff] %v5180_v20  ;;  %v5183_v31 = vpop.f32.mrf.mxu0  ;;  %v7166_v20 = vld [vmem:[#allocation29_spill] sm:$0xff]  ;;  %v1429_v28 = vld [vmem:[#allocation4 + $0x388] sm:$0xff] }
 0x260   : > { %7165 = vst [vmem:[#allocation27_spill] sm:$0xff] %v5183_v31  ;;  %v6926_v31 = vrot.slane %v5188_v10, 1  ;;  %1609 = vmatpush.msrb.mxu3 %v1431_v24  ;;  %v5209_v24 = vld [vmem:[#allocation2 + $0x88] sm:$0xff] }
 0x261   : > { %1347 = vmatmul.f32.gmra.mxu1 %v7166_v20 }
 0x262   : > { %1198 = vmatmul.f32.gmra.mxu0 %v5185_v42  ;;  %v5198_v35 = vsel %vm443_vm1, %v7167_v27, %v6926_v31  ;;  %v1428_v27 = vld [vmem:[#allocation4 + $0x380] sm:$0xff]  ;;  %v2487_v31 = vld [vmem:[#allocation7 + $0x278] sm:$0xff] }
 0x263   : > { %7168 = vst [vmem:[#allocation29_spill] sm:$0xff] %v5198_v35  ;;  %996 = vmatmul.f32.gmra.mxu2 %v5198_v35 }
 0x264   : > { %2601 = vmatpush.msra.mxu2 %v2487_v31 }
 0x266   : > { %v1110_v57 = vpop.f32.mrf.mxu3  ;;  %v1303_v36 = vpop.f32.mrf.mxu1 }
 0x267   : > { %v1154_v15 = vpop.f32.mrf.mxu0  ;;  %v5201_v57 = vld [vmem:[#allocation2 + $0x80] sm:$0xff] }
 0x268   : > { %v1430_v15 = vld [vmem:[#allocation4 + $0x390] sm:$0xff] }
 0x269   : > { %1610 = vmatpush.msrb.mxu3 %v1430_v15  ;;  %1350 = vmatmul.f32.gmra.mxu1 %v7169_v47 }
 0x26a   : > { %1201 = vmatmul.f32.gmra.mxu0 %v5201_v57 }
 0x26b   : > { %1611 = vmatpush.msrb.mxu3 %v1429_v28  ;;  %1476 = vmatmul.f32.vlgmr.msrb.gmra.mxu2 %v4384_v9  ;;  %v7172_v28 = vld [vmem:[#allocation33_spill] sm:$0xff]  ;;  %v5221_v9 = vld [vmem:[#allocation2 + $0x90] sm:$0xff] }
 0x26d   : > { %1612 = vmatpush.msrb.mxu3 %v1428_v27  ;;  %v7176_v27 = vld [vmem:[#allocation35_spill] sm:$0xff] }
 0x26e   : > { %v1113_v58 = vpop.f32.mrf.mxu3  ;;  %1613 = vmatmul.f32.vlgmr.msrb.gmra.mxu3 %v5137_v63  ;;  %v5212_v15 = vpop.f32.mrf.mxu1 }
 0x26f   : > { %v5205_v30 = vpop.f32.mrf.mxu0  ;;  %7170 = vst [vmem:[#allocation31_spill] sm:$0xff] %v5212_v15 }
 0x271   : > { %1353 = vmatmul.f32.gmra.mxu1 %v7172_v28 }
 0x272   : > { %1204 = vmatmul.f32.gmra.mxu0 %v5209_v24 }
 0x273   : > { %1479 = vmatmul.f32.gmra.mxu2 %v4398_v16  ;;  %v5231_v16 = vld [vmem:[#allocation2 + $0x98] sm:$0xff] }
 0x276   : > { %v5214_v36 = vpop.f32.mrf.mxu3  ;;  %1616 = vmatmul.f32.gmra.mxu3 %v5141_v29  ;;  %v5224_v63 = vpop.f32.mrf.mxu1  ;;  %v2486_v29 = vld [vmem:[#allocation7 + $0x270] sm:$0xff] }
 0x277   : > { %7171 = vst [vmem:[#allocation127_spill] sm:$0xff] %v5214_v36  ;;  %v5217_v58 = vpop.f32.mrf.mxu0  ;;  %v1450_v36 = vld [vmem:[#allocation4 + $0x430] sm:$0xff]  ;;  %2602 = vmatpush.msra.mxu2 %v2486_v29 }
 0x278   : > { %7173 = vst [vmem:[#allocation33_spill] sm:$0xff] %v5217_v58  ;;  %1743 = vmatpush.msrb.mxu0 %v1450_v36  ;;  %v2470_v58 = vld [vmem:[#allocation7 + $0x1f0] sm:$0xff] }
 0x279   : > { %7174 = vst [vmem:[#allocation128_spill] sm:$0xff] %v5224_v63  ;;  %1356 = vmatmul.f32.gmra.mxu1 %v7176_v27  ;;  %v7177_v63 = vld [vmem:[#allocation37_spill] sm:$0xff] }
 0x27a   : > { %1207 = vmatmul.f32.gmra.mxu0 %v5221_v9  ;;  %2505 = vmatpush.msra.mxu1 %v2470_v58 }
 0x27b   : > { %1482 = vmatmul.f32.gmra.mxu2 %v4423_v34  ;;  %v5237_v34 = vld [vmem:[#allocation2 + $0xa0] sm:$0xff] }
 0x27e   : > { %v5226_v31 = vpop.f32.mrf.mxu3  ;;  %1619 = vmatmul.f32.gmra.mxu3 %v5147_v32  ;;  %v1312_v35 = vpop.f32.mrf.mxu1 }
 0x27f   : > { %7175 = vst [vmem:[#allocation129_spill] sm:$0xff] %v5226_v31  ;;  %v1163_v17 = vpop.f32.mrf.mxu0 }
 0x280   : > { %v7178_v17 = vld [vmem:[#allocation39_spill] sm:$0xff] }
 0x281   : > { %1359 = vmatmul.f32.gmra.mxu1 %v7177_v63 }
 0x282   : > { %1210 = vmatmul.f32.gmra.mxu0 %v5231_v16 }
 0x283   : > { %1485 = vmatmul.f32.gmra.mxu2 %v4443_v43  ;;  %v1449_v43 = vld [vmem:[#allocation4 + $0x428] sm:$0xff] }
 0x284   : > { %1744 = vmatpush.msrb.mxu0 %v1449_v43 }
 0x286   : > { %v1122_v15 = vpop.f32.mrf.mxu3  ;;  %1622 = vmatmul.f32.gmra.mxu3 %v5155_v18  ;;  %v1315_v32 = vpop.f32.mrf.mxu1 }
 0x287   : > { %v1166_v31 = vpop.f32.mrf.mxu0  ;;  %v5245_v15 = vld [vmem:[#allocation2 + $0xa8] sm:$0xff] }
 0x288   : > { %v7182_v31 = vld [vmem:[#allocation41_spill] sm:$0xff]  ;;  %v2485_v32 = vld [vmem:[#allocation7 + $0x268] sm:$0xff] }
 0x289   : > { %1362 = vmatmul.f32.gmra.mxu1 %v7178_v17  ;;  %2603 = vmatpush.msra.mxu2 %v2485_v32  ;;  %v7187_v32 = vld [vmem:[#allocation43_spill] sm:$0xff] }
 0x28a   : > { %1213 = vmatmul.f32.gmra.mxu0 %v5237_v34 }
 0x28b   : > { %1488 = vmatmul.f32.gmra.mxu2 %v4463_v62  ;;  %v5257_v62 = vld [vmem:[#allocation2 + $0xb0] sm:$0xff] }
 0x28e   : > { %v1125_v36 = vpop.f32.mrf.mxu3  ;;  %1625 = vmatmul.f32.gmra.mxu3 %v5163_v8  ;;  %v5248_v18 = vpop.f32.mrf.mxu1  ;;  %v2469_v8 = vld [vmem:[#allocation7 + $0x1e8] sm:$0xff] }
 0x28f   : > { %v5241_v35 = vpop.f32.mrf.mxu0  ;;  %7180 = vst [vmem:[#allocation37_spill] sm:$0xff] %v5248_v18  ;;  %2506 = vmatpush.msra.mxu1 %v2469_v8 }
 0x290   : > { %7179 = vst [vmem:[#allocation35_spill] sm:$0xff] %v5241_v35 }
 0x291   : > { %1365 = vmatmul.f32.gmra.mxu1 %v7182_v31 }
 0x292   : > { %1216 = vmatmul.f32.gmra.mxu0 %v5245_v15 }
 0x293   : > { %1491 = vmatmul.f32.gmra.mxu2 %v4483_v12  ;;  %v5267_v12 = vld [vmem:[#allocation2 + $0xb8] sm:$0xff] }
 0x296   : > { %v5250_v58 = vpop.f32.mrf.mxu3  ;;  %1628 = vmatmul.f32.gmra.mxu3 %v5167_v37  ;;  %v5260_v36 = vpop.f32.mrf.mxu1  ;;  %v1448_v37 = vld [vmem:[#allocation4 + $0x420] sm:$0xff] }
 0x297   : > { %7181 = vst [vmem:[#allocation39_spill] sm:$0xff] %v5250_v58  ;;  %v5253_v29 = vpop.f32.mrf.mxu0  ;;  %v7186_v58 = vld [vmem:[#allocation42_spill] sm:$0xff]  ;;  %1745 = vmatpush.msrb.mxu0 %v1448_v37 }
 0x298   : > { %7183 = vst [vmem:[#allocation41_spill] sm:$0xff] %v5253_v29 }
 0x299   : > { %7184 = vst [vmem:[#allocation130_spill] sm:$0xff] %v5260_v36  ;;  %1368 = vmatmul.f32.gmra.mxu1 %v7186_v58 }
 0x29a   : > { %1219 = vmatmul.f32.gmra.mxu0 %v5257_v62 }
 0x29b   : > { %1494 = vmatmul.f32.gmra.mxu2 %v4503_v25  ;;  %v2484_v25 = vld [vmem:[#allocation7 + $0x260] sm:$0xff] }
 0x29c   : > { %2604 = vmatpush.msra.mxu2 %v2484_v25  ;;  %v7193_v25 = vld [vmem:[#allocation51_spill] sm:$0xff] }
 0x29e   : > { %v5262_v43 = vpop.f32.mrf.mxu3  ;;  %1631 = vmatmul.f32.gmra.mxu3 %v5175_v11  ;;  %v1324_v29 = vpop.f32.mrf.mxu1 }
 0x29f   : > { %7185 = vst [vmem:[#allocation131_spill] sm:$0xff] %v5262_v43  ;;  %v1175_v18 = vpop.f32.mrf.mxu0  ;;  %v7188_v43 = vld [vmem:[#allocation44_spill] sm:$0xff]  ;;  %v2468_v29 = vld [vmem:[#allocation7 + $0x1e0] sm:$0xff] }
 0x2a0   : > { %v5273_v18 = vld [vmem:[#allocation2 + $0xc0] sm:$0xff]  ;;  %2507 = vmatpush.msra.mxu1 %v2468_v29  ;;  %v2483_v29 = vld [vmem:[#allocation7 + $0x258] sm:$0xff] }
 0x2a1   : > { %1371 = vmatmul.f32.gmra.mxu1 %v7187_v32  ;;  %2605 = vmatpush.msra.mxu2 %v2483_v29 }
 0x2a2   : > { %1222 = vmatmul.f32.gmra.mxu0 %v5267_v12 }
 0x2a3   : > { %1497 = vmatmul.f32.gmra.mxu2 %v4523_v23 }
 0x2a6   : > { %v1134_v36 = vpop.f32.mrf.mxu3  ;;  %1634 = vmatmul.f32.gmra.mxu3 %v5185_v42  ;;  %v1327_v11 = vpop.f32.mrf.mxu1  ;;  %v7191_v42 = vld [vmem:[#allocation45_spill] sm:$0xff] }
 0x2a7   : > { %v1178_v8 = vpop.f32.mrf.mxu0  ;;  %v5281_v36 = vld [vmem:[#allocation2 + $0xc8] sm:$0xff] }
 0x2a8   : > { %v5291_v8 = vld [vmem:[#allocation2 + $0xd0] sm:$0xff] }
 0x2a9   : > { %1374 = vmatmul.f32.gmra.mxu1 %v7188_v43 }
 0x2aa   : > { %1225 = vmatmul.f32.gmra.mxu0 %v5273_v18 }
 0x2ab   : > { %1500 = vmatmul.f32.gmra.mxu2 %v4543_v52  ;;  %v1447_v52 = vld [vmem:[#allocation4 + $0x418] sm:$0xff] }
 0x2ac   : > { %1746 = vmatpush.msrb.mxu0 %v1447_v52  ;;  %v5303_v52 = vld [vmem:[#allocation2 + $0xe0] sm:$0xff] }
 0x2ae   : > { %1637 = vmatmul.f32.gmra.mxu3 %v5201_v57  ;;  %v5284_v23 = vpop.f32.mrf.mxu1 }
 0x2af   : > { %v5277_v35 = vpop.f32.mrf.mxu0  ;;  %7190 = vst [vmem:[#allocation43_spill] sm:$0xff] %v5284_v23  ;;  %v5297_v23 = vld [vmem:[#allocation2 + $0xd8] sm:$0xff] }
 0x2b0   : > { %7189 = vst [vmem:[#allocation42_spill] sm:$0xff] %v5277_v35 }
 0x2b1   : > { %1377 = vmatmul.f32.gmra.mxu1 %v7191_v42 }
 0x2b2   : > { %1228 = vmatmul.f32.gmra.mxu0 %v5281_v36 }
 0x2b3   : > { %1503 = vmatmul.f32.gmra.mxu2 %v4563_v7  ;;  %v2467_v7 = vld [vmem:[#allocation7 + $0x1d8] sm:$0xff] }
 0x2b4   : > { %2508 = vmatpush.msra.mxu1 %v2467_v7 }
 0x2b6   : > { %1640 = vmatmul.f32.gmra.mxu3 %v5209_v24  ;;  %v1333_v57 = vpop.f32.mrf.mxu1 }
 0x2b7   : > { %v5287_v37 = vpop.f32.mrf.mxu0 }
 0x2b8   : > { %7192 = vst [vmem:[#allocation44_spill] sm:$0xff] %v5287_v37  ;;  %v7194_v37 = vld [vmem:[#allocation56_spill] sm:$0xff] }
 0x2b9   : > { %1380 = vmatmul.f32.gmra.mxu1 %v7193_v25 }
 0x2ba   : > { %1231 = vmatmul.f32.gmra.mxu0 %v5291_v8 }
 0x2bb   : > { %1506 = vmatmul.f32.gmra.mxu2 %v4579_v39  ;;  %v1446_v39 = vld [vmem:[#allocation4 + $0x410] sm:$0xff] }
 0x2bc   : > { %1747 = vmatpush.msrb.mxu0 %v1446_v39  ;;  %v5324_v39 = vld [vmem:[#allocation2 + $0xf0] sm:$0xff] }
 0x2be   : > { %1643 = vmatmul.f32.gmra.mxu3 %v5221_v9  ;;  %v1336_v24 = vpop.f32.mrf.mxu1 }
 0x2bf   : > { %v1187_v11 = vpop.f32.mrf.mxu0  ;;  %v2466_v24 = vld [vmem:[#allocation7 + $0x1d0] sm:$0xff] }
 0x2c0   : > { %2509 = vmatpush.msra.mxu1 %v2466_v24 }
 0x2c1   : > { %1383 = vmatmul.f32.gmra.mxu1 %v7194_v37 }
 0x2c2   : > { %1234 = vmatmul.f32.gmra.mxu0 %v5297_v23 }
 0x2c3   : > { %1509 = vmatmul.f32.gmra.mxu2 %v4595_v6  ;;  %v2482_v6 = vld [vmem:[#allocation7 + $0x250] sm:$0xff] }
 0x2c4   : > { %2606 = vmatpush.msra.mxu2 %v2482_v6 }
 0x2c6   : > { %1646 = vmatmul.f32.gmra.mxu3 %v5231_v16  ;;  %v1339_v9 = vpop.f32.mrf.mxu1 }
 0x2c7   : > { %v1190_v35 = vpop.f32.mrf.mxu0 }
 0x2c8   : > { %v5311_v35 = vld [vmem:[#allocation2 + $0xe8] sm:$0xff] }
 0x2c9   : > { %1386 = vmatmul.f32.gmra.mxu1 %v4691_v14 }
 0x2ca   : > { %1237 = vmatmul.f32.gmra.mxu0 %v5303_v52 }
 0x2cb   : > { %1512 = vmatmul.f32.gmra.mxu2 %v4611_v55  ;;  %v5320_v55 = vpop.f32.mrf.mxu2 }
 0x2cc   : > { %7197 = vst [vmem:[#allocation56_spill] sm:$0xff] %v5320_v55  ;;  %v7207_v55 = vld [vmem:[#allocation60_spill] sm:$0xff] }
 0x2ce   : > { %1649 = vmatmul.f32.gmra.mxu3 %v5237_v34  ;;  %v5314_v16 = vpop.f32.mrf.mxu1 }
 0x2cf   : > { %v5307_v11 = vpop.f32.mrf.mxu0  ;;  %7196 = vst [vmem:[#allocation51_spill] sm:$0xff] %v5314_v16 }
 0x2d0   : > { %7195 = vst [vmem:[#allocation45_spill] sm:$0xff] %v5307_v11  ;;  %v7214_v11 = vld [vmem:[#allocation68_spill] sm:$0xff] }
 0x2d1   : > { %1389 = vmatmul.f32.gmra.mxu1 %v4708_v3 }
 0x2d2   : > { %1240 = vmatmul.f32.gmra.mxu0 %v5311_v35 }
 0x2d3   : > { %1515 = vmatmul.f32.gmra.mxu2 %v4627_v21  ;;  %v5332_v21 = vld [vmem:[#allocation2 + $0xf8] sm:$0xff] }
 0x2d6   : > { %1652 = vmatmul.f32.gmra.mxu3 %v5245_v15  ;;  %v5327_v9 = vpop.f32.mrf.mxu1 }
 0x2d7   : > { %v1196_v29 = vpop.f32.mrf.mxu0  ;;  %7199 = vst [vmem:[#allocation133_spill] sm:$0xff] %v5327_v9 }
 0x2d8   : > { %v1197_v7 = vadd.f32 %v1196_v29, %v5084_v53  ;;  %v1445_v53 = vld [vmem:[#allocation4 + $0x408] sm:$0xff] }
 0x2d9   : > { %1392 = vmatmul.f32.gmra.mxu1 %v4729_v5  ;;  %1748 = vmatpush.msrb.mxu0 %v1445_v53  ;;  %v7201_v53 = vld [vmem:[#allocation67_spill] sm:$0xff] }
 0x2da   : > { %v5322_v34 = vadd.f32 %v1333_v57, %v1197_v7  ;;  %1243 = vmatmul.f32.gmra.mxu0 %v5324_v39  ;;  %v5335_v57 = vpop.f32.mrf.mxu2  ;;  %v2481_v7 = vld [vmem:[#allocation7 + $0x248] sm:$0xff] }
 0x2db   : > { %1518 = vmatmul.f32.gmra.mxu2 %v4653_v1  ;;  %7200 = vst [vmem:[#allocation134_spill] sm:$0xff] %v5335_v57  ;;  %v5340_v1 = vld [vmem:[#allocation2 + $0x100] sm:$0xff] }
 0x2dc   : > { %7198 = vst [vmem:[#allocation132_spill] sm:$0xff] %v5322_v34  ;;  %2607 = vmatpush.msra.mxu2 %v2481_v7  ;;  %v7203_v57 = vld [vmem:[#allocation57_spill] sm:$0xff] }
 0x2de   : > { %1655 = vmatmul.f32.gmra.mxu3 %v5257_v62  ;;  %v1348_v15 = vpop.f32.mrf.mxu1  ;;  %v2465_v62 = vld [vmem:[#allocation7 + $0x1c8] sm:$0xff] }
 0x2df   : > { %v1199_v6 = vpop.f32.mrf.mxu0  ;;  %2510 = vmatpush.msra.mxu1 %v2465_v62  ;;  %v7205_v62 = vld [vmem:[#allocation70_spill] sm:$0xff] }
 0x2e1   : > { %1395 = vmatmul.f32.gmra.mxu1 %v4749_v22 }
 0x2e2   : > { %1246 = vmatmul.f32.gmra.mxu0 %v5332_v21 }
 0x2e3   : > { %1521 = vmatmul.f32.gmra.mxu2 %v4677_v38  ;;  %v1444_v38 = vld [vmem:[#allocation4 + $0x400] sm:$0xff] }
 0x2e4   : > { %1749 = vmatpush.msrb.mxu0 %v1444_v38 }
 0x2e6   : > { %1658 = vmatmul.f32.gmra.mxu3 %v5267_v12  ;;  %v1351_v24 = vpop.f32.mrf.mxu1  ;;  %v997_v6 = vpop.f32.mrf.mxu2 }
 0x2e7   : > { %v1202_v29 = vpop.f32.mrf.mxu0 }
 0x2e8   : > { %v5348_v29 = vld [vmem:[#allocation2 + $0x108] sm:$0xff] }
 0x2e9   : > { %1398 = vmatmul.f32.gmra.mxu1 %v7201_v53  ;;  %v2462_v53 = vld [vmem:[#allocation7 + $0x1b0] sm:$0xff] }
 0x2ea   : > { %1249 = vmatmul.f32.gmra.mxu0 %v5340_v1 }
 0x2eb   : > { %1524 = vmatmul.f32.gmra.mxu2 %v7203_v57  ;;  %v5358_v57 = vld [vmem:[#allocation2 + $0x110] sm:$0xff] }
 0x2ee   : > { %1661 = vmatmul.f32.gmra.mxu3 %v5273_v18  ;;  %v5351_v12 = vpop.f32.mrf.mxu1  ;;  %v1477_v7 = vpop.f32.mrf.mxu2  ;;  %v2480_v18 = vld [vmem:[#allocation7 + $0x240] sm:$0xff] }
 0x2ef   : > { %v5344_v15 = vpop.f32.mrf.mxu0  ;;  %7204 = vst [vmem:[#allocation57_spill] sm:$0xff] %v5351_v12  ;;  %2608 = vmatpush.msra.mxu2 %v2480_v18 }
 0x2f0   : > { %7202 = vst [vmem:[#allocation135_spill] sm:$0xff] %v5344_v15 }
 0x2f1   : > { %v1614_v24 = vpop.f32.mrf.mxu3  ;;  %1401 = vmatmul.f32.gmra.mxu1 %v7205_v62 }
 0x2f2   : > { %1252 = vmatmul.f32.gmra.mxu0 %v5348_v29  ;;  %v7209_v24 = vld [vmem:[#allocation75_spill] sm:$0xff] }
 0x2f3   : > { %1527 = vmatmul.f32.gmra.mxu2 %v7207_v55  ;;  %v7210_v55 = vld [vmem:[#allocation63_spill] sm:$0xff] }
 0x2f6   : > { %1664 = vmatmul.f32.gmra.mxu3 %v5281_v36  ;;  %v5361_v9 = vpop.f32.mrf.mxu1  ;;  %v1480_v12 = vpop.f32.mrf.mxu2  ;;  %v5368_v36 = vld [vmem:[#allocation2 + $0x118] sm:$0xff] }
 0x2f7   : > { %v5354_v6 = vpop.f32.mrf.mxu0  ;;  %7208 = vst [vmem:[#allocation60_spill] sm:$0xff] %v5361_v9 }
 0x2f8   : > { %7206 = vst [vmem:[#allocation136_spill] sm:$0xff] %v5354_v6  ;;  %v2464_v6 = vld [vmem:[#allocation7 + $0x1c0] sm:$0xff] }
 0x2f9   : > { %v1617_v38 = vpop.f32.mrf.mxu3  ;;  %1404 = vmatmul.f32.gmra.mxu1 %v7209_v24  ;;  %v7212_v24 = vld [vmem:[#allocation65_spill] sm:$0xff] }
 0x2fa   : > { %1255 = vmatmul.f32.gmra.mxu0 %v5358_v57  ;;  %v5363_v7 = vadd.f32 %v1617_v38, %v1480_v12  ;;  %2511 = vmatpush.msra.mxu1 %v2464_v6  ;;  %v7211_v12 = vld [vmem:[#allocation80_spill] sm:$0xff] }
 0x2fb   : > { %1530 = vmatmul.f32.gmra.mxu2 %v7210_v55 }
 0x2fe   : > { %1667 = vmatmul.f32.gmra.mxu3 %v5291_v8  ;;  %v1360_v15 = vpop.f32.mrf.mxu1  ;;  %v1483_v9 = vpop.f32.mrf.mxu2 }
 0x2ff   : > { %v1211_v16 = vpop.f32.mrf.mxu0  ;;  %v2479_v15 = vld [vmem:[#allocation7 + $0x238] sm:$0xff] }
 0x300   : > { %v5376_v16 = vld [vmem:[#allocation2 + $0x120] sm:$0xff]  ;;  %2609 = vmatpush.msra.mxu2 %v2479_v15 }
 0x301   : > { %v1620_v18 = vpop.f32.mrf.mxu3  ;;  %1407 = vmatmul.f32.gmra.mxu1 %v7211_v12 }
 0x302   : > { %1258 = vmatmul.f32.gmra.mxu0 %v5368_v36  ;;  %v5371_v34 = vadd.f32 %v1620_v18, %v1483_v9  ;;  %v5383_v9 = vld [vmem:[#allocation2 + $0x128] sm:$0xff] }
 0x303   : > { %1533 = vmatmul.f32.gmra.mxu2 %v7212_v24 }
 0x306   : > { %1670 = vmatmul.f32.gmra.mxu3 %v5297_v23  ;;  %v1363_v8 = vpop.f32.mrf.mxu1  ;;  %v1486_v6 = vpop.f32.mrf.mxu2  ;;  %v2463_v23 = vld [vmem:[#allocation7 + $0x1b8] sm:$0xff] }
 0x307   : > { %v1214_v38 = vpop.f32.mrf.mxu0  ;;  %2512 = vmatpush.msra.mxu1 %v2463_v23  ;;  %v7217_v6 = vld [vmem:[#allocation72_spill] sm:$0xff]  ;;  %v7219_v23 = vld [vmem:[#allocation77_spill] sm:$0xff] }
 0x309   : > { %v1623_v55 = vpop.f32.mrf.mxu3  ;;  %2513 = vmatpush.msra.mxu1 %v2462_v53 }
 0x30a   : > { %1261 = vmatmul.f32.gmra.mxu0 %v5376_v16 }
 0x30b   : > { %1536 = vmatmul.f32.gmra.mxu2 %v7214_v11  ;;  %v5392_v11 = vld [vmem:[#allocation2 + $0x130] sm:$0xff] }
 0x30e   : > { %1673 = vmatmul.f32.gmra.mxu3 %v5303_v52  ;;  %v5386_v24 = vpop.f32.mrf.mxu1  ;;  %v1489_v18 = vpop.f32.mrf.mxu2 }
 0x30f   : > { %v5379_v62 = vpop.f32.mrf.mxu0  ;;  %7215 = vst [vmem:[#allocation65_spill] sm:$0xff] %v5386_v24  ;;  %v5401_v18 = vld [vmem:[#allocation2 + $0x138] sm:$0xff] }
 0x310   : > { %7213 = vst [vmem:[#allocation63_spill] sm:$0xff] %v5379_v62 }
 0x311   : > { %v1626_v38 = vpop.f32.mrf.mxu3 }
 0x312   : > { %1264 = vmatmul.f32.gmra.mxu0 %v5383_v9 }
 0x313   : > { %1539 = vmatmul.f32.gmra.mxu2 %v7217_v6 }
 0x316   : > { %1676 = vmatmul.f32.gmra.mxu3 %v5311_v35  ;;  %v5395_v52 = vpop.f32.mrf.mxu1  ;;  %v1492_v55 = vpop.f32.mrf.mxu2  ;;  %v2478_v35 = vld [vmem:[#allocation7 + $0x230] sm:$0xff] }
 0x317   : > { %v5388_v8 = vpop.f32.mrf.mxu0  ;;  %7218 = vst [vmem:[#allocation72_spill] sm:$0xff] %v5395_v52  ;;  %2610 = vmatpush.msra.mxu2 %v2478_v35 }
 0x318   : > { %7216 = vst [vmem:[#allocation68_spill] sm:$0xff] %v5388_v8 }
 0x319   : > { %v1629_v15 = vpop.f32.mrf.mxu3 }
 0x31a   : > { %1267 = vmatmul.f32.gmra.mxu0 %v5392_v11  ;;  %v5397_v62 = vadd.f32 %v1629_v15, %v1492_v55 }
 0x31b   : > { %1542 = vmatmul.f32.gmra.mxu2 %v7219_v23 }
 0x31e   : > { %1679 = vmatmul.f32.gmra.mxu3 %v5324_v39  ;;  %v1372_v38 = vpop.f32.mrf.mxu1  ;;  %v1495_v6 = vpop.f32.mrf.mxu2 }
 0x31f   : > { %v1223_v24 = vpop.f32.mrf.mxu0 }
 0x321   : > { %v1632_v8 = vpop.f32.mrf.mxu3 }
 0x322   : > { %1270 = vmatmul.f32.gmra.mxu0 %v5401_v18  ;;  %v5404_v12 = vadd.f32 %v1632_v8, %v1495_v6 }
 0x323   : > { %1545 = vmatmul.f32.gmra.mxu2 %v4824_v44 }
 0x326   : > { %1682 = vmatmul.f32.gmra.mxu3 %v5332_v21  ;;  %v1375_v39 = vpop.f32.mrf.mxu1  ;;  %v1498_v24 = vpop.f32.mrf.mxu2  ;;  %v2477_v21 = vld [vmem:[#allocation7 + $0x228] sm:$0xff] }
 0x327   : > { %v1226_v52 = vpop.f32.mrf.mxu0  ;;  %2611 = vmatpush.msra.mxu2 %v2477_v21  ;;  %v2476_v39 = vld [vmem:[#allocation7 + $0x220] sm:$0xff] }
 0x329   : > { %v1635_v55 = vpop.f32.mrf.mxu3  ;;  %2612 = vmatpush.msra.mxu2 %v2476_v39  ;;  %v2474_v39 = vld [vmem:[#allocation7 + $0x210] sm:$0xff] }
 0x32a   : > { %1750 = vmatmul.f32.vlgmr.msrb.gmra.mxu0 %v4990_v59  ;;  %v2461_v59 = vld [vmem:[#allocation7 + $0x1a8] sm:$0xff] }
 0x32b   : > { %1548 = vmatmul.f32.gmra.mxu2 %v4839_v49  ;;  %2514 = vmatpush.msra.mxu1 %v2461_v59  ;;  %v2475_v59 = vld [vmem:[#allocation7 + $0x218] sm:$0xff] }
 0x32c   : > { %2613 = vmatpush.msra.mxu2 %v2475_v59  ;;  %v2502_v59 = vld [vmem:[#allocation7 + $0x2f0] sm:$0xff] }
 0x32e   : > { %1685 = vmatmul.f32.gmra.mxu3 %v5340_v1  ;;  %v5414_v8 = vpop.f32.mrf.mxu1  ;;  %v1501_v53 = vpop.f32.mrf.mxu2  ;;  %2614 = vmatpush.msra.mxu2 %v2474_v39 }
 0x32f   : > { %v5409_v15 = vpop.f32.mrf.mxu0 }
 0x331   : > { %v1638_v52 = vpop.f32.mrf.mxu3 }
 0x332   : > { %1753 = vmatmul.f32.gmra.mxu0 %v5001_v26 }
 0x333   : > { %1551 = vmatmul.f32.gmra.mxu2 %v4856_v0 }
 0x336   : > { %1688 = vmatmul.f32.gmra.mxu3 %v5348_v29  ;;  %v5421_v49 = vpop.f32.mrf.mxu1  ;;  %v1504_v1 = vpop.f32.mrf.mxu2 }
 0x337   : > { %v5416_v44 = vpop.f32.mrf.mxu0 }
 0x339   : > { %v1641_v26 = vpop.f32.mrf.mxu3 }
 0x33a   : > { %1756 = vmatmul.f32.gmra.mxu0 %v5012_v48  ;;  %v5423_v23 = vadd.f32 %v1641_v26, %v1504_v1 }
 0x33b   : > { %1554 = vmatmul.f32.gmra.mxu2 %v4877_v2 }
 0x33e   : > { %1691 = vmatmul.f32.gmra.mxu3 %v5358_v57  ;;  %v1384_v0 = vpop.f32.mrf.mxu1  ;;  %v1507_v29 = vpop.f32.mrf.mxu2 }
 0x33f   : > { %v1235_v35 = vpop.f32.mrf.mxu0 }
 0x341   : > { %v1644_v38 = vpop.f32.mrf.mxu3 }
 0x342   : > { %1759 = vmatmul.f32.gmra.mxu0 %v5021_v45  ;;  %v5428_v48 = vadd.f32 %v1644_v38, %v1507_v29  ;;  %v2460_v45 = vld [vmem:[#allocation7 + $0x1a0] sm:$0xff]  ;;  %v7220_v38 = vld [vmem:[#allocation22_spill] sm:$0xff] }
 0x343   : > { %1557 = vmatmul.f32.gmra.mxu2 %v4889_v33  ;;  %2515 = vmatpush.msra.mxu1 %v2460_v45  ;;  %v3865_v45 = vld [vmem:[#allocation2 + $0x148] sm:$0xff] }
 0x346   : > { %1694 = vmatmul.f32.gmra.mxu3 %v5368_v36  ;;  %v1387_v24 = vpop.f32.mrf.mxu1  ;;  %v1510_v2 = vpop.f32.mrf.mxu2 }
 0x347   : > { %v1238_v6 = vpop.f32.mrf.mxu0  ;;  %v2458_v2 = vld [vmem:[#allocation7 + $0x190] sm:$0xff] }
 0x348   : > { %v3864_v6 = vld [vmem:[#allocation2 + $0x140] sm:$0xff] }
 0x349   : > { %v1647_v55 = vpop.f32.mrf.mxu3 }
 0x34a   : > { %1762 = vmatmul.f32.gmra.mxu0 %v5030_v19  ;;  %v7222_v55 = vld [vmem:[#allocation23_spill] sm:$0xff] }
 0x34b   : > { %1560 = vmatmul.f32.gmra.mxu2 %v4898_v13 }
 0x34e   : > { %1697 = vmatmul.f32.gmra.mxu3 %v5376_v16  ;;  %v5438_v33 = vpop.f32.mrf.mxu1  ;;  %v1513_v36 = vpop.f32.mrf.mxu2 }
 0x34f   : > { %v5433_v57 = vpop.f32.mrf.mxu0 }
 0x351   : > { %v1650_v53 = vpop.f32.mrf.mxu3 }
 0x352   : > { %1765 = vmatmul.f32.gmra.mxu0 %v5041_v46 }
 0x353   : > { %1563 = vmatmul.f32.gmra.mxu2 %v4909_v40  ;;  %v2459_v40 = vld [vmem:[#allocation7 + $0x198] sm:$0xff] }
 0x354   : > { %2516 = vmatpush.msra.mxu1 %v2459_v40 }
 0x356   : > { %1700 = vmatmul.f32.gmra.mxu3 %v5383_v9  ;;  %v5445_v52 = vpop.f32.mrf.mxu1  ;;  %v1516_v13 = vpop.f32.mrf.mxu2  ;;  %2517 = vmatpush.msra.mxu1 %v2458_v2  ;;  %v5490_v2 = vld [vmem:[#allocation2 + $0x168] sm:$0xff] }
 0x357   : > { %v5440_v19 = vpop.f32.mrf.mxu0 }
 0x359   : > { %v1653_v21 = vpop.f32.mrf.mxu3 }
 0x35a   : > { %1768 = vmatmul.f32.gmra.mxu0 %v5050_v4  ;;  %v5447_v16 = vadd.f32 %v1653_v21, %v1516_v13  ;;  %v7224_v21 = vld [vmem:[#allocation24_spill] sm:$0xff] }
 0x35b   : > { %1566 = vmatmul.f32.gmra.mxu2 %v4922_v51 }
 0x35e   : > { %1703 = vmatmul.f32.gmra.mxu3 %v5392_v11  ;;  %v1396_v1 = vpop.f32.mrf.mxu1  ;;  %v1519_v9 = vpop.f32.mrf.mxu2 }
 0x35f   : > { %v1247_v46 = vpop.f32.mrf.mxu0 }
 0x360   : > { %v3866_v46 = vld [vmem:[#allocation2 + $0x150] sm:$0xff] }
 0x361   : > { %v1656_v4 = vpop.f32.mrf.mxu3 }
 0x362   : > { %1771 = vmatmul.f32.gmra.mxu0 %v5063_v50  ;;  %v5452_v26 = vadd.f32 %v1656_v4, %v1519_v9  ;;  %v2503_v50 = vld [vmem:[#allocation7 + $0x2f8] sm:$0xff]  ;;  %v2473_v4 = vld [vmem:[#allocation7 + $0x208] sm:$0xff] }
 0x363   : > { %1569 = vmatmul.f32.gmra.mxu2 %v4934_v54  ;;  %2698 = vmatpush.msra.mxu3 %v2503_v50  ;;  %v340_v50 = vrot.slane %v5188_v10, 7 }
 0x364   : > { %2615 = vmatpush.msra.mxu2 %v2473_v4  ;;  %v2456_v4 = vld [vmem:[#allocation7 + $0x180] sm:$0xff] }
 0x365   : > { %2699 = vmatpush.msra.mxu3 %v2502_v59  ;;  %v2472_v59 = vld [vmem:[#allocation7 + $0x200] sm:$0xff] }
 0x366   : > { %1706 = vmatmul.f32.gmra.mxu3 %v5401_v18  ;;  %v1399_v0 = vpop.f32.mrf.mxu1  ;;  %v1522_v51 = vpop.f32.mrf.mxu2  ;;  %2616 = vmatpush.msra.mxu2 %v2472_v59  ;;  %v7233_v59 = vld [vmem:[#allocation49_spill] sm:$0xff] }
 0x367   : > { %v1250_v35 = vpop.f32.mrf.mxu0  ;;  %v3867_v0 = vld [vmem:[#allocation2 + $0x158] sm:$0xff]  ;;  %v2457_v51 = vld [vmem:[#allocation7 + $0x188] sm:$0xff] }
 0x368   : > { %v7225_v35 = vld [vmem:[#allocation25_spill] sm:$0xff]  ;;  %2518 = vmatpush.msra.mxu1 %v2457_v51 }
 0x369   : > { %v1659_v29 = vpop.f32.mrf.mxu3  ;;  %v2500_v51 = vld [vmem:[#allocation7 + $0x2e0] sm:$0xff] }
 0x36a   : > { %1774 = vmatmul.f32.gmra.mxu0 %v5075_v41  ;;  %2519 = vmatpush.msra.mxu1 %v2456_v4  ;;  %v2497_v4 = vld [vmem:[#allocation7 + $0x2c8] sm:$0xff] }
 0x36b   : > { %1572 = vmatmul.f32.gmra.mxu2 %v7220_v38 }
 0x36e   : > { %1709 = vmatmul.f32.gmra.mxu3 %v3864_v6  ;;  %v5461_v24 = vpop.f32.mrf.mxu1  ;;  %v1525_v54 = vpop.f32.mrf.mxu2  ;;  %v7227_v6 = vrot.slane %v4352_v60, 7 }
 0x36f   : > { %v5457_v11 = vpop.f32.mrf.mxu0  ;;  %7221 = vst [vmem:[#allocation77_spill] sm:$0xff] %v5461_v24 }
 0x370   : > { %v350_v54 = vsel %vm346_vm0, %v7227_v6, %v340_v50 }
 0x371   : > { %v1662_v18 = vpop.f32.mrf.mxu3 }
 0x372   : > { %1777 = vmatmul.f32.gmra.mxu0 %v5092_v61 }
 0x373   : > { %1575 = vmatmul.f32.gmra.mxu2 %v7222_v55  ;;  %v341_v55 = vrot.slane %v5490_v2, 7 }
 0x376   : > { %1712 = vmatmul.f32.gmra.mxu3 %v3865_v45  ;;  %v5467_v36 = vpop.f32.mrf.mxu1  ;;  %v5469_v61 = vpop.f32.mrf.mxu2 }
 0x377   : > { %v5463_v41 = vpop.f32.mrf.mxu0  ;;  %7223 = vst [vmem:[#allocation22_spill] sm:$0xff] %v5467_v36  ;;  %v2494_v36 = vld [vmem:[#allocation7 + $0x2b0] sm:$0xff] }
 0x379   : > { %v5471_v53 = vpop.f32.mrf.mxu3 }
 0x37a   : > { %1780 = vmatmul.f32.gmra.mxu0 %v7164_v56 }
 0x37b   : > { %1578 = vmatmul.f32.gmra.mxu2 %v7224_v21 }
 0x37e   : > { %1715 = vmatmul.f32.gmra.mxu3 %v3866_v46  ;;  %v1408_v40 = vpop.f32.mrf.mxu1  ;;  %v5475_v1 = vpop.f32.mrf.mxu2  ;;  %v2501_v46 = vld [vmem:[#allocation7 + $0x2e8] sm:$0xff] }
 0x37f   : > { %v1259_v13 = vpop.f32.mrf.mxu0  ;;  %2700 = vmatpush.msra.mxu3 %v2501_v46  ;;  %v2498_v46 = vld [vmem:[#allocation7 + $0x2d0] sm:$0xff] }
 0x380   : > { %v349_v13 = vsel %vm346_vm0, %v340_v50, %v341_v55  ;;  %v7231_v50 = vld [vmem:[#allocation47_spill] sm:$0xff] }
 0x381   : > { %v5477_v56 = vpop.f32.mrf.mxu3  ;;  %2701 = vmatpush.msra.mxu3 %v2500_v51  ;;  %v7235_v51 = vld [vmem:[#allocation98_spill] sm:$0xff] }
 0x382   : > { %1783 = vmatmul.f32.gmra.mxu0 %v7166_v20 }
 0x383   : > { %1581 = vmatmul.f32.gmra.mxu2 %v7225_v35 }
 0x386   : > { %1718 = vmatmul.f32.gmra.mxu3 %v3867_v0  ;;  %v1534_v29 = vpop.f32.mrf.mxu2  ;;  %v6928_v0 = vmov 0.0  }
 0x387   : > { %v1262_v9 = vpop.f32.mrf.mxu0  ;;  %v2499_v29 = vld [vmem:[#allocation7 + $0x2d8] sm:$0xff] }
 0x388   : > { %2702 = vmatpush.msra.mxu3 %v2499_v29  ;;  %v2496_v29 = vld [vmem:[#allocation7 + $0x2c0] sm:$0xff] }
 0x389   : > { %v1671_v20 = vpop.f32.mrf.mxu3 }
 0x38a   : > { %1786 = vmatmul.f32.gmra.mxu0 %v7169_v47  ;;  %v7230_v20 = vld [vmem:[#allocation46_spill] sm:$0xff]  ;;  %2703 = vmatpush.msra.mxu3 %v2498_v46  ;;  %v7238_v46 = vld [vmem:[#allocation113_spill] sm:$0xff] }
 0x38b   : > { %1584 = vmatmul.f32.gmra.mxu2 %v350_v54  ;;  %v747_v6 = vadd.f32 %v7231_v50, %v7230_v20  ;;  %v2495_v50 = vld [vmem:[#allocation7 + $0x2b8] sm:$0xff] }
 0x38c   : > { %2704 = vmatpush.msra.mxu3 %v2497_v4  ;;  %v7240_v4 = vmov 0.0  }
 0x38e   : > { %1721 = vmatmul.f32.gmra.mxu3 %v5188_v10  ;;  %v1537_v18 = vpop.f32.mrf.mxu2 }
 0x38f   : > { %v5482_v38 = vpop.f32.mrf.mxu0  ;;  %2705 = vmatpush.msra.mxu3 %v2496_v29  ;;  %v2492_v29 = vld [vmem:[#allocation7 + $0x2a0] sm:$0xff] }
 0x390   : > { %7226 = vst [vmem:[#allocation23_spill] sm:$0xff] %v5482_v38 }
 0x391   : > { %v1674_v47 = vpop.f32.mrf.mxu3  ;;  %2706 = vmatpush.msra.mxu3 %v2495_v50  ;;  %v7243_v50 = vld [vmem:[#allocation33_spill] sm:$0xff] }
 0x392   : > { %1789 = vmatmul.f32.gmra.mxu0 %v7172_v28  ;;  %v5503_v28 = vld [vmem:[#allocation2 + $0x170] sm:$0xff]  ;;  %v7232_v47 = vld [vmem:[#allocation112_spill] sm:$0xff] }
 0x393   : > { %1587 = vmatmul.f32.gmra.mxu2 %v349_v13  ;;  %v342_v40 = vrot.slane %v5503_v28, 7  ;;  %2707 = vmatpush.msra.mxu3 %v2494_v36 }
 0x395   : > { %v348_v35 = vsel %vm346_vm0, %v341_v55, %v342_v40  ;;  %v884_v55 = vadd.f32 %v7232_v47, %v747_v6  ;;  %v7236_v6 = vld [vmem:[#allocation52_spill] sm:$0xff]  ;;  %v7237_v47 = vld [vmem:[#allocation53_spill] sm:$0xff] }
 0x396   : > { %1724 = vmatmul.f32.gmra.mxu3 %v5490_v2  ;;  %v5499_v60 = vpop.f32.mrf.mxu2 }
 0x397   : > { %v5493_v45 = vpop.f32.mrf.mxu0  ;;  %v1021_v20 = vadd.f32 %v7235_v51, %v884_v55  ;;  %v7239_v55 = vld [vmem:[#allocation123_spill] sm:$0xff] }
 0x398   : > { %7229 = vst [vmem:[#allocation24_spill] sm:$0xff] %v5493_v45  ;;  %v2493_v45 = vld [vmem:[#allocation7 + $0x2a8] sm:$0xff] }
 0x399   : > { %v5501_v21 = vpop.f32.mrf.mxu3  ;;  %2708 = vmatpush.msra.mxu3 %v2493_v45  ;;  %v7245_v45 = vld [vmem:[#allocation125_spill] sm:$0xff] }
 0x39a   : > { %1792 = vmatmul.f32.gmra.mxu0 %v7176_v27  ;;  %v5509_v27 = vrot.slane %v6928_v0, 7 }
 0x39b   : > { %1590 = vmatmul.f32.gmra.mxu2 %v348_v35  ;;  %v5525_v35 = vld [vmem:[#allocation2 + $0x178] sm:$0xff]  ;;  %2709 = vmatpush.msra.mxu3 %v2492_v29  ;;  %v7246_v29 = vmov 0 }
 0x39c   : > { %2520 = vmatmul.f32.vlgmr.msra.gmra.mxu1 %v5509_v27 }
 0x39e   : > { %1727 = vmatmul.f32.gmra.mxu3 %v5503_v28  ;;  %v5516_v54 = vpop.f32.mrf.mxu2 }
 0x39f   : > { %v1271_v9 = vpop.f32.mrf.mxu0 }
 0x3a0   : > { %v7234_v9 = vrot.slane %v7233_v59, 7  ;;  %v1158_v59 = vadd.f32 %v5205_v30, %v1021_v20  ;;  %v5541_v20 = vld [vmem:[%s6844_s2] ss:$0 sm:$0xff] }
 0x3a1   : > { %v5518_v18 = vpop.f32.mrf.mxu3 }
 0x3a2   : > { %1795 = vmatmul.f32.gmra.mxu0 %v7177_v63  ;;  %v347_v63 = vsel %vm346_vm0, %v342_v40, %v7234_v9  ;;  %v1295_v51 = vadd.f32 %v7239_v55, %v1158_v59  ;;  %v5547_v59 = vstv %s3620_s28 }
 0x3a3   : > { %1593 = vmatmul.f32.gmra.mxu2 %v347_v63  ;;  %vm1969_vm2 = vcmp.ge.s32.totalorder %v5547_v59, 0  ;;  %vm1979_vm3 = vcmp.lt.s32.totalorder %v5547_v59, 16 }
 0x3a4   : > { %vm5558_vm4 = vmand %vm1969_vm2, %vm1979_vm3 }
 0x3a5   : > { %v7247_v29 = vsel %vm5558_vm4, 4294967295, %v7246_v29 }
 0x3a6   : > { %1730 = vmatmul.f32.gmra.mxu3 %v5525_v35  ;;  %v1546_v40 = vpop.f32.mrf.mxu2  ;;  %7248 = vst [vmem:[#allocation46_spill] sm:$0xff] %v7247_v29 }
 0x3a7   : > { %v1751_v13 = vpop.f32.mrf.mxu0 }
 0x3a8   : > { %v750_v13 = vadd.f32 %v7237_v47, %v7236_v6  ;;  %v7241_v6 = vld [vmem:[#allocation99_spill] sm:$0xff] }
 0x3a9   : > { %v1683_v9 = vpop.f32.mrf.mxu3 }
 0x3aa   : > { %1798 = vmatmul.f32.gmra.mxu0 %v7178_v17  ;;  %v887_v63 = vadd.f32 %v7238_v46, %v750_v13  ;;  %v2491_v13 = vld [vmem:[#allocation7 + $0x298] sm:$0xff] }
 0x3ab   : > { %2617 = vmatmul.f32.vlgmr.msra.gmra.mxu2 %v7240_v4  ;;  %v2438_v9 = vld [vmem:[#allocation7 + $0xf8] sm:$0xff]  ;;  %2710 = vmatpush.msra.mxu3 %v2491_v13  ;;  %v2437_v13 = vld [vmem:[#allocation7 + $0xf0] sm:$0xff] }
 0x3ac   : > { %v1024_v47 = vadd.f32 %v7241_v6, %v887_v63  ;;  %v2422_v46 = vld [vmem:[#allocation7 + $0x78] sm:$0xff]  ;;  %2892 = vmatpush.msrb.mxu2 %v2438_v9 }
 0x3ad   : > { %2795 = vmatpush.msrb.mxu1 %v2422_v46 }
 0x3ae   : > { %v1549_v36 = vpop.f32.mrf.mxu2  ;;  %2893 = vmatpush.msrb.mxu2 %v2437_v13  ;;  %v2421_v13 = vld [vmem:[#allocation7 + $0x70] sm:$0xff] }
 0x3af   : > { %v1754_v0 = vpop.f32.mrf.mxu0  ;;  %2796 = vmatpush.msrb.mxu1 %v2421_v13  ;;  %v7262_v13 = vld [vmem:[#allocation31_spill] sm:$0xff] }
 0x3b0   : > { %v1755_v17 = vadd.f32 %v1754_v0, %v5363_v7  ;;  %v1161_v7 = vadd.f32 %v7243_v50, %v1024_v47 }
 0x3b1   : > { %v1686_v0 = vpop.f32.mrf.mxu3 }
 0x3b2   : > { %v1872_v30 = vadd.f32 %v1755_v17, %v1295_v51  ;;  %1801 = vmatmul.f32.gmra.mxu0 %v7182_v31  ;;  %v2490_v31 = vld [vmem:[#allocation7 + $0x290] sm:$0xff]  ;;  %v1298_v55 = vadd.f32 %v7245_v45, %v1161_v7  ;;  %v2489_v17 = vld [vmem:[#allocation7 + $0x288] sm:$0xff] }
 0x3b3   : > { %2711 = vmatpush.msra.mxu3 %v2490_v31 }
 0x3b4   : > { %v5550_v40 = vadd.f32 %v5541_v20, %v1872_v30  ;;  %v2488_v30 = vld [vmem:[#allocation7 + $0x280] sm:$0xff] }
 0x3b5   : > { %2712 = vmatpush.msra.mxu3 %v2489_v17  ;;  %v7254_v17 = vld [vmem:[#allocation59_spill] sm:$0xff] }
 0x3b6   : > { %7244 = vst [vmem:[#allocation25_spill] sm:$0xff] %v5550_v40  ;;  %v6933_v6 = vmax.f32 %v5550_v40, 0.0  ;;  %v1960_v40 = vadd.s32 1, %v5547_v59 }
 0x3b7   : > { %v1757_v63 = vpop.f32.mrf.mxu0  ;;  %2713 = vmatpush.msra.mxu3 %v2488_v30 }
 0x3b8   : > { %v1758_v51 = vadd.f32 %v1757_v63, %v5371_v34  ;;  %v5565_v34 = vpop.f32.mrf.mxu2  ;;  %vm1970_vm5 = vcmp.ge.s32.totalorder %v1960_v40, 0  ;;  %vm1980_vm6 = vcmp.lt.s32.totalorder %v1960_v40, 16 }
 0x3b9   : > { %v5567_v7 = vpop.f32.mrf.mxu3  ;;  %vm5623_vm7 = vmand %vm1970_vm5, %vm1980_vm6 }
 0x3ba   : > { %v1873_v47 = vadd.f32 %v1758_v51, %v1298_v55  ;;  %1804 = vmatmul.f32.gmra.mxu0 %v7186_v58  ;;  %v5574_v58 = vsel %vm5558_vm4, %v6933_v6, 0.0  ;;  %v7257_v6 = vld [vmem:[#allocation106_spill] sm:$0xff] }
 0x3bb   : > { %7250 = vst [vmem:[#allocation112_spill] sm:$0xff] %v5574_v58  ;;  %v6932_v46 = vrot.slane %v5574_v58, 7  ;;  %v6938_v63 = vrot.slane %v5574_v58, 1 }
 0x3bc   : > { %v5563_v50 = vadd.f32 %v5541_v20, %v1873_v47  ;;  %v7255_v47 = vld [vmem:[#allocation61_spill] sm:$0xff] }
 0x3bd   : > { %v759_v30 = vadd.f32 %v7255_v47, %v7254_v17  ;;  %v7261_v47 = vld [vmem:[#allocation117_spill] sm:$0xff] }
 0x3be   : > { %7249 = vst [vmem:[#allocation47_spill] sm:$0xff] %v5563_v50  ;;  %v6930_v36 = vmax.f32 %v5563_v50, 0.0  ;;  %v7259_v50 = vld [vmem:[#allocation64_spill] sm:$0xff] }
 0x3bf   : > { %v1760_v0 = vpop.f32.mrf.mxu0 }
 0x3c0   : > { %v5580_v9 = vsel %vm5558_vm4, %v6930_v36, 0.0  ;;  %v7256_v36 = vld [vmem:[#allocation116_spill] sm:$0xff] }
 0x3c1   : > { %7251 = vst [vmem:[#allocation49_spill] sm:$0xff] %v5580_v9  ;;  %v6931_v31 = vrot.slane %v5580_v9, 7  ;;  %v6937_v45 = vrot.slane %v5580_v9, 1  ;;  %v5607_v0 = vpop.f32.mrf.mxu3 }
 0x3c2   : > { %1807 = vmatmul.f32.gmra.mxu0 %v7187_v32  ;;  %v5605_v32 = vpop.f32.mrf.mxu2 }
 0x3c3   : > { %v5593_v55 = vsel %vm346_vm0, %v6932_v46, %v6931_v31  ;;  %v5601_v51 = vsel %vm443_vm1, %v6938_v63, %v6937_v45  ;;  %v896_v31 = vadd.f32 %v7256_v36, %v759_v30  ;;  %v7260_v63 = vld [vmem:[#allocation35_spill] sm:$0xff] }
 0x3c4   : > { %7252 = vst [vmem:[#allocation98_spill] sm:$0xff] %v5593_v55  ;;  %v7258_v55 = vld [vmem:[#allocation62_spill] sm:$0xff] }
 0x3c5   : > { %7253 = vst [vmem:[#allocation52_spill] sm:$0xff] %v5601_v51  ;;  %v1033_v9 = vadd.f32 %v7257_v6, %v896_v31  ;;  %v762_v45 = vadd.f32 %v7259_v50, %v7258_v55 }
 0x3c7   : > { %v1763_v46 = vpop.f32.mrf.mxu0  ;;  %v1170_v51 = vadd.f32 %v7260_v63, %v1033_v9  ;;  %v899_v29 = vadd.f32 %v7261_v47, %v762_v45  ;;  %v7265_v45 = vmov 0  ;;  %v5638_v47 = vrot.slane %v7240_v4, 1 }
 0x3c8   : > { %v7263_v46 = vld [vmem:[#allocation107_spill] sm:$0xff]  ;;  %v7266_v45 = vsel %vm5623_vm7, 4294967295, %v7265_v45 }
 0x3c9   : > { %v1695_v17 = vpop.f32.mrf.mxu3  ;;  %v1307_v38 = vadd.f32 %v7262_v13, %v1170_v51  ;;  %v1036_v6 = vadd.f32 %v7263_v46, %v899_v29  ;;  %7267 = vst [vmem:[#allocation53_spill] sm:$0xff] %v7266_v45 }
 0x3ca   : > { %1810 = vmatmul.f32.gmra.mxu0 %v7188_v43  ;;  %v1558_v58 = vpop.f32.mrf.mxu2  ;;  %v7264_v43 = vld [vmem:[#allocation41_spill] sm:$0xff] }
 0x3cb   : > { %v1173_v50 = vadd.f32 %v7264_v43, %v1036_v6 }
 0x3cf   : > { %v1766_v24 = vpop.f32.mrf.mxu0 }
 0x3d0   : > { %v1767_v36 = vadd.f32 %v1766_v24, %v5397_v62  ;;  %v2436_v62 = vld [vmem:[#allocation7 + $0xe8] sm:$0xff] }
 0x3d1   : > { %v1698_v63 = vpop.f32.mrf.mxu3  ;;  %v2420_v24 = vld [vmem:[#allocation7 + $0x68] sm:$0xff]  ;;  %2894 = vmatpush.msrb.mxu2 %v2436_v62 }
 0x3d2   : > { %v1876_v31 = vadd.f32 %v1767_v36, %v1307_v38  ;;  %1813 = vmatmul.f32.gmra.mxu0 %v7191_v42  ;;  %v1561_v9 = vpop.f32.mrf.mxu2  ;;  %2797 = vmatpush.msrb.mxu1 %v2420_v24  ;;  %v7269_v42 = vld [vmem:[#allocation128_spill] sm:$0xff] }
 0x3d3   : > { %v1310_v38 = vadd.f32 %v7269_v42, %v1173_v50  ;;  %v7276_v42 = vld [vmem:[#allocation73_spill] sm:$0xff] }
 0x3d4   : > { %v1920_v58 = vadd.f32 %v5541_v20, %v1876_v31 }
 0x3d6   : > { %v5627_v55 = vmax.f32 %v1920_v58, 0.0  ;;  %v2435_v58 = vld [vmem:[#allocation7 + $0xe0] sm:$0xff] }
 0x3d7   : > { %v1769_v29 = vpop.f32.mrf.mxu0  ;;  %2895 = vmatpush.msrb.mxu2 %v2435_v58 }
 0x3d8   : > { %7268 = vst [vmem:[#allocation113_spill] sm:$0xff] %v5627_v55  ;;  %v1770_v40 = vadd.f32 %v1769_v29, %v5404_v12  ;;  %3621 = vmatmul.msk.f32.gmra.mxu2 %vm5623_vm7, %v5627_v55  ;;  %v2212_v51 = vsel %vm5623_vm7, %v5627_v55, 0.0  ;;  %v7275_v29 = vld [vmem:[#allocation71_spill] sm:$0xff] }
 0x3d9   : > { %v2252_v30 = vrot.slane %v2212_v51, 7  ;;  %v2332_v17 = vrot.slane %v2212_v51, 1  ;;  %v5656_v31 = vpop.f32.mrf.mxu3 }
 0x3da   : > { %v1877_v13 = vadd.f32 %v1770_v40, %v1310_v38  ;;  %1816 = vmatmul.f32.gmra.mxu0 %v7193_v25  ;;  %v5654_v6 = vpop.f32.mrf.mxu2  ;;  %v771_v38 = vadd.f32 %v7276_v42, %v7275_v29  ;;  %v7281_v29 = vld [vmem:[#allocation76_spill] sm:$0xff]  ;;  %v7282_v42 = vld [vmem:[#allocation78_spill] sm:$0xff] }
 0x3db   : > { %v5644_v12 = vsel %vm346_vm0, %v5509_v27, %v2252_v30  ;;  %v5649_v36 = vsel %vm443_vm1, %v5638_v47, %v2332_v17 }
 0x3dc   : > { %7270 = vst [vmem:[#allocation123_spill] sm:$0xff] %v5644_v12  ;;  %v1921_v46 = vadd.f32 %v5541_v20, %v1877_v13  ;;  %2522 = vmatmul.f32.gmra.mxu1 %v5644_v12  ;;  %2714 = vmatmul.f32.vlgmr.msra.gmra.mxu3 %v5649_v36  ;;  %v7277_v13 = vld [vmem:[#allocation120_spill] sm:$0xff]  ;;  %v7322_v12 = vld [vmem:[#allocation82_spill] sm:$0xff] }
 0x3dd   : > { %7271 = vst [vmem:[#allocation99_spill] sm:$0xff] %v5649_v36 }
 0x3de   : > { %v5658_v25 = vmax.f32 %v1921_v46, 0.0 }
 0x3df   : > { %v1772_v43 = vpop.f32.mrf.mxu0 }
 0x3e0   : > { %7272 = vst [vmem:[#allocation33_spill] sm:$0xff] %v5658_v25  ;;  %3622 = vmatmul.msk.f32.gmra.mxu2 %vm5623_vm7, %v5658_v25  ;;  %v2213_v50 = vsel %vm5623_vm7, %v5658_v25, 0.0 }
 0x3e1   : > { %v2253_v9 = vrot.slane %v2213_v50, 7  ;;  %v2333_v63 = vrot.slane %v2213_v50, 1  ;;  %v5681_v51 = vpop.f32.mrf.mxu3 }
 0x3e2   : > { %1819 = vmatmul.f32.gmra.mxu0 %v7194_v37  ;;  %v5679_v40 = vpop.f32.mrf.mxu2  ;;  %v2419_v37 = vld [vmem:[#allocation7 + $0x60] sm:$0xff] }
 0x3e3   : > { %v5669_v62 = vsel %vm346_vm0, %v2252_v30, %v2253_v9  ;;  %v5673_v24 = vsel %vm443_vm1, %v2332_v17, %v2333_v63  ;;  %2798 = vmatpush.msrb.mxu1 %v2419_v37  ;;  %v908_v30 = vadd.f32 %v7277_v13, %v771_v38  ;;  %v7278_v17 = vld [vmem:[#allocation32_spill] sm:$0xff]  ;;  %v5690_v50 = vsel %vm346_vm0, %v2253_v9, %v5509_v27  ;;  %v7283_v37 = vld [vmem:[#allocation42_spill] sm:$0xff] }
 0x3e4   : > { %7273 = vst [vmem:[#allocation125_spill] sm:$0xff] %v5669_v62  ;;  %2525 = vmatmul.f32.gmra.mxu1 %v5669_v62  ;;  %2716 = vmatmul.f32.gmra.mxu3 %v5673_v24  ;;  %v5695_v58 = vsel %vm443_vm1, %v2333_v63, %v5638_v47  ;;  %v774_v38 = vadd.f32 %v7282_v42, %v7281_v29  ;;  %v1961_v9 = vadd.s32 2, %v5547_v59  ;;  %v7285_v62 = vld [vmem:[#allocation37_spill] sm:$0xff]  ;;  %v7286_v29 = vld [vmem:[#allocation34_spill] sm:$0xff] }
 0x3e5   : > { %7274 = vst [vmem:[#allocation59_spill] sm:$0xff] %v5673_v24  ;;  %v1045_v43 = vadd.f32 %v7278_v17, %v908_v30 }
 0x3e6   : > { %7279 = vst [vmem:[#allocation61_spill] sm:$0xff] %v5690_v50  ;;  %vm1971_vm8 = vcmp.ge.s32.totalorder %v1961_v9, 0  ;;  %vm1981_vm9 = vcmp.lt.s32.totalorder %v1961_v9, 16 }
 0x3e7   : > { %v1775_v46 = vpop.f32.mrf.mxu0  ;;  %7280 = vst [vmem:[#allocation116_spill] sm:$0xff] %v5695_v58  ;;  %v1182_v13 = vadd.f32 %v7283_v37, %v1045_v43  ;;  %v7287_v37 = vld [vmem:[#allocation44_spill] sm:$0xff]  ;;  %vm5713_vm10 = vmand %vm1971_vm8, %vm1981_vm9 }
 0x3e8   : > { %2625 = vmatmul.f32.gmra.mxu2 %v7240_v4  ;;  %v7284_v46 = vld [vmem:[#allocation122_spill] sm:$0xff] }
 0x3e9   : > { %v1707_v30 = vpop.f32.mrf.mxu3  ;;  %v911_v17 = vadd.f32 %v7284_v46, %v774_v38  ;;  %v1319_v25 = vadd.f32 %v7285_v62, %v1182_v13  ;;  %v7292_v46 = vld [vmem:[#allocation130_spill] sm:$0xff] }
 0x3ea   : > { %1822 = vmatmul.f32.gmra.mxu0 %v4691_v14  ;;  %v1570_v14 = vpop.f32.mrf.mxu2 }
 0x3eb   : > { %v1048_v42 = vadd.f32 %v7286_v29, %v911_v17 }
 0x3ec   : > { %2528 = vmatmul.f32.gmra.mxu1 %v5690_v50  ;;  %2719 = vmatmul.f32.gmra.mxu3 %v5695_v58  ;;  %v7317_v58 = vld [vmem:[#allocation93_spill] sm:$0xff] }
 0x3ed   : > { %v1185_v14 = vadd.f32 %v7287_v37, %v1048_v42 }
 0x3ef   : > { %v1778_v24 = vpop.f32.mrf.mxu0  ;;  %v1322_v17 = vadd.f32 %v7292_v46, %v1185_v14 }
 0x3f0   : > { %v1779_v63 = vadd.f32 %v1778_v24, %v5423_v23  ;;  %2627 = vmatmul.f32.gmra.mxu2 %v7240_v4  ;;  %v7288_v23 = vmov 0 }
 0x3f1   : > { %v1710_v13 = vpop.f32.mrf.mxu3  ;;  %v7289_v23 = vsel %vm5713_vm10, 4294967295, %v7288_v23 }
 0x3f2   : > { %v1880_v43 = vadd.f32 %v1779_v63, %v1319_v25  ;;  %1825 = vmatmul.f32.gmra.mxu0 %v4708_v3  ;;  %v1573_v62 = vpop.f32.mrf.mxu2  ;;  %7290 = vst [vmem:[#allocation106_spill] sm:$0xff] %v7289_v23  ;;  %v2434_v25 = vld [vmem:[#allocation7 + $0xd8] sm:$0xff]  ;;  %v7300_v23 = vld [vmem:[#allocation67_spill] sm:$0xff] }
 0x3f3   : > { %v2418_v3 = vld [vmem:[#allocation7 + $0x58] sm:$0xff]  ;;  %2896 = vmatpush.msrb.mxu2 %v2434_v25 }
 0x3f4   : > { %v1924_v38 = vadd.f32 %v5541_v20, %v1880_v43  ;;  %2530 = vmatmul.f32.gmra.mxu1 %v5509_v27  ;;  %2722 = vmatmul.f32.gmra.mxu3 %v5638_v47 }
 0x3f5   : > { %2799 = vmatpush.msrb.mxu1 %v2418_v3  ;;  %v2433_v3 = vld [vmem:[#allocation7 + $0xd0] sm:$0xff] }
 0x3f6   : > { %v5717_v24 = vmax.f32 %v1924_v38, 0.0  ;;  %2897 = vmatpush.msrb.mxu2 %v2433_v3  ;;  %v7298_v3 = vld [vmem:[#allocation27_spill] sm:$0xff] }
 0x3f7   : > { %v1781_v30 = vpop.f32.mrf.mxu0 }
 0x3f8   : > { %7291 = vst [vmem:[#allocation62_spill] sm:$0xff] %v5717_v24  ;;  %v1782_v9 = vadd.f32 %v1781_v30, %v5428_v48  ;;  %3623 = vmatmul.msk.f32.gmra.mxu2 %vm5713_vm10, %v5717_v24  ;;  %v2216_v63 = vsel %vm5713_vm10, %v5717_v24, 0.0 }
 0x3f9   : > { %v2256_v29 = vrot.slane %v2216_v63, 7  ;;  %v2336_v42 = vrot.slane %v2216_v63, 1  ;;  %v5743_v62 = vpop.f32.mrf.mxu3  ;;  %v7296_v63 = vld [vmem:[#allocation85_spill] sm:$0xff] }
 0x3fa   : > { %v1881_v43 = vadd.f32 %v1782_v9, %v1322_v17  ;;  %1828 = vmatmul.f32.gmra.mxu0 %v4729_v5  ;;  %v5741_v38 = vpop.f32.mrf.mxu2 }
 0x3fb   : > { %v5731_v37 = vsel %vm346_vm0, %v5509_v27, %v2256_v29  ;;  %v5736_v48 = vsel %vm443_vm1, %v5638_v47, %v2336_v42 }
 0x3fc   : > { %7293 = vst [vmem:[#allocation64_spill] sm:$0xff] %v5736_v48  ;;  %v1925_v14 = vadd.f32 %v5541_v20, %v1881_v43  ;;  %2532 = vmatmul.f32.gmra.mxu1 %v5731_v37  ;;  %2724 = vmatmul.f32.gmra.mxu3 %v5736_v48  ;;  %v7297_v43 = vld [vmem:[#allocation86_spill] sm:$0xff] }
 0x3fe   : > { %v5745_v5 = vmax.f32 %v1925_v14, 0.0  ;;  %v783_v14 = vadd.f32 %v7297_v43, %v7296_v63 }
 0x3ff   : > { %v1784_v13 = vpop.f32.mrf.mxu0 }
 0x400   : > { %7294 = vst [vmem:[#allocation35_spill] sm:$0xff] %v5745_v5  ;;  %3624 = vmatmul.msk.f32.gmra.mxu2 %vm5713_vm10, %v5745_v5  ;;  %v2217_v25 = vsel %vm5713_vm10, %v5745_v5, 0.0 }
 0x401   : > { %v2257_v30 = vrot.slane %v2217_v25, 7  ;;  %v2337_v46 = vrot.slane %v2217_v25, 1  ;;  %v5768_v25 = vpop.f32.mrf.mxu3 }
 0x402   : > { %1831 = vmatmul.f32.gmra.mxu0 %v4749_v22  ;;  %v5766_v13 = vpop.f32.mrf.mxu2  ;;  %v2417_v22 = vld [vmem:[#allocation7 + $0x50] sm:$0xff] }
 0x403   : > { %v5756_v17 = vsel %vm346_vm0, %v2256_v29, %v2257_v30  ;;  %v5760_v9 = vsel %vm443_vm1, %v2336_v42, %v2337_v46  ;;  %2800 = vmatpush.msrb.mxu1 %v2417_v22  ;;  %v920_v29 = vadd.f32 %v7298_v3, %v783_v14  ;;  %v7299_v42 = vld [vmem:[#allocation54_spill] sm:$0xff]  ;;  %v5777_v63 = vsel %vm346_vm0, %v2257_v30, %v5509_v27  ;;  %v7302_v22 = vld [vmem:[#allocation45_spill] sm:$0xff] }
 0x404   : > { %7295 = vst [vmem:[#allocation117_spill] sm:$0xff] %v5760_v9  ;;  %2535 = vmatmul.f32.gmra.mxu1 %v5756_v17  ;;  %2726 = vmatmul.f32.gmra.mxu3 %v5760_v9  ;;  %v5782_v43 = vsel %vm443_vm1, %v2337_v46, %v5638_v47  ;;  %v7304_v46 = vld [vmem:[#allocation70_spill] sm:$0xff] }
 0x405   : > { %v1057_v48 = vadd.f32 %v7299_v42, %v920_v29  ;;  %7301 = vst [vmem:[#allocation31_spill] sm:$0xff] %v5782_v43  ;;  %v7303_v29 = vld [vmem:[#allocation43_spill] sm:$0xff] }
 0x407   : > { %v1787_v5 = vpop.f32.mrf.mxu0  ;;  %v1194_v9 = vadd.f32 %v7302_v22, %v1057_v48 }
 0x408   : > { %2635 = vmatmul.f32.gmra.mxu2 %v7240_v4 }
 0x409   : > { %v1719_v14 = vpop.f32.mrf.mxu3  ;;  %v1331_v42 = vadd.f32 %v7303_v29, %v1194_v9  ;;  %v2432_v9 = vld [vmem:[#allocation7 + $0xc8] sm:$0xff] }
 0x40a   : > { %1834 = vmatmul.f32.gmra.mxu0 %v7300_v23  ;;  %v1582_v5 = vpop.f32.mrf.mxu2  ;;  %v1962_v23 = vadd.s32 3, %v5547_v59  ;;  %v7305_v14 = vmov 0  ;;  %2898 = vmatpush.msrb.mxu2 %v2432_v9 }
 0x40c   : > { %2538 = vmatmul.f32.gmra.mxu1 %v5777_v63  ;;  %2729 = vmatmul.f32.gmra.mxu3 %v5782_v43  ;;  %vm1972_vm11 = vcmp.ge.s32.totalorder %v1962_v23, 0  ;;  %vm1982_vm12 = vcmp.lt.s32.totalorder %v1962_v23, 16 }
 0x40d   : > { %vm5795_vm13 = vmand %vm1972_vm11, %vm1982_vm12 }
 0x40e   : > { %v7306_v14 = vsel %vm5795_vm13, 4294967295, %v7305_v14 }
 0x40f   : > { %v1790_v3 = vpop.f32.mrf.mxu0  ;;  %7307 = vst [vmem:[#allocation107_spill] sm:$0xff] %v7306_v14 }
 0x410   : > { %v1791_v30 = vadd.f32 %v1790_v3, %v5447_v16  ;;  %2637 = vmatmul.f32.gmra.mxu2 %v7240_v4  ;;  %v2416_v3 = vld [vmem:[#allocation7 + $0x48] sm:$0xff] }
 0x411   : > { %v1722_v5 = vpop.f32.mrf.mxu3  ;;  %2801 = vmatpush.msrb.mxu1 %v2416_v3 }
 0x412   : > { %v1884_v24 = vadd.f32 %v1791_v30, %v1331_v42  ;;  %1837 = vmatmul.f32.gmra.mxu0 %v7304_v46  ;;  %v1585_v22 = vpop.f32.mrf.mxu2  ;;  %v7309_v46 = vld [vmem:[#allocation132_spill] sm:$0xff] }
 0x413   : > { %v7310_v22 = vld [vmem:[#allocation75_spill] sm:$0xff] }
 0x414   : > { %v1928_v48 = vadd.f32 %v5541_v20, %v1884_v24  ;;  %2540 = vmatmul.f32.gmra.mxu1 %v5509_v27  ;;  %2732 = vmatmul.f32.gmra.mxu3 %v5638_v47 }
 0x416   : > { %v5799_v16 = vmax.f32 %v1928_v48, 0.0 }
 0x417   : > { %v1793_v29 = vpop.f32.mrf.mxu0 }
 0x418   : > { %7308 = vst [vmem:[#allocation41_spill] sm:$0xff] %v5799_v16  ;;  %v1794_v23 = vadd.f32 %v1793_v29, %v5452_v26  ;;  %3625 = vmatmul.msk.f32.gmra.mxu2 %vm5795_vm13, %v5799_v16  ;;  %v2220_v24 = vsel %vm5795_vm13, %v5799_v16, 0.0 }
 0x419   : > { %v2260_v42 = vrot.slane %v2220_v24, 7  ;;  %v2340_v30 = vrot.slane %v2220_v24, 1  ;;  %v5825_v29 = vpop.f32.mrf.mxu3 }
 0x41a   : > { %v1885_v48 = vadd.f32 %v1794_v23, %v7309_v46  ;;  %1840 = vmatmul.f32.gmra.mxu0 %v7310_v22  ;;  %v5823_v3 = vpop.f32.mrf.mxu2  ;;  %7312 = vst [vmem:[#allocation71_spill] sm:$0xff] %v5825_v29  ;;  %v2521_v46 = vpop.f32.mrf.mxu1  ;;  %v2431_v22 = vld [vmem:[#allocation7 + $0xc0] sm:$0xff] }
 0x41b   : > { %v5813_v5 = vsel %vm346_vm0, %v5509_v27, %v2260_v42  ;;  %v5818_v26 = vsel %vm443_vm1, %v5638_v47, %v2340_v30  ;;  %2899 = vmatpush.msrb.mxu2 %v2431_v22  ;;  %v7316_v46 = vld [vmem:[#allocation92_spill] sm:$0xff] }
 0x41c   : > { %7311 = vst [vmem:[#allocation128_spill] sm:$0xff] %v5818_v26  ;;  %v1929_v9 = vadd.f32 %v5541_v20, %v1885_v48  ;;  %2542 = vmatmul.f32.gmra.mxu1 %v5813_v5  ;;  %2734 = vmatmul.f32.gmra.mxu3 %v5818_v26  ;;  %v7314_v26 = vld [vmem:[#allocation80_spill] sm:$0xff]  ;;  %v795_v50 = vadd.f32 %v7317_v58, %v7316_v46 }
 0x41d   : > { %v3102_v58 = vld [vmem:[#allocation7 + $0x378] sm:$0xff] }
 0x41e   : > { %v5827_v23 = vmax.f32 %v1929_v9, 0.0  ;;  %3135 = vmatpush.msra.mxu0 %v3102_v58  ;;  %v3100_v58 = vld [vmem:[#allocation7 + $0x368] sm:$0xff] }
 0x41f   : > { %v1796_v24 = vpop.f32.mrf.mxu0 }
 0x420   : > { %7313 = vst [vmem:[#allocation73_spill] sm:$0xff] %v5827_v23  ;;  %3626 = vmatmul.msk.f32.gmra.mxu2 %vm5795_vm13, %v5827_v23  ;;  %v2221_v48 = vsel %vm5795_vm13, %v5827_v23, 0.0 }
 0x421   : > { %v2261_v16 = vrot.slane %v2221_v48, 7  ;;  %v2341_v43 = vrot.slane %v2221_v48, 1  ;;  %v5850_v48 = vpop.f32.mrf.mxu3 }
 0x422   : > { %1843 = vmatmul.f32.gmra.mxu0 %v7314_v26  ;;  %v5848_v23 = vpop.f32.mrf.mxu2  ;;  %7319 = vst [vmem:[#allocation76_spill] sm:$0xff] %v5850_v48  ;;  %v2415_v26 = vld [vmem:[#allocation7 + $0x40] sm:$0xff]  ;;  %v7327_v48 = vld [vmem:[#allocation79_spill] sm:$0xff] }
 0x423   : > { %v5838_v9 = vsel %vm346_vm0, %v2260_v42, %v2261_v16  ;;  %v5842_v24 = vsel %vm443_vm1, %v2340_v30, %v2341_v43  ;;  %7318 = vst [vmem:[#allocation32_spill] sm:$0xff] %v5848_v23  ;;  %2802 = vmatpush.msrb.mxu1 %v2415_v26  ;;  %v7320_v42 = vld [vmem:[#allocation74_spill] sm:$0xff]  ;;  %v5859_v46 = vsel %vm346_vm0, %v2261_v16, %v5509_v27  ;;  %v7324_v26 = vld [vmem:[#allocation95_spill] sm:$0xff] }
 0x424   : > { %7315 = vst [vmem:[#allocation120_spill] sm:$0xff] %v5842_v24  ;;  %2545 = vmatmul.f32.gmra.mxu1 %v5838_v9  ;;  %2736 = vmatmul.f32.gmra.mxu3 %v5842_v24  ;;  %v932_v14 = vadd.f32 %v7320_v42, %v795_v50  ;;  %v7321_v30 = vld [vmem:[#allocation26_spill] sm:$0xff]  ;;  %v5864_v24 = vsel %vm443_vm1, %v2341_v43, %v5638_v47  ;;  %v7325_v50 = vld [vmem:[#allocation96_spill] sm:$0xff]  ;;  %v7326_v42 = vld [vmem:[#allocation135_spill] sm:$0xff]  ;;  %v1963_v43 = vadd.s32 4, %v5547_v59 }
 0x425   : > { %7323 = vst [vmem:[#allocation78_spill] sm:$0xff] %v5864_v24  ;;  %v1666_v16 = vadd.f32 %v5471_v53, %v5469_v61  ;;  %v3098_v61 = vld [vmem:[#allocation7 + $0x358] sm:$0xff] }
 0x426   : > { %v1069_v36 = vadd.f32 %v7321_v30, %v932_v14  ;;  %v3101_v14 = vld [vmem:[#allocation7 + $0x370] sm:$0xff]  ;;  %vm1973_vm14 = vcmp.ge.s32.totalorder %v1963_v43, 0  ;;  %vm1983_vm15 = vcmp.lt.s32.totalorder %v1963_v43, 16  ;;  %v7331_v53 = vld [vmem:[#allocation136_spill] sm:$0xff] }
 0x427   : > { %v1799_v22 = vpop.f32.mrf.mxu0  ;;  %3136 = vmatpush.msra.mxu0 %v3101_v14  ;;  %v7330_v14 = vld [vmem:[#allocation84_spill] sm:$0xff]  ;;  %vm5883_vm2 = vmand %vm1973_vm14, %vm1983_vm15 }
 0x428   : > { %2645 = vmatmul.f32.gmra.mxu2 %v7240_v4  ;;  %v798_v22 = vadd.f32 %v7325_v50, %v7324_v26  ;;  %v1206_v45 = vadd.f32 %v7326_v42, %v1069_v36  ;;  %v7328_v26 = vld [vmem:[#allocation51_spill] sm:$0xff]  ;;  %v3099_v42 = vld [vmem:[#allocation7 + $0x360] sm:$0xff]  ;;  %v2430_v43 = vld [vmem:[#allocation7 + $0xb8] sm:$0xff] }
 0x429   : > { %v1731_v30 = vpop.f32.mrf.mxu3  ;;  %3137 = vmatpush.msra.mxu0 %v3100_v58  ;;  %2900 = vmatpush.msrb.mxu2 %v2430_v43 }
 0x42a   : > { %1846 = vmatmul.f32.gmra.mxu0 %v7322_v12  ;;  %v1594_v12 = vpop.f32.mrf.mxu2  ;;  %v935_v23 = vadd.f32 %v7327_v48, %v798_v22  ;;  %v1343_v50 = vadd.f32 %v7328_v26, %v1206_v45  ;;  %v1669_v22 = vadd.f32 %v5477_v56, %v5475_v1  ;;  %v7334_v26 = vld [vmem:[#allocation133_spill] sm:$0xff]  ;;  %v3096_v1 = vld [vmem:[#allocation7 + $0x348] sm:$0xff] }
 0x42b   : > { %v7329_v12 = vld [vmem:[#allocation111_spill] sm:$0xff]  ;;  %3138 = vmatpush.msra.mxu0 %v3099_v42 }
 0x42c   : > { %2548 = vmatmul.f32.gmra.mxu1 %v5859_v46  ;;  %2739 = vmatmul.f32.gmra.mxu3 %v5864_v24  ;;  %v1072_v24 = vadd.f32 %v7329_v12, %v935_v23  ;;  %v3097_v23 = vld [vmem:[#allocation7 + $0x350] sm:$0xff] }
 0x42d   : > { %3139 = vmatpush.msra.mxu0 %v3098_v61  ;;  %v3095_v61 = vld [vmem:[#allocation7 + $0x340] sm:$0xff] }
 0x42e   : > { %v1209_v29 = vadd.f32 %v7331_v53, %v1072_v24  ;;  %v2414_v24 = vld [vmem:[#allocation7 + $0x38] sm:$0xff] }
 0x42f   : > { %v1802_v55 = vpop.f32.mrf.mxu0  ;;  %2803 = vmatpush.msrb.mxu1 %v2414_v24  ;;  %3140 = vmatpush.msra.mxu0 %v3097_v23 }
 0x430   : > { %v1803_v36 = vadd.f32 %v1802_v55, %v1666_v16  ;;  %2647 = vmatmul.f32.gmra.mxu2 %v7240_v4 }
 0x431   : > { %3141 = vmatpush.msra.mxu0 %v3096_v1  ;;  %v3091_v1 = vld [vmem:[#allocation7 + $0x320] sm:$0xff] }
 0x432   : > { %v1888_v30 = vadd.f32 %v1803_v36, %v1343_v50  ;;  %1849 = vmatmul.f32.gmra.mxu0 %v7330_v14  ;;  %v2618_v45 = vpop.f32.mrf.mxu2  ;;  %v1346_v50 = vadd.f32 %v7334_v26, %v1209_v29  ;;  %v7335_v14 = vld [vmem:[#allocation88_spill] sm:$0xff]  ;;  %v2429_v26 = vld [vmem:[#allocation7 + $0xb0] sm:$0xff] }
 0x433   : > { %v3094_v45 = vld [vmem:[#allocation7 + $0x338] sm:$0xff]  ;;  %3142 = vmatpush.msra.mxu0 %v3095_v61  ;;  %2901 = vmatpush.msrb.mxu2 %v2429_v26  ;;  %v440_v61 = vrot.slane %v5490_v2, 1  ;;  %v7342_v2 = vld [vmem:[#allocation87_spill] sm:$0xff] }
 0x434   : > { %v1932_v48 = vadd.f32 %v5541_v20, %v1888_v30  ;;  %2550 = vmatmul.f32.gmra.mxu1 %v5509_v27  ;;  %2742 = vmatmul.f32.gmra.mxu3 %v5638_v47 }
 0x435   : > { %3143 = vmatpush.msra.mxu0 %v3094_v45  ;;  %v7340_v45 = vld [vmem:[#allocation101_spill] sm:$0xff] }
 0x436   : > { %v5889_v16 = vmax.f32 %v1932_v48, 0.0 }
 0x437   : > { %v1805_v58 = vpop.f32.mrf.mxu0 }
 0x438   : > { %v1806_v36 = vadd.f32 %v1805_v58, %v1669_v22  ;;  %3627 = vmatmul.msk.f32.gmra.mxu2 %vm5883_vm2, %v5889_v16  ;;  %v2224_v42 = vsel %vm5883_vm2, %v5889_v16, 0.0  ;;  %v3093_v22 = vld [vmem:[#allocation7 + $0x330] sm:$0xff]  ;;  %v3092_v58 = vld [vmem:[#allocation7 + $0x328] sm:$0xff] }
 0x439   : > { %v2264_v56 = vrot.slane %v2224_v42, 7  ;;  %v2344_v12 = vrot.slane %v2224_v42, 1  ;;  %3144 = vmatpush.msra.mxu0 %v3093_v22  ;;  %v7337_v42 = vld [vmem:[#allocation29_spill] sm:$0xff]  ;;  %v3090_v22 = vld [vmem:[#allocation7 + $0x318] sm:$0xff] }
 0x43a   : > { %v1889_v30 = vadd.f32 %v1806_v36, %v1346_v50  ;;  %1852 = vmatmul.f32.gmra.mxu0 %v7335_v14 }
 0x43b   : > { %v5902_v29 = vsel %vm346_vm0, %v5509_v27, %v2264_v56  ;;  %v5907_v53 = vsel %vm443_vm1, %v5638_v47, %v2344_v12  ;;  %3145 = vmatpush.msra.mxu0 %v3092_v58 }
 0x43c   : > { %v1933_v48 = vadd.f32 %v5541_v20, %v1889_v30  ;;  %2552 = vmatmul.f32.gmra.mxu1 %v5902_v29  ;;  %2744 = vmatmul.f32.gmra.mxu3 %v5907_v53 }
 0x43d   : > { %3146 = vmatpush.msra.mxu0 %v3091_v1 }
 0x43e   : > { %v5912_v23 = vmax.f32 %v1933_v48, 0.0  ;;  %v7339_v48 = vld [vmem:[#allocation100_spill] sm:$0xff] }
 0x43f   : > { %v1808_v43 = vpop.f32.mrf.mxu0  ;;  %3147 = vmatpush.msra.mxu0 %v3090_v22  ;;  %v7345_v22 = vld [vmem:[#allocation103_spill] sm:$0xff] }
 0x440   : > { %7336 = vst [vmem:[#allocation42_spill] sm:$0xff] %v5912_v23  ;;  %3628 = vmatmul.msk.f32.gmra.mxu2 %vm5883_vm2, %v5912_v23  ;;  %v2225_v24 = vsel %vm5883_vm2, %v5912_v23, 0.0  ;;  %v807_v43 = vadd.f32 %v7340_v45, %v7339_v48  ;;  %v3088_v48 = vld [vmem:[#allocation7 + $0x308] sm:$0xff]  ;;  %v3087_v23 = vld [vmem:[#allocation7 + $0x300] sm:$0xff] }
 0x441   : > { %v2265_v50 = vrot.slane %v2225_v24, 7  ;;  %v2345_v36 = vrot.slane %v2225_v24, 1  ;;  %v2413_v24 = vld [vmem:[#allocation7 + $0x30] sm:$0xff]  ;;  %v7343_v45 = vld [vmem:[#allocation114_spill] sm:$0xff] }
 0x442   : > { %1855 = vmatmul.f32.gmra.mxu0 %v7337_v42  ;;  %2804 = vmatpush.msrb.mxu1 %v2413_v24  ;;  %v7341_v42 = vrot.slane %v5188_v10, 1  ;;  %v944_v58 = vadd.f32 %v7342_v2, %v807_v43  ;;  %v441_v43 = vrot.slane %v5503_v28, 1  ;;  %v7346_v24 = vld [vmem:[#allocation104_spill] sm:$0xff]  ;;  %v7348_v2 = vld [vmem:[#allocation89_spill] sm:$0xff] }
 0x443   : > { %v5923_v30 = vsel %vm346_vm0, %v2264_v56, %v2265_v50  ;;  %v5927_v14 = vsel %vm443_vm1, %v2344_v12, %v2345_v36  ;;  %v3089_v56 = vld [vmem:[#allocation7 + $0x310] sm:$0xff]  ;;  %v5944_v1 = vsel %vm346_vm0, %v2265_v50, %v5509_v27  ;;  %v5949_v10 = vsel %vm443_vm1, %v2345_v36, %v5638_v47 }
 0x444   : > { %7338 = vst [vmem:[#allocation122_spill] sm:$0xff] %v5927_v14  ;;  %2555 = vmatmul.f32.gmra.mxu1 %v5923_v30  ;;  %2746 = vmatmul.f32.gmra.mxu3 %v5927_v14  ;;  %v446_v12 = vsel %vm443_vm1, %v7341_v42, %v440_v61  ;;  %v1081_v14 = vadd.f32 %v7343_v45, %v944_v58 }
 0x445   : > { %3148 = vmatpush.msra.mxu0 %v3089_v56  ;;  %7344 = vst [vmem:[#allocation37_spill] sm:$0xff] %v5949_v10  ;;  %v810_v56 = vadd.f32 %v7346_v24, %v7345_v22  ;;  %v1678_v50 = vadd.f32 %v5501_v21, %v5499_v60  ;;  %v445_v28 = vsel %vm443_vm1, %v440_v61, %v441_v43  ;;  %v442_v60 = vrot.slane %v5525_v35, 1  ;;  %v7351_v21 = vld [vmem:[#allocation68_spill] sm:$0xff] }
 0x447   : > { %v1811_v26 = vpop.f32.mrf.mxu0  ;;  %3149 = vmatpush.msra.mxu0 %v3088_v48  ;;  %v947_v58 = vadd.f32 %v7348_v2, %v810_v56  ;;  %v7349_v48 = vld [vmem:[#allocation57_spill] sm:$0xff]  ;;  %v1681_v56 = vadd.f32 %v5518_v18, %v5516_v54 }
 0x448   : > { %2655 = vmatmul.f32.gmra.mxu2 %v7240_v4  ;;  %v7347_v26 = vld [vmem:[#allocation63_spill] sm:$0xff] }
 0x449   : > { %v1218_v42 = vadd.f32 %v7347_v26, %v1081_v14  ;;  %3150 = vmatpush.msra.mxu0 %v3087_v23  ;;  %v7350_v14 = vld [vmem:[#allocation115_spill] sm:$0xff] }
 0x44a   : > { %1858 = vmatmul.f32.gmra.mxu0 %v446_v12  ;;  %v1964_v12 = vadd.s32 5, %v5547_v59  ;;  %v1084_v24 = vadd.f32 %v7350_v14, %v947_v58 }
 0x44b   : > { %v1355_v45 = vadd.f32 %v7349_v48, %v1218_v42 }
 0x44c   : > { %2558 = vmatmul.f32.gmra.mxu1 %v5944_v1  ;;  %2749 = vmatmul.f32.gmra.mxu3 %v5949_v10  ;;  %vm1974_vm3 = vcmp.ge.s32.totalorder %v1964_v12, 0  ;;  %vm1984_vm5 = vcmp.lt.s32.totalorder %v1964_v12, 16  ;;  %v1221_v23 = vadd.f32 %v7351_v21, %v1084_v24  ;;  %v2412_v12 = vld [vmem:[#allocation7 + $0x28] sm:$0xff] }
 0x44d   : > { %vm5971_vm6 = vmand %vm1974_vm3, %vm1984_vm5  ;;  %2805 = vmatpush.msrb.mxu1 %v2412_v12 }
 0x44f   : > { %v1814_v36 = vpop.f32.mrf.mxu0 }
 0x450   : > { %v1815_v22 = vadd.f32 %v1814_v36, %v1678_v50  ;;  %2657 = vmatmul.f32.gmra.mxu2 %v7240_v4  ;;  %v2428_v50 = vld [vmem:[#allocation7 + $0xa8] sm:$0xff]  ;;  %v444_v36 = vsel %vm443_vm1, %v441_v43, %v442_v60 }
 0x451   : > { %2902 = vmatpush.msrb.mxu2 %v2428_v50  ;;  %v7357_v50 = vld [vmem:[#allocation48_spill] sm:$0xff] }
 0x452   : > { %v1892_v26 = vadd.f32 %v1815_v22, %v1355_v45  ;;  %1861 = vmatmul.f32.gmra.mxu0 %v445_v28  ;;  %v7354_v28 = vld [vmem:[#allocation60_spill] sm:$0xff]  ;;  %v7358_v12 = vrot.slane %v7357_v50, 1  ;;  %v2411_v50 = vld [vmem:[#allocation7 + $0x20] sm:$0xff] }
 0x453   : > { %v1358_v2 = vadd.f32 %v7354_v28, %v1221_v23  ;;  %v2427_v28 = vld [vmem:[#allocation7 + $0xa0] sm:$0xff]  ;;  %2806 = vmatpush.msrb.mxu1 %v2411_v50 }
 0x454   : > { %v1936_v10 = vadd.f32 %v5541_v20, %v1892_v26  ;;  %2560 = vmatmul.f32.gmra.mxu1 %v5509_v27  ;;  %2752 = vmatmul.f32.gmra.mxu3 %v5638_v47 }
 0x455   : > { %2903 = vmatpush.msrb.mxu2 %v2427_v28 }
 0x456   : > { %v5977_v42 = vmax.f32 %v1936_v10, 0.0 }
 0x457   : > { %v1817_v35 = vpop.f32.mrf.mxu0 }
 0x458   : > { %v1818_v58 = vadd.f32 %v1817_v35, %v1681_v56  ;;  %3629 = vmatmul.msk.f32.gmra.mxu2 %vm5971_vm6, %v5977_v42  ;;  %v2228_v54 = vsel %vm5971_vm6, %v5977_v42, 0.0  ;;  %v491_v35 = vsel %vm443_vm1, %v442_v60, %v7358_v12 }
 0x459   : > { %v2523_v18 = vpop.f32.mrf.mxu1  ;;  %v2268_v10 = vrot.slane %v2228_v54, 7  ;;  %v2348_v48 = vrot.slane %v2228_v54, 1 }
 0x45a   : > { %v1893_v45 = vadd.f32 %v1818_v58, %v1358_v2  ;;  %1864 = vmatmul.f32.gmra.mxu0 %v444_v36 }
 0x45b   : > { %v2620_v22 = vpop.f32.mrf.mxu2  ;;  %v5991_v43 = vsel %vm346_vm0, %v5509_v27, %v2268_v10  ;;  %v5996_v14 = vsel %vm443_vm1, %v5638_v47, %v2348_v48 }
 0x45c   : > { %7355 = vst [vmem:[#allocation34_spill] sm:$0xff] %v5996_v14  ;;  %v1937_v24 = vadd.f32 %v5541_v20, %v1893_v45  ;;  %v2621_v26 = vadd.f32 %v2620_v22, %v2523_v18  ;;  %2562 = vmatmul.f32.gmra.mxu1 %v5991_v43  ;;  %2754 = vmatmul.f32.gmra.mxu3 %v5996_v14  ;;  %v7360_v22 = vld [vmem:[#allocation108_spill] sm:$0xff] }
 0x45e   : > { %v6001_v21 = vmax.f32 %v1937_v24, 0.0  ;;  %v7361_v24 = vld [vmem:[#allocation121_spill] sm:$0xff] }
 0x45f   : > { %v1820_v23 = vpop.f32.mrf.mxu0  ;;  %v2715_v56 = vpop.f32.mrf.mxu3 }
 0x460   : > { %7356 = vst [vmem:[#allocation44_spill] sm:$0xff] %v6001_v21  ;;  %3630 = vmatmul.msk.f32.gmra.mxu2 %vm5971_vm6, %v6001_v21  ;;  %v2229_v36 = vsel %vm5971_vm6, %v6001_v21, 0.0  ;;  %v819_v23 = vadd.f32 %v7361_v24, %v7360_v22  ;;  %v7363_v21 = vld [vmem:[#allocation118_spill] sm:$0xff] }
 0x461   : > { %v2526_v2 = vpop.f32.mrf.mxu1  ;;  %v2269_v58 = vrot.slane %v2229_v36, 7  ;;  %v2349_v54 = vrot.slane %v2229_v36, 1  ;;  %v7362_v36 = vld [vmem:[#allocation94_spill] sm:$0xff] }
 0x462   : > { %1867 = vmatmul.f32.gmra.mxu0 %v491_v35  ;;  %v956_v28 = vadd.f32 %v7362_v36, %v819_v23  ;;  %v7365_v24 = vld [vmem:[#allocation58_spill] sm:$0xff]  ;;  %v7366_v36 = vld [vmem:[#allocation97_spill] sm:$0xff] }
 0x463   : > { %v2623_v18 = vpop.f32.mrf.mxu2  ;;  %v6015_v45 = vsel %vm346_vm0, %v2268_v10, %v2269_v58  ;;  %v6019_v60 = vsel %vm443_vm1, %v2348_v48, %v2349_v54  ;;  %v6039_v22 = vsel %vm443_vm1, %v2349_v54, %v5638_v47  ;;  %v7367_v54 = vld [vmem:[#allocation65_spill] sm:$0xff] }
 0x464   : > { %7359 = vst [vmem:[#allocation130_spill] sm:$0xff] %v6019_v60  ;;  %v2624_v56 = vadd.f32 %v2623_v18, %v2526_v2  ;;  %2565 = vmatmul.f32.gmra.mxu1 %v6015_v45  ;;  %2756 = vmatmul.f32.gmra.mxu3 %v6019_v60  ;;  %v1093_v14 = vadd.f32 %v7363_v21, %v956_v28 }
 0x465   : > { %v6034_v18 = vsel %vm346_vm0, %v2269_v58, %v5509_v27  ;;  %v1690_v21 = vadd.f32 %v5567_v7, %v5565_v34  ;;  %v1965_v58 = vadd.s32 6, %v5547_v59 }
 0x466   : > { %v1230_v50 = vadd.f32 %v5409_v15, %v1093_v14  ;;  %v7368_v14 = vld [vmem:[#allocation119_spill] sm:$0xff] }
 0x467   : > { %v1823_v12 = vpop.f32.mrf.mxu0  ;;  %v2717_v35 = vpop.f32.mrf.mxu3  ;;  %vm1975_vm8 = vcmp.ge.s32.totalorder %v1965_v58, 0  ;;  %vm1985_vm9 = vcmp.lt.s32.totalorder %v1965_v58, 16  ;;  %v2410_v58 = vld [vmem:[#allocation7 + $0x18] sm:$0xff] }
 0x468   : > { %v6026_v10 = vadd.f32 %v2717_v35, %v2621_v26  ;;  %2665 = vmatmul.f32.gmra.mxu2 %v7240_v4  ;;  %v7364_v26 = vld [vmem:[#allocation109_spill] sm:$0xff]  ;;  %vm6060_vm11 = vmand %vm1975_vm8, %vm1985_vm9  ;;  %2807 = vmatpush.msrb.mxu1 %v2410_v58 }
 0x469   : > { %v2529_v48 = vpop.f32.mrf.mxu1  ;;  %v822_v23 = vadd.f32 %v7365_v24, %v7364_v26 }
 0x46a   : > { %3151 = vmatmul.f32.vlgmr.msra.gmra.mxu0 %v5509_v27  ;;  %v1367_v48 = vadd.f32 %v7367_v54, %v1230_v50  ;;  %v1693_v50 = vadd.f32 %v5607_v0, %v5605_v32 }
 0x46b   : > { %v2626_v2 = vpop.f32.mrf.mxu2  ;;  %v959_v28 = vadd.f32 %v7366_v36, %v822_v23 }
 0x46c   : > { %2568 = vmatmul.f32.gmra.mxu1 %v6034_v18  ;;  %2759 = vmatmul.f32.gmra.mxu3 %v6039_v22 }
 0x46d   : > { %v1096_v26 = vadd.f32 %v7368_v14, %v959_v28 }
 0x46f   : > { %v1826_v12 = vpop.f32.mrf.mxu0  ;;  %v2720_v35 = vpop.f32.mrf.mxu3  ;;  %v1233_v7 = vadd.f32 %v5416_v44, %v1096_v26  ;;  %v7372_v44 = vld [vmem:[#allocation72_spill] sm:$0xff] }
 0x470   : > { %v1827_v2 = vadd.f32 %v1826_v12, %v1690_v21  ;;  %v6051_v60 = vadd.f32 %v2720_v35, %v2624_v56  ;;  %2667 = vmatmul.f32.gmra.mxu2 %v7240_v4  ;;  %v7369_v56 = vmov 0  ;;  %v2426_v12 = vld [vmem:[#allocation7 + $0x98] sm:$0xff] }
 0x471   : > { %v2531_v15 = vpop.f32.mrf.mxu1  ;;  %v7370_v56 = vsel %vm6060_vm11, 4294967295, %v7369_v56  ;;  %2904 = vmatpush.msrb.mxu2 %v2426_v12  ;;  %v1370_v28 = vadd.f32 %v7372_v44, %v1233_v7 }
 0x472   : > { %v1896_v24 = vadd.f32 %v1827_v2, %v1367_v48  ;;  %3153 = vmatmul.f32.gmra.mxu0 %v5731_v37  ;;  %7371 = vst [vmem:[#allocation85_spill] sm:$0xff] %v7370_v56 }
 0x473   : > { %v2628_v34 = vpop.f32.mrf.mxu2 }
 0x474   : > { %v1940_v23 = vadd.f32 %v5541_v20, %v1896_v24  ;;  %2570 = vmatmul.f32.gmra.mxu1 %v5509_v27  ;;  %2762 = vmatmul.f32.gmra.mxu3 %v5638_v47 }
 0x476   : > { %v6066_v21 = vmax.f32 %v1940_v23, 0.0 }
 0x477   : > { %v1829_v35 = vpop.f32.mrf.mxu0  ;;  %v2723_v36 = vpop.f32.mrf.mxu3 }
 0x478   : > { %v1830_v54 = vadd.f32 %v1829_v35, %v1693_v50  ;;  %3631 = vmatmul.msk.f32.gmra.mxu2 %vm6060_vm11, %v6066_v21  ;;  %v2232_v48 = vsel %vm6060_vm11, %v6066_v21, 0.0  ;;  %v2425_v35 = vld [vmem:[#allocation7 + $0x90] sm:$0xff] }
 0x479   : > { %v2533_v32 = vpop.f32.mrf.mxu1  ;;  %v2272_v0 = vrot.slane %v2232_v48, 7  ;;  %v2352_v2 = vrot.slane %v2232_v48, 1  ;;  %2905 = vmatpush.msrb.mxu2 %v2425_v35  ;;  %v7377_v35 = vld [vmem:[#allocation102_spill] sm:$0xff] }
 0x47a   : > { %v1897_v15 = vadd.f32 %v1830_v54, %v1370_v28  ;;  %3156 = vmatmul.f32.gmra.mxu0 %v5756_v17 }
 0x47b   : > { %v2630_v14 = vpop.f32.mrf.mxu2  ;;  %v6079_v26 = vsel %vm346_vm0, %v5509_v27, %v2272_v0  ;;  %v6084_v24 = vsel %vm443_vm1, %v5638_v47, %v2352_v2 }
 0x47c   : > { %7373 = vst [vmem:[#allocation86_spill] sm:$0xff] %v6084_v24  ;;  %v1941_v34 = vadd.f32 %v5541_v20, %v1897_v15  ;;  %v2631_v7 = vadd.f32 %v2630_v14, %v2533_v32  ;;  %2572 = vmatmul.f32.gmra.mxu1 %v6079_v26  ;;  %2764 = vmatmul.f32.gmra.mxu3 %v6084_v24  ;;  %v7375_v32 = vld [vmem:[#allocation110_spill] sm:$0xff]  ;;  %v7378_v24 = vld [vmem:[#allocation124_spill] sm:$0xff] }
 0x47d   : > { %v7376_v15 = vld [vmem:[#allocation66_spill] sm:$0xff] }
 0x47e   : > { %v6089_v23 = vmax.f32 %v1941_v34, 0.0  ;;  %v831_v14 = vadd.f32 %v7376_v15, %v7375_v32  ;;  %v7380_v15 = vld [vmem:[#allocation69_spill] sm:$0xff] }
 0x47f   : > { %v1832_v50 = vpop.f32.mrf.mxu0  ;;  %v2725_v12 = vpop.f32.mrf.mxu3 }
 0x480   : > { %7374 = vst [vmem:[#allocation27_spill] sm:$0xff] %v6089_v23  ;;  %3632 = vmatmul.msk.f32.gmra.mxu2 %vm6060_vm11, %v6089_v23  ;;  %v2233_v58 = vsel %vm6060_vm11, %v6089_v23, 0.0  ;;  %v2409_v50 = vld [vmem:[#allocation7 + $0x10] sm:$0xff]  ;;  %v968_v23 = vadd.f32 %v7377_v35, %v831_v14 }
 0x481   : > { %v2536_v36 = vpop.f32.mrf.mxu1  ;;  %v2273_v20 = vrot.slane %v2233_v58, 7  ;;  %v2353_v44 = vrot.slane %v2233_v58, 1  ;;  %2808 = vmatpush.msrb.mxu1 %v2409_v50 }
 0x482   : > { %3159 = vmatmul.f32.gmra.mxu0 %v5777_v63  ;;  %v1105_v56 = vadd.f32 %v7378_v24, %v968_v23  ;;  %v1702_v24 = vadd.f32 %v5656_v31, %v5654_v6  ;;  %v1966_v23 = vadd.s32 7, %v5547_v59 }
 0x483   : > { %v2633_v28 = vpop.f32.mrf.mxu2  ;;  %v6100_v54 = vsel %vm346_vm0, %v2272_v0, %v2273_v20  ;;  %v6104_v48 = vsel %vm443_vm1, %v2352_v2, %v2353_v44  ;;  %v6124_v32 = vsel %vm443_vm1, %v2353_v44, %v5638_v47 }
 0x484   : > { %v2634_v34 = vadd.f32 %v2633_v28, %v2536_v36  ;;  %2575 = vmatmul.f32.gmra.mxu1 %v6100_v54  ;;  %2766 = vmatmul.f32.gmra.mxu3 %v6104_v48  ;;  %v6119_v28 = vsel %vm346_vm0, %v2273_v20, %v5509_v27  ;;  %v1242_v50 = vadd.f32 %v5433_v57, %v1105_v56  ;;  %v7382_v56 = vld [vmem:[#allocation126_spill] sm:$0xff]  ;;  %vm1976_vm12 = vcmp.ge.s32.totalorder %v1966_v23, 0 }
 0x485   : > { %vm1986_vm14 = vcmp.lt.s32.totalorder %v1966_v23, 16  ;;  %v2408_v23 = vld [vmem:[#allocation7 + $0x8] sm:$0xff] }
 0x486   : > { %v1379_v44 = vadd.f32 %v5414_v8, %v1242_v50  ;;  %v6145_v8 = vld [vmem:[%s6844_s2] ss:$0 sm:$0xff]  ;;  %vm6150_vm15 = vmand %vm1976_vm12, %vm1986_vm14  ;;  %v1705_v50 = vadd.f32 %v5681_v51, %v5679_v40  ;;  %2809 = vmatpush.msrb.mxu1 %v2408_v23  ;;  %v2453_v23 = vld [vmem:[#allocation7 + $0x170] sm:$0xff] }
 0x487   : > { %v1835_v12 = vpop.f32.mrf.mxu0  ;;  %v2727_v58 = vpop.f32.mrf.mxu3 }
 0x488   : > { %v6111_v0 = vadd.f32 %v2727_v58, %v2631_v7  ;;  %2675 = vmatmul.f32.gmra.mxu2 %v7240_v4  ;;  %v7379_v7 = vld [vmem:[#allocation36_spill] sm:$0xff]  ;;  %v7381_v58 = vld [vmem:[#allocation105_spill] sm:$0xff] }
 0x489   : > { %v2539_v2 = vpop.f32.mrf.mxu1  ;;  %v834_v14 = vadd.f32 %v7380_v15, %v7379_v7 }
 0x48a   : > { %3161 = vmatmul.f32.gmra.mxu0 %v5509_v27 }
 0x48b   : > { %v2636_v36 = vpop.f32.mrf.mxu2  ;;  %v971_v35 = vadd.f32 %v7381_v58, %v834_v14  ;;  %v7383_v14 = vmov 0 }
 0x48c   : > { %2578 = vmatmul.f32.gmra.mxu1 %v6119_v28  ;;  %2769 = vmatmul.f32.gmra.mxu3 %v6124_v32  ;;  %v7384_v14 = vsel %vm6150_vm15, 4294967295, %v7383_v14 }
 0x48d   : > { %v1108_v7 = vadd.f32 %v7382_v56, %v971_v35  ;;  %7385 = vst [vmem:[#allocation54_spill] sm:$0xff] %v7384_v14  ;;  %v7392_v14 = vld [vmem:[#allocation28_spill] sm:$0xff] }
 0x48f   : > { %v1838_v20 = vpop.f32.mrf.mxu0  ;;  %v2730_v12 = vpop.f32.mrf.mxu3  ;;  %v1245_v31 = vadd.f32 %v5440_v19, %v1108_v7  ;;  %v2424_v19 = vld [vmem:[#allocation7 + $0x88] sm:$0xff] }
 0x490   : > { %v1839_v2 = vadd.f32 %v1838_v20, %v1702_v24  ;;  %v6136_v36 = vadd.f32 %v2730_v12, %v2634_v34  ;;  %2677 = vmatmul.f32.gmra.mxu2 %v7240_v4 }
 0x491   : > { %v2541_v57 = vpop.f32.mrf.mxu1  ;;  %2906 = vmatpush.msrb.mxu2 %v2424_v19  ;;  %v1382_v58 = vadd.f32 %v5421_v49, %v1245_v31  ;;  %v2454_v31 = vld [vmem:[#allocation7 + $0x178] sm:$0xff] }
 0x492   : > { %v1900_v15 = vadd.f32 %v1839_v2, %v1379_v44  ;;  %3163 = vmatmul.f32.gmra.mxu0 %v5813_v5  ;;  %2989 = vmatpush.msrb.mxu3 %v2454_v31  ;;  %v2451_v31 = vld [vmem:[#allocation7 + $0x160] sm:$0xff] }
 0x493   : > { %v2638_v6 = vpop.f32.mrf.mxu2 }
 0x494   : > { %v1944_v34 = vadd.f32 %v6145_v8, %v1900_v15  ;;  %2580 = vmatmul.f32.gmra.mxu1 %v5509_v27  ;;  %2772 = vmatmul.f32.gmra.mxu3 %v5638_v47 }
 0x495   : > { %2990 = vmatpush.msrb.mxu3 %v2453_v23 }
 0x496   : > { %v6156_v24 = vmax.f32 %v1944_v34, 0.0 }
 0x497   : > { %v1841_v20 = vpop.f32.mrf.mxu0  ;;  %v2733_v12 = vpop.f32.mrf.mxu3 }
 0x498   : > { %7386 = vst [vmem:[#allocation67_spill] sm:$0xff] %v6156_v24  ;;  %v1842_v35 = vadd.f32 %v1841_v20, %v1705_v50  ;;  %3633 = vmatmul.msk.f32.gmra.mxu2 %vm6150_vm15, %v6156_v24  ;;  %v2236_v44 = vsel %vm6150_vm15, %v6156_v24, 0.0  ;;  %v2423_v12 = vld [vmem:[#allocation7 + $0x80] sm:$0xff] }
 0x499   : > { %v2543_v40 = vpop.f32.mrf.mxu1  ;;  %v2276_v51 = vrot.slane %v2236_v44, 7  ;;  %v2356_v2 = vrot.slane %v2236_v44, 1  ;;  %2907 = vmatpush.msrb.mxu2 %v2423_v12  ;;  %v2450_v12 = vld [vmem:[#allocation7 + $0x158] sm:$0xff] }
 0x49a   : > { %v1901_v57 = vadd.f32 %v1842_v35, %v1382_v58  ;;  %3166 = vmatmul.f32.gmra.mxu0 %v5838_v9 }
 0x49b   : > { %v2640_v56 = vpop.f32.mrf.mxu2  ;;  %v6169_v49 = vsel %vm346_vm0, %v5509_v27, %v2276_v51  ;;  %v6174_v7 = vsel %vm443_vm1, %v5638_v47, %v2356_v2 }
 0x49c   : > { %7387 = vst [vmem:[#allocation45_spill] sm:$0xff] %v6174_v7  ;;  %v1945_v15 = vadd.f32 %v6145_v8, %v1901_v57  ;;  %v2641_v6 = vadd.f32 %v2640_v56, %v2543_v40  ;;  %2582 = vmatmul.f32.gmra.mxu1 %v6169_v49  ;;  %2774 = vmatmul.f32.gmra.mxu3 %v6174_v7  ;;  %v2452_v40 = vld [vmem:[#allocation7 + $0x168] sm:$0xff]  ;;  %v2449_v7 = vld [vmem:[#allocation7 + $0x150] sm:$0xff] }
 0x49d   : > { %2991 = vmatpush.msrb.mxu3 %v2452_v40 }
 0x49e   : > { %v6179_v34 = vmax.f32 %v1945_v15, 0.0 }
 0x49f   : > { %v1844_v50 = vpop.f32.mrf.mxu0  ;;  %v2735_v19 = vpop.f32.mrf.mxu3  ;;  %2992 = vmatpush.msrb.mxu3 %v2451_v31 }
 0x4a0   : > { %7388 = vst [vmem:[#allocation43_spill] sm:$0xff] %v6179_v34  ;;  %3634 = vmatmul.msk.f32.gmra.mxu2 %vm6150_vm15, %v6179_v34  ;;  %v2237_v20 = vsel %vm6150_vm15, %v6179_v34, 0.0  ;;  %v7390_v50 = vld [vmem:[#allocation38_spill] sm:$0xff]  ;;  %v7391_v19 = vld [vmem:[#allocation81_spill] sm:$0xff] }
 0x4a1   : > { %v2546_v58 = vpop.f32.mrf.mxu1  ;;  %v2277_v35 = vrot.slane %v2237_v20, 7  ;;  %v2357_v44 = vrot.slane %v2237_v20, 1  ;;  %v843_v23 = vadd.f32 %v7391_v19, %v7390_v50  ;;  %v2407_v20 = vld [vmem:[#allocation7] sm:$0xff]  ;;  %2993 = vmatpush.msrb.mxu3 %v2450_v12 }
 0x4a2   : > { %3169 = vmatmul.f32.gmra.mxu0 %v5859_v46  ;;  %2810 = vmatpush.msrb.mxu1 %v2407_v20 }
 0x4a3   : > { %v2643_v57 = vpop.f32.mrf.mxu2  ;;  %v6190_v56 = vsel %vm346_vm0, %v2276_v51, %v2277_v35  ;;  %v6194_v15 = vsel %vm443_vm1, %v2356_v2, %v2357_v44  ;;  %v980_v2 = vadd.f32 %v7392_v14, %v843_v23  ;;  %2994 = vmatpush.msrb.mxu3 %v2449_v7  ;;  %v6209_v31 = vsel %vm346_vm0, %v2277_v35, %v5509_v27  ;;  %v7394_v23 = vld [vmem:[#allocation40_spill] sm:$0xff]  ;;  %v7395_v7 = vld [vmem:[#allocation83_spill] sm:$0xff] }
 0x4a4   : > { %7389 = vst [vmem:[#allocation70_spill] sm:$0xff] %v6194_v15  ;;  %v2644_v34 = vadd.f32 %v2643_v57, %v2546_v58  ;;  %2585 = vmatmul.f32.gmra.mxu1 %v6190_v56  ;;  %2776 = vmatmul.f32.gmra.mxu3 %v6194_v15  ;;  %v2448_v58 = vld [vmem:[#allocation7 + $0x148] sm:$0xff]  ;;  %v7393_v57 = vld [vmem:[#allocation127_spill] sm:$0xff]  ;;  %v6214_v14 = vsel %vm443_vm1, %v2357_v44, %v5638_v47 }
 0x4a5   : > { %v1117_v19 = vadd.f32 %v7393_v57, %v980_v2  ;;  %2995 = vmatpush.msrb.mxu3 %v2448_v58  ;;  %v846_v20 = vadd.f32 %v7395_v7, %v7394_v23  ;;  %v1714_v35 = vadd.f32 %v5743_v62, %v5741_v38  ;;  %v2445_v2 = vld [vmem:[#allocation7 + $0x130] sm:$0xff]  ;;  %v7397_v7 = vld [vmem:[#allocation129_spill] sm:$0xff] }
 0x4a7   : > { %v1847_v40 = vpop.f32.mrf.mxu0  ;;  %v2737_v51 = vpop.f32.mrf.mxu3  ;;  %v1254_v12 = vadd.f32 %v5457_v11, %v1117_v19 }
 0x4a8   : > { %v6201_v24 = vadd.f32 %v2737_v51, %v2641_v6  ;;  %2685 = vmatmul.f32.gmra.mxu2 %v7240_v4  ;;  %v2447_v6 = vld [vmem:[#allocation7 + $0x140] sm:$0xff]  ;;  %v1967_v40 = vadd.s32 8, %v5547_v59 }
 0x4a9   : > { %v2549_v50 = vpop.f32.mrf.mxu1  ;;  %2996 = vmatpush.msrb.mxu3 %v2447_v6  ;;  %v1391_v57 = vadd.f32 %v5438_v33, %v1254_v12  ;;  %v2444_v6 = vld [vmem:[#allocation7 + $0x128] sm:$0xff]  ;;  %v7398_v12 = vmov 0 }
 0x4aa   : > { %3171 = vmatmul.f32.gmra.mxu0 %v5509_v27  ;;  %v7396_v50 = vld [vmem:[#allocation30_spill] sm:$0xff]  ;;  %vm1977_vm3 = vcmp.ge.s32.totalorder %v1967_v40, 0  ;;  %vm1987_vm5 = vcmp.lt.s32.totalorder %v1967_v40, 16  ;;  %v1717_v40 = vadd.f32 %v5768_v25, %v5766_v13 }
 0x4ab   : > { %v2646_v15 = vpop.f32.mrf.mxu2  ;;  %v983_v58 = vadd.f32 %v7396_v50, %v846_v20  ;;  %v2443_v20 = vld [vmem:[#allocation7 + $0x120] sm:$0xff]  ;;  %vm6235_vm8 = vmand %vm1977_vm3, %vm1987_vm5 }
 0x4ac   : > { %2588 = vmatmul.f32.gmra.mxu1 %v6209_v31  ;;  %2779 = vmatmul.f32.gmra.mxu3 %v6214_v14  ;;  %v2446_v15 = vld [vmem:[#allocation7 + $0x138] sm:$0xff]  ;;  %v7399_v12 = vsel %vm6235_vm8, 4294967295, %v7398_v12 }
 0x4ad   : > { %2997 = vmatpush.msrb.mxu3 %v2446_v15  ;;  %v1120_v38 = vadd.f32 %v7397_v7, %v983_v58  ;;  %7400 = vst [vmem:[#allocation132_spill] sm:$0xff] %v7399_v12  ;;  %v2441_v58 = vld [vmem:[#allocation7 + $0x110] sm:$0xff] }
 0x4af   : > { %v1850_v44 = vpop.f32.mrf.mxu0  ;;  %v2740_v51 = vpop.f32.mrf.mxu3  ;;  %2998 = vmatpush.msrb.mxu3 %v2445_v2  ;;  %v1257_v33 = vadd.f32 %v5463_v41, %v1120_v38  ;;  %v3118_v2 = vld [vmem:[#allocation7 + $0x3f8] sm:$0xff]  ;;  %v2440_v38 = vld [vmem:[#allocation7 + $0x108] sm:$0xff] }
 0x4b0   : > { %v1851_v11 = vadd.f32 %v1850_v44, %v1714_v35  ;;  %v6226_v19 = vadd.f32 %v2740_v51, %v2644_v34  ;;  %2687 = vmatmul.f32.gmra.mxu2 %v7240_v4  ;;  %v2442_v35 = vld [vmem:[#allocation7 + $0x118] sm:$0xff]  ;;  %3232 = vmatpush.msra.mxu1 %v3118_v2 }
 0x4b1   : > { %v2551_v23 = vpop.f32.mrf.mxu1  ;;  %2999 = vmatpush.msrb.mxu3 %v2444_v6  ;;  %v3134_v51 = vld [vmem:[#allocation7 + $0x478] sm:$0xff] }
 0x4b2   : > { %v1904_v62 = vadd.f32 %v1851_v11, %v1391_v57  ;;  %3173 = vmatmul.f32.gmra.mxu0 %v5902_v29  ;;  %3329 = vmatpush.msra.mxu2 %v3134_v51  ;;  %v1394_v57 = vadd.f32 %v5445_v52, %v1257_v33 }
 0x4b3   : > { %v2648_v15 = vpop.f32.mrf.mxu2  ;;  %3000 = vmatpush.msrb.mxu3 %v2443_v20 }
 0x4b4   : > { %v1948_v34 = vadd.f32 %v6145_v8, %v1904_v62  ;;  %2590 = vmatmul.f32.gmra.mxu1 %v5509_v27  ;;  %2782 = vmatmul.f32.gmra.mxu3 %v5638_v47 }
 0x4b5   : > { %3001 = vmatpush.msrb.mxu3 %v2442_v35 }
 0x4b6   : > { %v6241_v44 = vmax.f32 %v1948_v34, 0.0  ;;  %v2439_v34 = vld [vmem:[#allocation7 + $0x100] sm:$0xff] }
 0x4b7   : > { %v1853_v41 = vpop.f32.mrf.mxu0  ;;  %v2743_v50 = vpop.f32.mrf.mxu3  ;;  %3002 = vmatpush.msrb.mxu3 %v2441_v58 }
 0x4b8   : > { %7401 = vst [vmem:[#allocation75_spill] sm:$0xff] %v6241_v44  ;;  %v1854_v11 = vadd.f32 %v1853_v41, %v1717_v40  ;;  %3635 = vmatmul.msk.f32.gmra.mxu2 %vm6235_vm8, %v6241_v44  ;;  %v2240_v13 = vsel %vm6235_vm8, %v6241_v44, 0.0  ;;  %v3133_v41 = vld [vmem:[#allocation7 + $0x470] sm:$0xff] }
 0x4b9   : > { %v2553_v25 = vpop.f32.mrf.mxu1  ;;  %v2280_v23 = vrot.slane %v2240_v13, 7  ;;  %v2360_v6 = vrot.slane %v2240_v13, 1  ;;  %3003 = vmatpush.msrb.mxu3 %v2440_v38  ;;  %3330 = vmatpush.msra.mxu2 %v3133_v41  ;;  %v7406_v38 = vld [vmem:[#allocation90_spill] sm:$0xff] }
 0x4ba   : > { %v1905_v7 = vadd.f32 %v1854_v11, %v1394_v57  ;;  %3176 = vmatmul.f32.gmra.mxu0 %v5923_v30 }
 0x4bb   : > { %v2650_v62 = vpop.f32.mrf.mxu2  ;;  %v6254_v52 = vsel %vm346_vm0, %v5509_v27, %v2280_v23  ;;  %v6259_v15 = vsel %vm443_vm1, %v5638_v47, %v2360_v6  ;;  %3004 = vmatpush.msrb.mxu3 %v2439_v34  ;;  %v3117_v34 = vld [vmem:[#allocation7 + $0x3f0] sm:$0xff] }
 0x4bc   : > { %7402 = vst [vmem:[#allocation80_spill] sm:$0xff] %v6259_v15  ;;  %v1949_v20 = vadd.f32 %v6145_v8, %v1905_v7  ;;  %v2651_v33 = vadd.f32 %v2650_v62, %v2553_v25  ;;  %2592 = vmatmul.f32.gmra.mxu1 %v6254_v52  ;;  %2784 = vmatmul.f32.gmra.mxu3 %v6259_v15  ;;  %v7405_v7 = vld [vmem:[#allocation50_spill] sm:$0xff] }
 0x4bd   : > { %v855_v62 = vadd.f32 %v7406_v38, %v7405_v7  ;;  %3233 = vmatpush.msra.mxu1 %v3117_v34  ;;  %v7411_v38 = vld [vmem:[#allocation91_spill] sm:$0xff] }
 0x4be   : > { %v6264_v35 = vmax.f32 %v1949_v20, 0.0  ;;  %v7412_v34 = vld [vmem:[#allocation23_spill] sm:$0xff] }
 0x4bf   : > { %v1856_v40 = vpop.f32.mrf.mxu0  ;;  %v2745_v51 = vpop.f32.mrf.mxu3 }
 0x4c0   : > { %7403 = vst [vmem:[#allocation92_spill] sm:$0xff] %v6264_v35  ;;  %3636 = vmatmul.msk.f32.gmra.mxu2 %vm6235_vm8, %v6264_v35  ;;  %v2241_v2 = vsel %vm6235_vm8, %v6264_v35, 0.0  ;;  %v7408_v35 = vld [vmem:[#allocation39_spill] sm:$0xff] }
 0x4c1   : > { %v2556_v50 = vpop.f32.mrf.mxu1  ;;  %v2281_v58 = vrot.slane %v2241_v2, 7  ;;  %v2361_v57 = vrot.slane %v2241_v2, 1  ;;  %v7407_v2 = vld [vmem:[#allocation56_spill] sm:$0xff] }
 0x4c2   : > { %3179 = vmatmul.f32.gmra.mxu0 %v5944_v1  ;;  %v992_v41 = vadd.f32 %v7407_v2, %v855_v62 }
 0x4c3   : > { %v2653_v11 = vpop.f32.mrf.mxu2  ;;  %v6275_v13 = vsel %vm346_vm0, %v2280_v23, %v2281_v58  ;;  %v6279_v25 = vsel %vm443_vm1, %v2360_v6, %v2361_v57  ;;  %v6299_v7 = vsel %vm443_vm1, %v2361_v57, %v5638_v47 }
 0x4c4   : > { %7404 = vst [vmem:[#allocation93_spill] sm:$0xff] %v6279_v25  ;;  %v2654_v20 = vadd.f32 %v2653_v11, %v2556_v50  ;;  %2595 = vmatmul.f32.gmra.mxu1 %v6275_v13  ;;  %2786 = vmatmul.f32.gmra.mxu3 %v6279_v25  ;;  %v1129_v12 = vadd.f32 %v7408_v35, %v992_v41  ;;  %v7413_v35 = vld [vmem:[#allocation71_spill] sm:$0xff]  ;;  %v7414_v41 = vld [vmem:[#allocation134_spill] sm:$0xff] }
 0x4c5   : > { %v6294_v11 = vsel %vm346_vm0, %v2281_v58, %v5509_v27  ;;  %7409 = vst [vmem:[#allocation74_spill] sm:$0xff] %v6299_v7 }
 0x4c7   : > { %v1859_v40 = vpop.f32.mrf.mxu0  ;;  %v2747_v51 = vpop.f32.mrf.mxu3 }
 0x4c8   : > { %v6286_v23 = vadd.f32 %v2747_v51, %v2651_v33  ;;  %2695 = vmatmul.f32.gmra.mxu2 %v7240_v4  ;;  %v7410_v33 = vld [vmem:[#allocation55_spill] sm:$0xff]  ;;  %v1266_v40 = vadd.f32 %v7412_v34, %v1129_v12  ;;  %v1726_v51 = vadd.f32 %v7413_v35, %v5823_v3  ;;  %v7417_v35 = vld [vmem:[#allocation24_spill] sm:$0xff] }
 0x4c9   : > { %v2559_v6 = vpop.f32.mrf.mxu1  ;;  %v858_v62 = vadd.f32 %v7411_v38, %v7410_v33  ;;  %v3132_v33 = vld [vmem:[#allocation7 + $0x468] sm:$0xff]  ;;  %v7416_v38 = vld [vmem:[#allocation131_spill] sm:$0xff] }
 0x4ca   : > { %3181 = vmatmul.f32.gmra.mxu0 %v5509_v27  ;;  %3331 = vmatpush.msra.mxu2 %v3132_v33  ;;  %v7422_v33 = vld [vmem:[#allocation25_spill] sm:$0xff] }
 0x4cb   : > { %v2656_v50 = vpop.f32.mrf.mxu2  ;;  %v995_v6 = vadd.f32 %v7414_v41, %v858_v62  ;;  %v3116_v62 = vld [vmem:[#allocation7 + $0x3e8] sm:$0xff] }
 0x4cc   : > { %2598 = vmatmul.f32.gmra.mxu1 %v6294_v11  ;;  %2789 = vmatmul.f32.gmra.mxu3 %v6299_v7  ;;  %v7415_v50 = vld [vmem:[#allocation77_spill] sm:$0xff] }
 0x4cd   : > { %v1403_v44 = vadd.f32 %v7415_v50, %v1266_v40  ;;  %v1132_v34 = vadd.f32 %v7416_v38, %v995_v6  ;;  %3234 = vmatpush.msra.mxu1 %v3116_v62  ;;  %v7418_v40 = vld [vmem:[#allocation32_spill] sm:$0xff]  ;;  %v7421_v6 = vld [vmem:[#allocation22_spill] sm:$0xff] }
 0x4cf   : > { %v1862_v2 = vpop.f32.mrf.mxu0  ;;  %v2750_v58 = vpop.f32.mrf.mxu3  ;;  %v1269_v15 = vadd.f32 %v7417_v35, %v1132_v34  ;;  %v7425_v35 = vld [vmem:[#allocation112_spill] sm:$0xff] }
 0x4d0   : > { %v1863_v57 = vadd.f32 %v1862_v2, %v1726_v51  ;;  %v6310_v25 = vadd.f32 %v2750_v58, %v2654_v20  ;;  %2908 = vmatmul.f32.vlgmr.msrb.gmra.mxu2 %v7240_v4  ;;  %v1968_v20 = vadd.s32 9, %v5547_v59  ;;  %v7419_v51 = vld [vmem:[#allocation76_spill] sm:$0xff]  ;;  %v7426_v62 = vrot.slane %v7425_v35, 7 }
 0x4d1   : > { %v2561_v12 = vpop.f32.mrf.mxu1  ;;  %v1729_v2 = vadd.f32 %v7419_v51, %v7418_v40  ;;  %v1406_v50 = vadd.f32 %v7421_v6, %v1269_v15  ;;  %v7427_v40 = vrot.slane %v7425_v35, 1 }
 0x4d2   : > { %v1908_v7 = vadd.f32 %v1863_v57, %v1403_v44  ;;  %3183 = vmatmul.f32.gmra.mxu0 %v5991_v43  ;;  %v7423_v12 = vmax.f32 %v7422_v33, 0.0  ;;  %vm1978_vm9 = vcmp.ge.s32.totalorder %v1968_v20, 0  ;;  %vm1988_vm12 = vcmp.lt.s32.totalorder %v1968_v20, 16  ;;  %v7433_v33 = vld [vmem:[#allocation47_spill] sm:$0xff] }
 0x4d3   : > { %v2658_v3 = vpop.f32.mrf.mxu2  ;;  %v2325_v15 = vsel %vm346_vm0, %v5509_v27, %v7426_v62  ;;  %v2405_v51 = vsel %vm443_vm1, %v5638_v47, %v7427_v40  ;;  %vm6341_vm14 = vmand %vm1978_vm9, %vm1988_vm12  ;;  %v7428_v20 = vmov 0  ;;  %v7437_v40 = vld [vmem:[#allocation98_spill] sm:$0xff] }
 0x4d4   : > { %2792 = vmatmul.f32.gmra.mxu3 %v5638_v47  ;;  %2811 = vmatmul.f32.vlgmr.msrb.gmra.mxu1 %v5509_v27  ;;  %v6322_v58 = vadd.f32 %v6145_v8, %v1908_v7  ;;  %v7429_v20 = vsel %vm6341_vm14, 4294967295, %v7428_v20 }
 0x4d5   : > { %7430 = vst [vmem:[#allocation82_spill] sm:$0xff] %v7429_v20 }
 0x4d6   : > { %7420 = vst [vmem:[#allocation26_spill] sm:$0xff] %v6322_v58  ;;  %v7015_v34 = vmax.f32 %v6322_v58, 0.0  ;;  %v7449_v58 = vld [vmem:[#allocation125_spill] sm:$0xff] }
 0x4d7   : > { %v1865_v44 = vpop.f32.mrf.mxu0  ;;  %v2753_v41 = vpop.f32.mrf.mxu3 }
 0x4d8   : > { %v1866_v57 = vadd.f32 %v1865_v44, %v1729_v2  ;;  %3637 = vmatmul.msk.f32.gmra.mxu2 %vm5558_vm4, %v7423_v12  ;;  %v6353_v6 = vsel %vm6341_vm14, %v7015_v34, 0.0  ;;  %v7434_v12 = vmax.f32 %v7433_v33, 0.0 }
 0x4d9   : > { %v2563_v59 = vpop.f32.mrf.mxu1  ;;  %7432 = vst [vmem:[#allocation96_spill] sm:$0xff] %v6353_v6 }
 0x4da   : > { %v1909_v3 = vadd.f32 %v1866_v57, %v1406_v50  ;;  %3186 = vmatmul.f32.gmra.mxu0 %v6015_v45 }
 0x4db   : > { %v2660_v7 = vpop.f32.mrf.mxu2 }
 0x4dc   : > { %v6346_v2 = vadd.f32 %v6145_v8, %v1909_v3  ;;  %v2661_v44 = vadd.f32 %v2660_v7, %v2563_v59  ;;  %2813 = vmatmul.f32.gmra.mxu1 %v2325_v15  ;;  %3005 = vmatmul.f32.vlgmr.msrb.gmra.mxu3 %v2405_v51  ;;  %v3131_v8 = vld [vmem:[#allocation7 + $0x460] sm:$0xff]  ;;  %v7016_v7 = vrot.slane %v6353_v6, 1  ;;  %v7438_v51 = vld [vmem:[#allocation52_spill] sm:$0xff] }
 0x4dd   : > { %3332 = vmatpush.msra.mxu2 %v3131_v8 }
 0x4de   : > { %7431 = vst [vmem:[#allocation95_spill] sm:$0xff] %v6346_v2  ;;  %v7013_v41 = vmax.f32 %v6346_v2, 0.0  ;;  %v7448_v2 = vld [vmem:[#allocation33_spill] sm:$0xff] }
 0x4df   : > { %v1868_v50 = vpop.f32.mrf.mxu0  ;;  %v2755_v57 = vpop.f32.mrf.mxu3 }
 0x4e0   : > { %3638 = vmatmul.msk.f32.gmra.mxu2 %vm5558_vm4, %v7434_v12  ;;  %v6363_v59 = vsel %vm6341_vm14, %v7013_v41, 0.0  ;;  %v3115_v50 = vld [vmem:[#allocation7 + $0x3e0] sm:$0xff] }
 0x4e1   : > { %7435 = vst [vmem:[#allocation135_spill] sm:$0xff] %v6363_v59  ;;  %v2566_v3 = vpop.f32.mrf.mxu1  ;;  %v7014_v35 = vrot.slane %v6363_v59, 1  ;;  %3235 = vmatpush.msra.mxu1 %v3115_v50 }
 0x4e2   : > { %3189 = vmatmul.f32.gmra.mxu0 %v6034_v18 }
 0x4e3   : > { %v2663_v62 = vpop.f32.mrf.mxu2  ;;  %v6374_v38 = vsel %vm443_vm1, %v7016_v7, %v7014_v35  ;;  %v7439_v35 = vld [vmem:[#allocation49_spill] sm:$0xff] }
 0x4e4   : > { %7436 = vst [vmem:[#allocation79_spill] sm:$0xff] %v6374_v38  ;;  %v2664_v15 = vadd.f32 %v2663_v62, %v2566_v3  ;;  %2816 = vmatmul.f32.gmra.mxu1 %v7437_v40  ;;  %3007 = vmatmul.f32.gmra.mxu3 %v7438_v51  ;;  %v7440_v34 = vrot.slane %v7439_v35, 7  ;;  %v7441_v62 = vrot.slane %v7439_v35, 1  ;;  %v3114_v35 = vld [vmem:[#allocation7 + $0x3d8] sm:$0xff]  ;;  %v7458_v38 = vld [vmem:[#allocation35_spill] sm:$0xff] }
 0x4e5   : > { %3236 = vmatpush.msra.mxu1 %v3114_v35  ;;  %v3129_v35 = vld [vmem:[#allocation7 + $0x450] sm:$0xff] }
 0x4e6   : > { %v2323_v3 = vsel %vm346_vm0, %v7440_v34, %v5509_v27  ;;  %v2403_v40 = vsel %vm443_vm1, %v7441_v62, %v5638_v47 }
 0x4e7   : > { %v2757_v57 = vpop.f32.mrf.mxu3  ;;  %v3152_v33 = vpop.f32.mrf.mxu0 }
 0x4e8   : > { %v6378_v12 = vadd.f32 %v2757_v57, %v2661_v44  ;;  %2916 = vmatmul.f32.gmra.mxu2 %v7240_v4 }
 0x4e9   : > { %v2569_v8 = vpop.f32.mrf.mxu1 }
 0x4ea   : > { %3191 = vmatmul.f32.gmra.mxu0 %v5509_v27 }
 0x4eb   : > { %v2666_v41 = vpop.f32.mrf.mxu2 }
 0x4ec   : > { %2819 = vmatmul.f32.gmra.mxu1 %v2323_v3  ;;  %3010 = vmatmul.f32.gmra.mxu3 %v2403_v40  ;;  %v3130_v41 = vld [vmem:[#allocation7 + $0x458] sm:$0xff]  ;;  %v7444_v3 = vld [vmem:[#allocation113_spill] sm:$0xff] }
 0x4ed   : > { %3333 = vmatpush.msra.mxu2 %v3130_v41  ;;  %v7446_v41 = vld [vmem:[#allocation123_spill] sm:$0xff] }
 0x4ef   : > { %v2760_v44 = vpop.f32.mrf.mxu3  ;;  %v6392_v51 = vpop.f32.mrf.mxu0  ;;  %3334 = vmatpush.msra.mxu2 %v3129_v35  ;;  %v7452_v35 = vld [vmem:[#allocation116_spill] sm:$0xff] }
 0x4f0   : > { %7442 = vst [vmem:[#allocation51_spill] sm:$0xff] %v6392_v51  ;;  %v6394_v50 = vadd.f32 %v2760_v44, %v2664_v15  ;;  %2918 = vmatmul.f32.gmra.mxu2 %v7240_v4  ;;  %v7461_v51 = vld [vmem:[#allocation31_spill] sm:$0xff] }
 0x4f1   : > { %v2571_v57 = vpop.f32.mrf.mxu1 }
 0x4f2   : > { %3193 = vmatmul.f32.gmra.mxu0 %v6079_v26  ;;  %v7447_v57 = vld [vmem:[#allocation99_spill] sm:$0xff] }
 0x4f3   : > { %v2668_v34 = vpop.f32.mrf.mxu2 }
 0x4f4   : > { %2821 = vmatmul.f32.gmra.mxu1 %v5509_v27  ;;  %3013 = vmatmul.f32.gmra.mxu3 %v5638_v47 }
 0x4f7   : > { %v2763_v33 = vpop.f32.mrf.mxu3  ;;  %v6400_v8 = vpop.f32.mrf.mxu0 }
 0x4f8   : > { %7443 = vst [vmem:[#allocation111_spill] sm:$0xff] %v6400_v8  ;;  %3639 = vmatmul.msk.f32.gmra.mxu2 %vm5623_vm7, %v7444_v3 }
 0x4f9   : > { %v2573_v62 = vpop.f32.mrf.mxu1 }
 0x4fa   : > { %3196 = vmatmul.f32.gmra.mxu0 %v6100_v54 }
 0x4fb   : > { %v2670_v40 = vpop.f32.mrf.mxu2 }
 0x4fc   : > { %v2671_v44 = vadd.f32 %v2670_v40, %v2573_v62  ;;  %2823 = vmatmul.f32.gmra.mxu1 %v7446_v41  ;;  %3015 = vmatmul.f32.gmra.mxu3 %v7447_v57  ;;  %v7450_v62 = vld [vmem:[#allocation59_spill] sm:$0xff] }
 0x4fd   : > { %v3113_v40 = vld [vmem:[#allocation7 + $0x3d0] sm:$0xff] }
 0x4fe   : > { %3237 = vmatpush.msra.mxu1 %v3113_v40 }
 0x4ff   : > { %v2765_v34 = vpop.f32.mrf.mxu3  ;;  %v3160_v7 = vpop.f32.mrf.mxu0 }
 0x500   : > { %3640 = vmatmul.msk.f32.gmra.mxu2 %vm5623_vm7, %v7448_v2  ;;  %v7451_v34 = vld [vmem:[#allocation61_spill] sm:$0xff] }
 0x501   : > { %v2576_v33 = vpop.f32.mrf.mxu1 }
 0x502   : > { %3199 = vmatmul.f32.gmra.mxu0 %v6119_v28 }
 0x503   : > { %v2673_v3 = vpop.f32.mrf.mxu2 }
 0x504   : > { %v2674_v20 = vadd.f32 %v2673_v3, %v2576_v33  ;;  %2826 = vmatmul.f32.gmra.mxu1 %v7449_v58  ;;  %3017 = vmatmul.f32.gmra.mxu3 %v7450_v62  ;;  %v3128_v62 = vld [vmem:[#allocation7 + $0x448] sm:$0xff] }
 0x505   : > { %3335 = vmatpush.msra.mxu2 %v3128_v62  ;;  %v7457_v62 = vld [vmem:[#allocation64_spill] sm:$0xff] }
 0x507   : > { %v2767_v41 = vpop.f32.mrf.mxu3  ;;  %v3162_v57 = vpop.f32.mrf.mxu0 }
 0x508   : > { %v6414_v7 = vadd.f32 %v2767_v41, %v2671_v44  ;;  %2926 = vmatmul.f32.gmra.mxu2 %v7240_v4  ;;  %v3112_v41 = vld [vmem:[#allocation7 + $0x3c8] sm:$0xff] }
 0x509   : > { %v2579_v2 = vpop.f32.mrf.mxu1  ;;  %3238 = vmatpush.msra.mxu1 %v3112_v41  ;;  %v3127_v41 = vld [vmem:[#allocation7 + $0x440] sm:$0xff] }
 0x50a   : > { %3201 = vmatmul.f32.gmra.mxu0 %v5509_v27  ;;  %3336 = vmatpush.msra.mxu2 %v3127_v41 }
 0x50b   : > { %v2676_v15 = vpop.f32.mrf.mxu2 }
 0x50c   : > { %2829 = vmatmul.f32.gmra.mxu1 %v7451_v34  ;;  %3020 = vmatmul.f32.gmra.mxu3 %v7452_v35  ;;  %v7455_v15 = vld [vmem:[#allocation62_spill] sm:$0xff] }
 0x50f   : > { %v2770_v33 = vpop.f32.mrf.mxu3  ;;  %v6420_v58 = vpop.f32.mrf.mxu0 }
 0x510   : > { %7453 = vst [vmem:[#allocation84_spill] sm:$0xff] %v6420_v58  ;;  %v6422_v3 = vadd.f32 %v2770_v33, %v2674_v20  ;;  %2928 = vmatmul.f32.gmra.mxu2 %v7240_v4 }
 0x511   : > { %v2581_v44 = vpop.f32.mrf.mxu1 }
 0x512   : > { %3203 = vmatmul.f32.gmra.mxu0 %v6169_v49 }
 0x513   : > { %v2678_v40 = vpop.f32.mrf.mxu2 }
 0x514   : > { %2831 = vmatmul.f32.gmra.mxu1 %v5509_v27  ;;  %3023 = vmatmul.f32.gmra.mxu3 %v5638_v47 }
 0x517   : > { %v2773_v57 = vpop.f32.mrf.mxu3  ;;  %v6428_v2 = vpop.f32.mrf.mxu0 }
 0x518   : > { %7454 = vst [vmem:[#allocation136_spill] sm:$0xff] %v6428_v2  ;;  %3641 = vmatmul.msk.f32.gmra.mxu2 %vm5713_vm10, %v7455_v15 }
 0x519   : > { %v2583_v34 = vpop.f32.mrf.mxu1 }
 0x51a   : > { %3206 = vmatmul.f32.gmra.mxu0 %v6190_v56 }
 0x51b   : > { %v2680_v35 = vpop.f32.mrf.mxu2 }
 0x51c   : > { %v2681_v33 = vadd.f32 %v2680_v35, %v2583_v34  ;;  %2833 = vmatmul.f32.gmra.mxu1 %v5731_v37  ;;  %3025 = vmatmul.f32.gmra.mxu3 %v7457_v62  ;;  %v7459_v34 = vld [vmem:[#allocation117_spill] sm:$0xff] }
 0x51d   : > { %v3111_v37 = vld [vmem:[#allocation7 + $0x3c0] sm:$0xff] }
 0x51e   : > { %3239 = vmatpush.msra.mxu1 %v3111_v37  ;;  %v3126_v37 = vld [vmem:[#allocation7 + $0x438] sm:$0xff] }
 0x51f   : > { %v2775_v44 = vpop.f32.mrf.mxu3  ;;  %v3170_v40 = vpop.f32.mrf.mxu0  ;;  %3337 = vmatpush.msra.mxu2 %v3126_v37 }
 0x520   : > { %3642 = vmatmul.msk.f32.gmra.mxu2 %vm5713_vm10, %v7458_v38 }
 0x521   : > { %v2586_v57 = vpop.f32.mrf.mxu1 }
 0x522   : > { %3209 = vmatmul.f32.gmra.mxu0 %v6209_v31 }
 0x523   : > { %v2683_v2 = vpop.f32.mrf.mxu2 }
 0x524   : > { %v2684_v58 = vadd.f32 %v2683_v2, %v2586_v57  ;;  %2836 = vmatmul.f32.gmra.mxu1 %v5756_v17  ;;  %3027 = vmatmul.f32.gmra.mxu3 %v7459_v34 }
 0x527   : > { %v2777_v35 = vpop.f32.mrf.mxu3  ;;  %v3172_v44 = vpop.f32.mrf.mxu0 }
 0x528   : > { %v6442_v40 = vadd.f32 %v2777_v35, %v2681_v33  ;;  %2936 = vmatmul.f32.gmra.mxu2 %v7240_v4 }
 0x529   : > { %v2589_v8 = vpop.f32.mrf.mxu1 }
 0x52a   : > { %7460 = vst [vmem:[#allocation133_spill] sm:$0xff] %v6442_v40  ;;  %3211 = vmatmul.f32.gmra.mxu0 %v5509_v27 }
 0x52b   : > { %v2686_v41 = vpop.f32.mrf.mxu2 }
 0x52c   : > { %2839 = vmatmul.f32.gmra.mxu1 %v5777_v63  ;;  %3030 = vmatmul.f32.gmra.mxu3 %v7461_v51  ;;  %v3110_v63 = vld [vmem:[#allocation7 + $0x3b8] sm:$0xff]  ;;  %v7465_v41 = vld [vmem:[#allocation41_spill] sm:$0xff] }
 0x52d   : > { %3240 = vmatpush.msra.mxu1 %v3110_v63  ;;  %v3125_v63 = vld [vmem:[#allocation7 + $0x430] sm:$0xff] }
 0x52e   : > { %3338 = vmatpush.msra.mxu2 %v3125_v63 }
 0x52f   : > { %v2780_v2 = vpop.f32.mrf.mxu3  ;;  %v6448_v17 = vpop.f32.mrf.mxu0 }
 0x530   : > { %7462 = vst [vmem:[#allocation88_spill] sm:$0xff] %v6448_v17  ;;  %v6450_v57 = vadd.f32 %v2780_v2, %v2684_v58  ;;  %2938 = vmatmul.f32.gmra.mxu2 %v7240_v4 }
 0x531   : > { %v2591_v33 = vpop.f32.mrf.mxu1 }
 0x532   : > { %7463 = vst [vmem:[#allocation29_spill] sm:$0xff] %v6450_v57  ;;  %3213 = vmatmul.f32.gmra.mxu0 %v6254_v52  ;;  %v7467_v52 = vld [vmem:[#allocation128_spill] sm:$0xff]  ;;  %v7468_v57 = vld [vmem:[#allocation73_spill] sm:$0xff] }
 0x533   : > { %v2688_v8 = vpop.f32.mrf.mxu2 }
 0x534   : > { %2841 = vmatmul.f32.gmra.mxu1 %v5509_v27  ;;  %3033 = vmatmul.f32.gmra.mxu3 %v5638_v47 }
 0x537   : > { %v2783_v35 = vpop.f32.mrf.mxu3  ;;  %v6456_v44 = vpop.f32.mrf.mxu0 }
 0x538   : > { %7464 = vst [vmem:[#allocation100_spill] sm:$0xff] %v6456_v44  ;;  %3643 = vmatmul.msk.f32.gmra.mxu2 %vm5795_vm13, %v7465_v41 }
 0x539   : > { %v2593_v2 = vpop.f32.mrf.mxu1 }
 0x53a   : > { %3216 = vmatmul.f32.gmra.mxu0 %v6275_v13  ;;  %v7469_v13 = vld [vmem:[#allocation120_spill] sm:$0xff] }
 0x53b   : > { %v2690_v37 = vpop.f32.mrf.mxu2 }
 0x53c   : > { %v2691_v33 = vadd.f32 %v2690_v37, %v2593_v2  ;;  %2843 = vmatmul.f32.gmra.mxu1 %v5813_v5  ;;  %3035 = vmatmul.f32.gmra.mxu3 %v7467_v52  ;;  %v3109_v5 = vld [vmem:[#allocation7 + $0x3b0] sm:$0xff] }
 0x53d   : > { %3241 = vmatpush.msra.mxu1 %v3109_v5 }
 0x53f   : > { %v2785_v8 = vpop.f32.mrf.mxu3  ;;  %v3180_v17 = vpop.f32.mrf.mxu0 }
 0x540   : > { %3644 = vmatmul.msk.f32.gmra.mxu2 %vm5795_vm13, %v7468_v57 }
 0x541   : > { %v2596_v35 = vpop.f32.mrf.mxu1 }
 0x542   : > { %3219 = vmatmul.f32.gmra.mxu0 %v6294_v11  ;;  %v7470_v11 = vld [vmem:[#allocation78_spill] sm:$0xff] }
 0x543   : > { %v2693_v44 = vpop.f32.mrf.mxu2 }
 0x544   : > { %v2694_v40 = vadd.f32 %v2693_v44, %v2596_v35  ;;  %2846 = vmatmul.f32.gmra.mxu1 %v5838_v9  ;;  %3037 = vmatmul.f32.gmra.mxu3 %v7469_v13  ;;  %v2284_v9 = vrot.slane %v6353_v6, 7 }
 0x547   : > { %v2787_v2 = vpop.f32.mrf.mxu3  ;;  %v3182_v37 = vpop.f32.mrf.mxu0 }
 0x548   : > { %v6470_v17 = vadd.f32 %v2787_v2, %v2691_v33  ;;  %2946 = vmatmul.f32.gmra.mxu2 %v7240_v4  ;;  %v3124_v33 = vld [vmem:[#allocation7 + $0x428] sm:$0xff]  ;;  %v2289_v37 = vsel %vm346_vm0, %v5509_v27, %v2284_v9 }
 0x549   : > { %v2599_v8 = vpop.f32.mrf.mxu1  ;;  %3339 = vmatpush.msra.mxu2 %v3124_v33 }
 0x54a   : > { %3221 = vmatmul.f32.gmra.mxu0 %v5509_v27  ;;  %v3108_v8 = vld [vmem:[#allocation7 + $0x3a8] sm:$0xff] }
 0x54b   : > { %v2696_v63 = vpop.f32.mrf.mxu2  ;;  %3242 = vmatpush.msra.mxu1 %v3108_v8 }
 0x54c   : > { %2849 = vmatmul.f32.gmra.mxu1 %v5859_v46  ;;  %3040 = vmatmul.f32.gmra.mxu3 %v7470_v11  ;;  %v2285_v63 = vrot.slane %v6363_v59, 7  ;;  %v3123_v59 = vld [vmem:[#allocation7 + $0x420] sm:$0xff] }
 0x54d   : > { %3340 = vmatpush.msra.mxu2 %v3123_v59 }
 0x54e   : > { %v2288_v33 = vsel %vm346_vm0, %v2284_v9, %v2285_v63  ;;  %v2287_v9 = vsel %vm346_vm0, %v2285_v63, %v5509_v27 }
 0x54f   : > { %v2790_v44 = vpop.f32.mrf.mxu3  ;;  %v6477_v35 = vpop.f32.mrf.mxu0 }
 0x550   : > { %7471 = vst [vmem:[#allocation101_spill] sm:$0xff] %v6477_v35  ;;  %v6479_v5 = vadd.f32 %v2790_v44, %v2694_v40  ;;  %2948 = vmatmul.f32.gmra.mxu2 %v7240_v4 }
 0x551   : > { %v2812_v2 = vpop.f32.mrf.mxu1 }
 0x552   : > { %3223 = vmatmul.f32.gmra.mxu0 %v2289_v37 }
 0x553   : > { %v2909_v46 = vpop.f32.mrf.mxu2 }
 0x554   : > { %2851 = vmatmul.f32.gmra.mxu1 %v5509_v27  ;;  %3043 = vmatmul.f32.gmra.mxu3 %v5638_v47 }
 0x557   : > { %v2793_v40 = vpop.f32.mrf.mxu3  ;;  %v6488_v44 = vpop.f32.mrf.mxu0 }
 0x558   : > { %7472 = vst [vmem:[#allocation87_spill] sm:$0xff] %v6488_v44  ;;  %3645 = vmatmul.msk.f32.gmra.mxu2 %vm5883_vm2, %v5889_v16  ;;  %v7473_v44 = vld [vmem:[#allocation42_spill] sm:$0xff] }
 0x559   : > { %v2814_v2 = vpop.f32.mrf.mxu1 }
 0x55a   : > { %v2815_v37 = vadd.f32 %v2814_v2, %v6026_v10  ;;  %3226 = vmatmul.f32.gmra.mxu0 %v2288_v33  ;;  %v7474_v33 = vld [vmem:[#allocation122_spill] sm:$0xff] }
 0x55b   : > { %v2911_v46 = vpop.f32.mrf.mxu2 }
 0x55c   : > { %v2912_v35 = vadd.f32 %v2911_v46, %v2815_v37  ;;  %2853 = vmatmul.f32.gmra.mxu1 %v5902_v29  ;;  %3045 = vmatmul.f32.gmra.mxu3 %v5907_v53  ;;  %v3107_v37 = vld [vmem:[#allocation7 + $0x3a0] sm:$0xff] }
 0x55d   : > { %3243 = vmatpush.msra.mxu1 %v3107_v37 }
 0x55f   : > { %v3006_v8 = vpop.f32.mrf.mxu3  ;;  %v3190_v40 = vpop.f32.mrf.mxu0 }
 0x560   : > { %3646 = vmatmul.msk.f32.gmra.mxu2 %vm5883_vm2, %v7473_v44 }
 0x561   : > { %v2817_v6 = vpop.f32.mrf.mxu1 }
 0x562   : > { %v2818_v10 = vadd.f32 %v2817_v6, %v6051_v60  ;;  %3229 = vmatmul.f32.gmra.mxu0 %v2287_v9  ;;  %v7475_v60 = vld [vmem:[#allocation37_spill] sm:$0xff]  ;;  %v3122_v9 = vld [vmem:[#allocation7 + $0x418] sm:$0xff] }
 0x563   : > { %v2914_v2 = vpop.f32.mrf.mxu2  ;;  %3341 = vmatpush.msra.mxu2 %v3122_v9 }
 0x564   : > { %v2915_v29 = vadd.f32 %v2914_v2, %v2818_v10  ;;  %2856 = vmatmul.f32.gmra.mxu1 %v5923_v30  ;;  %3047 = vmatmul.f32.gmra.mxu3 %v7474_v33 }
 0x567   : > { %v3008_v46 = vpop.f32.mrf.mxu3  ;;  %v3192_v8 = vpop.f32.mrf.mxu0 }
 0x568   : > { %v6507_v40 = vadd.f32 %v3008_v46, %v2912_v35  ;;  %2956 = vmatmul.f32.gmra.mxu2 %v7240_v4 }
 0x569   : > { %v2820_v39 = vpop.f32.mrf.mxu1 }
 0x56a   : > { %v3106_v39 = vld [vmem:[#allocation7 + $0x398] sm:$0xff] }
 0x56b   : > { %v2917_v63 = vpop.f32.mrf.mxu2  ;;  %3244 = vmatpush.msra.mxu1 %v3106_v39 }
 0x56c   : > { %2859 = vmatmul.f32.gmra.mxu1 %v5944_v1  ;;  %3050 = vmatmul.f32.gmra.mxu3 %v7475_v60  ;;  %v7478_v63 = vld [vmem:[#allocation34_spill] sm:$0xff] }
 0x56f   : > { %v3011_v6 = vpop.f32.mrf.mxu3  ;;  %v6512_v59 = vpop.f32.mrf.mxu0 }
 0x570   : > { %7476 = vst [vmem:[#allocation114_spill] sm:$0xff] %v6512_v59  ;;  %v6514_v30 = vadd.f32 %v3011_v6, %v2915_v29  ;;  %2958 = vmatmul.f32.gmra.mxu2 %v7240_v4 }
 0x571   : > { %v2822_v10 = vpop.f32.mrf.mxu1 }
 0x572   : > { %v7479_v10 = vld [vmem:[#allocation44_spill] sm:$0xff] }
 0x573   : > { %v2919_v35 = vpop.f32.mrf.mxu2 }
 0x574   : > { %2861 = vmatmul.f32.gmra.mxu1 %v5509_v27  ;;  %3053 = vmatmul.f32.gmra.mxu3 %v5638_v47  ;;  %v3121_v35 = vld [vmem:[#allocation7 + $0x410] sm:$0xff] }
 0x575   : > { %3342 = vmatpush.msra.mxu2 %v3121_v35  ;;  %v3120_v35 = vld [vmem:[#allocation7 + $0x408] sm:$0xff] }
 0x577   : > { %v3014_v1 = vpop.f32.mrf.mxu3  ;;  %v6519_v2 = vpop.f32.mrf.mxu0  ;;  %3343 = vmatpush.msra.mxu2 %v3120_v35 }
 0x578   : > { %7477 = vst [vmem:[#allocation103_spill] sm:$0xff] %v6519_v2  ;;  %3647 = vmatmul.msk.f32.gmra.mxu2 %vm5971_vm6, %v5977_v42 }
 0x579   : > { %v2824_v29 = vpop.f32.mrf.mxu1 }
 0x57a   : > { %v2825_v37 = vadd.f32 %v2824_v29, %v6111_v0  ;;  %v7480_v0 = vld [vmem:[#allocation130_spill] sm:$0xff] }
 0x57b   : > { %v2921_v46 = vpop.f32.mrf.mxu2 }
 0x57c   : > { %v2922_v8 = vadd.f32 %v2921_v46, %v2825_v37  ;;  %2863 = vmatmul.f32.gmra.mxu1 %v5991_v43  ;;  %3055 = vmatmul.f32.gmra.mxu3 %v7478_v63  ;;  %v3105_v43 = vld [vmem:[#allocation7 + $0x390] sm:$0xff] }
 0x57d   : > { %3245 = vmatpush.msra.mxu1 %v3105_v43 }
 0x57f   : > { %v3016_v6 = vpop.f32.mrf.mxu3  ;;  %v3200_v9 = vpop.f32.mrf.mxu0 }
 0x580   : > { %3648 = vmatmul.msk.f32.gmra.mxu2 %vm5971_vm6, %v7479_v10 }
 0x581   : > { %v2827_v39 = vpop.f32.mrf.mxu1 }
 0x582   : > { %v2828_v1 = vadd.f32 %v2827_v39, %v6136_v36 }
 0x583   : > { %v2924_v2 = vpop.f32.mrf.mxu2 }
 0x584   : > { %v2925_v59 = vadd.f32 %v2924_v2, %v2828_v1  ;;  %2866 = vmatmul.f32.gmra.mxu1 %v6015_v45  ;;  %3057 = vmatmul.f32.gmra.mxu3 %v7480_v0  ;;  %v3104_v1 = vld [vmem:[#allocation7 + $0x388] sm:$0xff] }
 0x585   : > { %3246 = vmatpush.msra.mxu1 %v3104_v1  ;;  %v3119_v1 = vld [vmem:[#allocation7 + $0x400] sm:$0xff] }
 0x586   : > { %3344 = vmatpush.msra.mxu2 %v3119_v1 }
 0x587   : > { %v3018_v29 = vpop.f32.mrf.mxu3  ;;  %v3202_v37 = vpop.f32.mrf.mxu0 }
 0x588   : > { %v6533_v46 = vadd.f32 %v3018_v29, %v2922_v8  ;;  %2966 = vmatmul.f32.gmra.mxu2 %v7240_v4  ;;  %v7497_v29 = vld [vmem:[#allocation84_spill] sm:$0xff] }
 0x589   : > { %v2830_v6 = vpop.f32.mrf.mxu1 }
 0x58b   : > { %v2927_v9 = vpop.f32.mrf.mxu2 }
 0x58c   : > { %2869 = vmatmul.f32.gmra.mxu1 %v6034_v18  ;;  %3060 = vmatmul.f32.gmra.mxu3 %v6039_v22 }
 0x58f   : > { %v3021_v36 = vpop.f32.mrf.mxu3  ;;  %v6538_v2 = vpop.f32.mrf.mxu0 }
 0x590   : > { %7481 = vst [vmem:[#allocation104_spill] sm:$0xff] %v6538_v2  ;;  %v6540_v45 = vadd.f32 %v3021_v36, %v2925_v59  ;;  %2968 = vmatmul.f32.gmra.mxu2 %v7240_v4  ;;  %v7485_v36 = vld [vmem:[#allocation86_spill] sm:$0xff] }
 0x591   : > { %v2832_v39 = vpop.f32.mrf.mxu1 }
 0x592   : > { %7482 = vst [vmem:[#allocation63_spill] sm:$0xff] %v6540_v45 }
 0x593   : > { %v2929_v8 = vpop.f32.mrf.mxu2 }
 0x594   : > { %2871 = vmatmul.f32.gmra.mxu1 %v5509_v27  ;;  %3063 = vmatmul.f32.gmra.mxu3 %v5638_v47  ;;  %v7486_v8 = vld [vmem:[#allocation27_spill] sm:$0xff] }
 0x597   : > { %v3024_v18 = vpop.f32.mrf.mxu3  ;;  %v6545_v43 = vpop.f32.mrf.mxu0 }
 0x598   : > { %7483 = vst [vmem:[#allocation89_spill] sm:$0xff] %v6545_v43  ;;  %3649 = vmatmul.msk.f32.gmra.mxu2 %vm6060_vm11, %v6066_v21 }
 0x599   : > { %v2834_v59 = vpop.f32.mrf.mxu1 }
 0x59a   : > { %v2835_v37 = vadd.f32 %v2834_v59, %v6201_v24 }
 0x59b   : > { %v2931_v6 = vpop.f32.mrf.mxu2 }
 0x59c   : > { %v2932_v9 = vadd.f32 %v2931_v6, %v2835_v37  ;;  %2873 = vmatmul.f32.gmra.mxu1 %v6079_v26  ;;  %3065 = vmatmul.f32.gmra.mxu3 %v7485_v36  ;;  %v3103_v26 = vld [vmem:[#allocation7 + $0x380] sm:$0xff] }
 0x59d   : > { %3247 = vmatpush.msra.mxu1 %v3103_v26 }
 0x59f   : > { %v3026_v35 = vpop.f32.mrf.mxu3  ;;  %v3210_v39 = vpop.f32.mrf.mxu0 }
 0x5a0   : > { %3650 = vmatmul.msk.f32.gmra.mxu2 %vm6060_vm11, %v7486_v8 }
 0x5a1   : > { %v2837_v18 = vpop.f32.mrf.mxu1 }
 0x5a2   : > { %v2838_v43 = vadd.f32 %v2837_v18, %v6226_v19  ;;  %v7488_v18 = vld [vmem:[#allocation67_spill] sm:$0xff] }
 0x5a3   : > { %v2934_v2 = vpop.f32.mrf.mxu2 }
 0x5a4   : > { %v2935_v45 = vadd.f32 %v2934_v2, %v2838_v43  ;;  %2876 = vmatmul.f32.gmra.mxu1 %v6100_v54  ;;  %3067 = vmatmul.f32.gmra.mxu3 %v6104_v48 }
 0x5a7   : > { %v3028_v24 = vpop.f32.mrf.mxu3  ;;  %v3212_v59 = vpop.f32.mrf.mxu0 }
 0x5a8   : > { %v6559_v37 = vadd.f32 %v3028_v24, %v2932_v9  ;;  %2976 = vmatmul.f32.gmra.mxu2 %v7240_v4 }
 0x5a9   : > { %v2840_v6 = vpop.f32.mrf.mxu1 }
 0x5aa   : > { %v7490_v6 = vld [vmem:[#allocation45_spill] sm:$0xff] }
 0x5ab   : > { %v2937_v35 = vpop.f32.mrf.mxu2 }
 0x5ac   : > { %2879 = vmatmul.f32.gmra.mxu1 %v6119_v28  ;;  %3070 = vmatmul.f32.gmra.mxu3 %v6124_v32  ;;  %v7501_v28 = vld [vmem:[#allocation93_spill] sm:$0xff] }
 0x5af   : > { %v3031_v19 = vpop.f32.mrf.mxu3  ;;  %v6564_v2 = vpop.f32.mrf.mxu0 }
 0x5b0   : > { %v6566_v54 = vadd.f32 %v3031_v19, %v2935_v45  ;;  %2978 = vmatmul.f32.gmra.mxu2 %v7240_v4  ;;  %v7491_v19 = vld [vmem:[#allocation43_spill] sm:$0xff] }
 0x5b1   : > { %v2842_v43 = vpop.f32.mrf.mxu1 }
 0x5b3   : > { %v2939_v39 = vpop.f32.mrf.mxu2 }
 0x5b4   : > { %2881 = vmatmul.f32.gmra.mxu1 %v5509_v27  ;;  %3073 = vmatmul.f32.gmra.mxu3 %v5638_v47 }
 0x5b7   : > { %v3034_v9 = vpop.f32.mrf.mxu3  ;;  %v6571_v1 = vpop.f32.mrf.mxu0 }
 0x5b8   : > { %7487 = vst [vmem:[#allocation57_spill] sm:$0xff] %v6571_v1  ;;  %3651 = vmatmul.msk.f32.gmra.mxu2 %vm6150_vm15, %v7488_v18 }
 0x5b9   : > { %v2844_v26 = vpop.f32.mrf.mxu1 }
 0x5ba   : > { %v2845_v24 = vadd.f32 %v2844_v26, %v6286_v23  ;;  %v7492_v23 = vld [vmem:[#allocation70_spill] sm:$0xff] }
 0x5bb   : > { %v2941_v45 = vpop.f32.mrf.mxu2 }
 0x5bc   : > { %v2942_v59 = vadd.f32 %v2941_v45, %v2845_v24  ;;  %2883 = vmatmul.f32.gmra.mxu1 %v6169_v49  ;;  %3075 = vmatmul.f32.gmra.mxu3 %v7490_v6 }
 0x5bf   : > { %v3036_v35 = vpop.f32.mrf.mxu3  ;;  %v3220_v27 = vpop.f32.mrf.mxu0 }
 0x5c0   : > { %3652 = vmatmul.msk.f32.gmra.mxu2 %vm6150_vm15, %v7491_v19 }
 0x5c1   : > { %v2847_v43 = vpop.f32.mrf.mxu1 }
 0x5c2   : > { %v2848_v39 = vadd.f32 %v2847_v43, %v6310_v25 }
 0x5c3   : > { %v2944_v9 = vpop.f32.mrf.mxu2 }
 0x5c4   : > { %v2945_v1 = vadd.f32 %v2944_v9, %v2848_v39  ;;  %2886 = vmatmul.f32.gmra.mxu1 %v6190_v56  ;;  %3077 = vmatmul.f32.gmra.mxu3 %v7492_v23 }
 0x5c7   : > { %v3038_v26 = vpop.f32.mrf.mxu3  ;;  %v3222_v24 = vpop.f32.mrf.mxu0 }
 0x5c8   : > { %v6585_v49 = vadd.f32 %v3038_v26, %v2942_v59  ;;  %2986 = vmatmul.f32.gmra.mxu2 %v7240_v4 }
 0x5c9   : > { %v2850_v45 = vpop.f32.mrf.mxu1 }
 0x5cb   : > { %v2947_v35 = vpop.f32.mrf.mxu2 }
 0x5cc   : > { %2889 = vmatmul.f32.gmra.mxu1 %v6209_v31  ;;  %3080 = vmatmul.f32.gmra.mxu3 %v6214_v14 }
 0x5cf   : > { %v3041_v27 = vpop.f32.mrf.mxu3  ;;  %v6590_v25 = vpop.f32.mrf.mxu0 }
 0x5d0   : > { %v6592_v43 = vadd.f32 %v3041_v27, %v2945_v1  ;;  %3345 = vmatmul.f32.vlgmr.msra.gmra.mxu2 %v7457_v62 }
 0x5d1   : > { %v2852_v56 = vpop.f32.mrf.mxu1 }
 0x5d3   : > { %v2949_v39 = vpop.f32.mrf.mxu2 }
 0x5d4   : > { %3248 = vmatmul.f32.vlgmr.msra.gmra.mxu1 %v7240_v4  ;;  %3083 = vmatmul.f32.gmra.mxu3 %v5638_v47 }
 0x5d7   : > { %v3044_v59 = vpop.f32.mrf.mxu3  ;;  %v6597_v9 = vpop.f32.mrf.mxu0 }
 0x5d8   : > { %3347 = vmatmul.f32.gmra.mxu2 %v7459_v34 }
 0x5d9   : > { %v2854_v31 = vpop.f32.mrf.mxu1 }
 0x5da   : > { %v2855_v26 = vadd.f32 %v2854_v31, %v6378_v12 }
 0x5db   : > { %v2951_v24 = vpop.f32.mrf.mxu2 }
 0x5dc   : > { %v2952_v45 = vadd.f32 %v2951_v24, %v2855_v26  ;;  %3653 = vmatmul.msk.f32.gmra.mxu1 %vm5713_vm10, %v7455_v15 }
 0x5df   : > { %v3046_v62 = vpop.f32.mrf.mxu3  ;;  %v3230_v1 = vpop.f32.mrf.mxu0 }
 0x5e0   : > { %3350 = vmatmul.f32.gmra.mxu2 %v7461_v51 }
 0x5e1   : > { %v2857_v35 = vpop.f32.mrf.mxu1 }
 0x5e2   : > { %v2858_v27 = vadd.f32 %v2857_v35, %v6394_v50 }
 0x5e3   : > { %v2954_v56 = vpop.f32.mrf.mxu2 }
 0x5e4   : > { %v2955_v39 = vadd.f32 %v2954_v56, %v2858_v27  ;;  %3654 = vmatmul.msk.f32.gmra.mxu1 %vm5713_vm10, %v7458_v38 }
 0x5e7   : > { %v3048_v12 = vpop.f32.mrf.mxu3 }
 0x5e8   : > { %v6609_v34 = vadd.f32 %v3048_v12, %v2952_v45  ;;  %3353 = vmatmul.f32.gmra.mxu2 %v5638_v47 }
 0x5e9   : > { %v2860_v59 = vpop.f32.mrf.mxu1 }
 0x5eb   : > { %v2957_v15 = vpop.f32.mrf.mxu2 }
 0x5ec   : > { %3256 = vmatmul.f32.gmra.mxu1 %v7240_v4  ;;  %v7493_v15 = vld [vmem:[#allocation133_spill] sm:$0xff] }
 0x5ef   : > { %v3051_v31 = vpop.f32.mrf.mxu3 }
 0x5f0   : > { %v6613_v51 = vadd.f32 %v3051_v31, %v2955_v39  ;;  %3355 = vmatmul.f32.gmra.mxu2 %v7467_v52 }
 0x5f1   : > { %v2862_v50 = vpop.f32.mrf.mxu1 }
 0x5f3   : > { %v2959_v26 = vpop.f32.mrf.mxu2 }
 0x5f4   : > { %3258 = vmatmul.f32.gmra.mxu1 %v7240_v4 }
 0x5f7   : > { %v3054_v20 = vpop.f32.mrf.mxu3 }
 0x5f8   : > { %3357 = vmatmul.f32.gmra.mxu2 %v7469_v13 }
 0x5f9   : > { %v2864_v38 = vpop.f32.mrf.mxu1 }
 0x5fa   : > { %v2865_v24 = vadd.f32 %v2864_v38, %v6414_v7  ;;  %v7494_v38 = vld [vmem:[#allocation29_spill] sm:$0xff] }
 0x5fb   : > { %v2961_v45 = vpop.f32.mrf.mxu2 }
 0x5fc   : > { %v2962_v62 = vadd.f32 %v2961_v45, %v2865_v24  ;;  %3655 = vmatmul.msk.f32.gmra.mxu1 %vm5795_vm13, %v7465_v41 }
 0x5ff   : > { %v3056_v1 = vpop.f32.mrf.mxu3 }
 0x600   : > { %3360 = vmatmul.f32.gmra.mxu2 %v7470_v11 }
 0x601   : > { %v2867_v52 = vpop.f32.mrf.mxu1 }
 0x602   : > { %v2868_v35 = vadd.f32 %v2867_v52, %v6422_v3 }
 0x603   : > { %v2964_v27 = vpop.f32.mrf.mxu2 }
 0x604   : > { %v2965_v56 = vadd.f32 %v2964_v27, %v2868_v35  ;;  %3656 = vmatmul.msk.f32.gmra.mxu1 %vm5795_vm13, %v7468_v57 }
 0x607   : > { %v3058_v13 = vpop.f32.mrf.mxu3 }
 0x608   : > { %v6627_v7 = vadd.f32 %v3058_v13, %v2962_v62  ;;  %3363 = vmatmul.f32.gmra.mxu2 %v5638_v47 }
 0x609   : > { %v2870_v39 = vpop.f32.mrf.mxu1 }
 0x60b   : > { %v2967_v12 = vpop.f32.mrf.mxu2 }
 0x60c   : > { %3266 = vmatmul.f32.gmra.mxu1 %v7240_v4 }
 0x60f   : > { %v3061_v41 = vpop.f32.mrf.mxu3 }
 0x610   : > { %v6631_v11 = vadd.f32 %v3061_v41, %v2965_v56  ;;  %3365 = vmatmul.f32.gmra.mxu2 %v5907_v53 }
 0x611   : > { %v2872_v3 = vpop.f32.mrf.mxu1 }
 0x613   : > { %v2969_v59 = vpop.f32.mrf.mxu2 }
 0x614   : > { %3268 = vmatmul.f32.gmra.mxu1 %v7240_v4 }
 0x617   : > { %v3064_v58 = vpop.f32.mrf.mxu3 }
 0x618   : > { %3367 = vmatmul.f32.gmra.mxu2 %v7474_v33 }
 0x619   : > { %v2874_v57 = vpop.f32.mrf.mxu1 }
 0x61a   : > { %v2875_v31 = vadd.f32 %v2874_v57, %v7493_v15 }
 0x61b   : > { %v2971_v50 = vpop.f32.mrf.mxu2 }
 0x61c   : > { %v2972_v26 = vadd.f32 %v2971_v50, %v2875_v31  ;;  %3657 = vmatmul.msk.f32.gmra.mxu1 %vm5883_vm2, %v5889_v16  ;;  %v7495_v50 = vld [vmem:[#allocation51_spill] sm:$0xff] }
 0x61f   : > { %v3066_v20 = vpop.f32.mrf.mxu3 }
 0x620   : > { %3370 = vmatmul.f32.gmra.mxu2 %v7475_v60 }
 0x621   : > { %v2877_v53 = vpop.f32.mrf.mxu1 }
 0x622   : > { %v2878_v24 = vadd.f32 %v2877_v53, %v7494_v38  ;;  %v6676_v38 = vld [vmem:[%s6846_s4] ss:$0 sm:$0xff] }
 0x623   : > { %v2974_v45 = vpop.f32.mrf.mxu2 }
 0x624   : > { %v2975_v62 = vadd.f32 %v2974_v45, %v2878_v24  ;;  %3658 = vmatmul.msk.f32.gmra.mxu1 %vm5883_vm2, %v7473_v44  ;;  %v3870_v45 = vld [vmem:[#allocation2 + $0x48] sm:$0xff] }
 0x627   : > { %v3068_v33 = vpop.f32.mrf.mxu3 }
 0x628   : > { %v6645_v1 = vadd.f32 %v3068_v33, %v2972_v26  ;;  %3373 = vmatmul.f32.gmra.mxu2 %v5638_v47  ;;  %v7496_v33 = vld [vmem:[#allocation111_spill] sm:$0xff] }
 0x629   : > { %v2880_v52 = vpop.f32.mrf.mxu1 }
 0x62b   : > { %v2977_v35 = vpop.f32.mrf.mxu2 }
 0x62c   : > { %3276 = vmatmul.f32.gmra.mxu1 %v7240_v4 }
 0x62f   : > { %v3071_v16 = vpop.f32.mrf.mxu3 }
 0x630   : > { %v6649_v60 = vadd.f32 %v3071_v16, %v2975_v62  ;;  %3375 = vmatmul.f32.gmra.mxu2 %v7478_v63 }
 0x631   : > { %v2882_v27 = vpop.f32.mrf.mxu1 }
 0x632   : > { %v3871_v27 = vld [vmem:[#allocation2 + $0x50] sm:$0xff] }
 0x633   : > { %v2979_v56 = vpop.f32.mrf.mxu2 }
 0x634   : > { %3278 = vmatmul.f32.gmra.mxu1 %v7240_v4 }
 0x637   : > { %v3074_v55 = vpop.f32.mrf.mxu3 }
 0x638   : > { %3377 = vmatmul.f32.gmra.mxu2 %v7480_v0 }
 0x639   : > { %v2884_v44 = vpop.f32.mrf.mxu1 }
 0x63a   : > { %v2885_v13 = vadd.f32 %v2884_v44, %v6470_v17 }
 0x63b   : > { %v2981_v39 = vpop.f32.mrf.mxu2 }
 0x63c   : > { %v2982_v12 = vadd.f32 %v2981_v39, %v2885_v13  ;;  %3659 = vmatmul.msk.f32.gmra.mxu1 %vm5971_vm6, %v5977_v42 }
 0x63f   : > { %v3076_v41 = vpop.f32.mrf.mxu3 }
 0x640   : > { %3380 = vmatmul.f32.gmra.mxu2 %v6039_v22 }
 0x641   : > { %v2887_v63 = vpop.f32.mrf.mxu1 }
 0x642   : > { %v2888_v3 = vadd.f32 %v2887_v63, %v6479_v5 }
 0x643   : > { %v2984_v59 = vpop.f32.mrf.mxu2 }
 0x644   : > { %v2985_v58 = vadd.f32 %v2984_v59, %v2888_v3  ;;  %3660 = vmatmul.msk.f32.gmra.mxu1 %vm5971_vm6, %v7479_v10  ;;  %v3872_v3 = vld [vmem:[#allocation2 + $0x68] sm:$0xff] }
 0x647   : > { %v3078_v0 = vpop.f32.mrf.mxu3 }
 0x648   : > { %v6663_v17 = vadd.f32 %v3078_v0, %v2982_v12  ;;  %3383 = vmatmul.f32.gmra.mxu2 %v5638_v47 }
 0x649   : > { %v2890_v57 = vpop.f32.mrf.mxu1 }
 0x64b   : > { %v2987_v15 = vpop.f32.mrf.mxu2 }
 0x64c   : > { %3286 = vmatmul.f32.gmra.mxu1 %v7240_v4 }
 0x64f   : > { %v3081_v42 = vpop.f32.mrf.mxu3 }
 0x650   : > { %v6667_v22 = vadd.f32 %v3081_v42, %v2985_v58  ;;  %3385 = vmatmul.f32.gmra.mxu2 %v7485_v36  ;;  %v3873_v42 = vld [vmem:[#allocation2 + $0x70] sm:$0xff] }
 0x651   : > { %v3249_v5 = vpop.f32.mrf.mxu1 }
 0x653   : > { %v3346_v31 = vpop.f32.mrf.mxu2 }
 0x654   : > { %3288 = vmatmul.f32.gmra.mxu1 %v7240_v4 }
 0x657   : > { %v3084_v61 = vpop.f32.mrf.mxu3 }
 0x658   : > { %3387 = vmatmul.f32.gmra.mxu2 %v6104_v48  ;;  %v7500_v61 = vld [vmem:[#allocation80_spill] sm:$0xff] }
 0x659   : > { %v3251_v10 = vpop.f32.mrf.mxu1 }
 0x65a   : > { %v3252_v26 = vadd.f32 %v3251_v10, %v7495_v50 }
 0x65b   : > { %v3348_v20 = vpop.f32.mrf.mxu2 }
 0x65c   : > { %v3349_v53 = vadd.f32 %v3348_v20, %v3252_v26  ;;  %3661 = vmatmul.msk.f32.gmra.mxu1 %vm6060_vm11, %v6066_v21  ;;  %v7502_v26 = vld [vmem:[#allocation88_spill] sm:$0xff] }
 0x65e   : > { %v3426_v36 = vadd.f32 %v3349_v53, %v6507_v40 }
 0x660   : > { %v3446_v24 = vadd.f32 %v6676_v38, %v3426_v36  ;;  %3390 = vmatmul.f32.gmra.mxu2 %v6124_v32 }
 0x661   : > { %v3254_v48 = vpop.f32.mrf.mxu1 }
 0x662   : > { %v3462_v62 = vadd.f32 %v3870_v45, %v3446_v24  ;;  %v3255_v52 = vadd.f32 %v3254_v48, %v7496_v33  ;;  %v7503_v24 = vld [vmem:[#allocation75_spill] sm:$0xff]  ;;  %v7505_v33 = vld [vmem:[#allocation74_spill] sm:$0xff] }
 0x663   : > { %v3351_v35 = vpop.f32.mrf.mxu2 }
 0x664   : > { %3478 = vst [vmem:[%s4228_s30] sm:$0xff] %v3462_v62  ;;  %v3352_v16 = vadd.f32 %v3351_v35, %v3255_v52  ;;  %3662 = vmatmul.msk.f32.gmra.mxu1 %vm6060_vm11, %v7486_v8  ;;  %v3874_v35 = vld [vmem:[#allocation2 + $0x88] sm:$0xff] }
 0x666   : > { %v3427_v21 = vadd.f32 %v3352_v16, %v6514_v30 }
 0x668   : > { %v3447_v40 = vadd.f32 %v6676_v38, %v3427_v21  ;;  %3393 = vmatmul.f32.gmra.mxu2 %v5638_v47  ;;  %v7506_v21 = vld [vmem:[#allocation100_spill] sm:$0xff] }
 0x669   : > { %v3257_v32 = vpop.f32.mrf.mxu1 }
 0x66a   : > { %v3463_v56 = vadd.f32 %v3871_v27, %v3447_v40 }
 0x66b   : > { %v3354_v55 = vpop.f32.mrf.mxu2 }
 0x66c   : > { %3479 = vst [vmem:[%s4228_s30 + $0x8] sm:$0xff] %v3463_v56  ;;  %3296 = vmatmul.f32.gmra.mxu1 %v7240_v4  ;;  %v7507_v56 = vld [vmem:[#allocation92_spill] sm:$0xff] }
 0x670   : > { %3395 = vmatmul.f32.gmra.mxu2 %v7490_v6 }
 0x671   : > { %v3259_v44 = vpop.f32.mrf.mxu1 }
 0x673   : > { %v3356_v13 = vpop.f32.mrf.mxu2 }
 0x674   : > { %3298 = vmatmul.f32.gmra.mxu1 %v7240_v4  ;;  %v3875_v13 = vld [vmem:[#allocation2 + $0x90] sm:$0xff] }
 0x678   : > { %3397 = vmatmul.f32.gmra.mxu2 %v7492_v23  ;;  %v7498_v23 = vld [vmem:[#allocation136_spill] sm:$0xff] }
 0x679   : > { %v3261_v30 = vpop.f32.mrf.mxu1 }
 0x67a   : > { %v3262_v8 = vadd.f32 %v3261_v30, %v7497_v29 }
 0x67b   : > { %v3358_v39 = vpop.f32.mrf.mxu2 }
 0x67c   : > { %v3359_v12 = vadd.f32 %v3358_v39, %v3262_v8  ;;  %3663 = vmatmul.msk.f32.gmra.mxu1 %vm6150_vm15, %v7488_v18  ;;  %v7499_v18 = vld [vmem:[#allocation63_spill] sm:$0xff]  ;;  %v7508_v8 = vld [vmem:[#allocation96_spill] sm:$0xff] }
 0x67d   : > { %v7509_v39 = vrot.slane %v7508_v8, 1 }
 0x67e   : > { %v3428_v41 = vadd.f32 %v3359_v12, %v6533_v46  ;;  %v3879_v12 = vld [vmem:[#allocation2 + $0xd0] sm:$0xff] }
 0x680   : > { %v3448_v6 = vadd.f32 %v6676_v38, %v3428_v41  ;;  %3400 = vmatmul.f32.gmra.mxu2 %v6214_v14  ;;  %v2369_v41 = vsel %vm443_vm1, %v5638_v47, %v7509_v39 }
 0x681   : > { %v3264_v63 = vpop.f32.mrf.mxu1 }
 0x682   : > { %v3464_v59 = vadd.f32 %v3872_v3, %v3448_v6  ;;  %v3265_v58 = vadd.f32 %v3264_v63, %v7498_v23  ;;  %v7511_v63 = vld [vmem:[#allocation79_spill] sm:$0xff] }
 0x683   : > { %v3361_v0 = vpop.f32.mrf.mxu2 }
 0x684   : > { %3480 = vst [vmem:[%s4228_s30 + $0x10] sm:$0xff] %v3464_v59  ;;  %v3362_v57 = vadd.f32 %v3361_v0, %v3265_v58  ;;  %3664 = vmatmul.msk.f32.gmra.mxu1 %vm6150_vm15, %v7491_v19  ;;  %v7512_v59 = vld [vmem:[#allocation101_spill] sm:$0xff] }
 0x686   : > { %v3429_v15 = vadd.f32 %v3362_v57, %v7499_v18  ;;  %v7513_v57 = vld [vmem:[#allocation26_spill] sm:$0xff] }
 0x687   : > { %v7514_v18 = vmax.f32 %v7513_v57, 0.0 }
 0x688   : > { %v3449_v46 = vadd.f32 %v6676_v38, %v3429_v15  ;;  %3403 = vmatmul.f32.gmra.mxu2 %v5638_v47 }
 0x689   : > { %v3267_v14 = vpop.f32.mrf.mxu1 }
 0x68a   : > { %v3465_v5 = vadd.f32 %v3873_v42, %v3449_v46  ;;  %v7516_v14 = vld [vmem:[#allocation135_spill] sm:$0xff] }
 0x68b   : > { %v3364_v31 = vpop.f32.mrf.mxu2  ;;  %v7517_v42 = vrot.slane %v7516_v14, 1 }
 0x68c   : > { %3481 = vst [vmem:[%s4228_s30 + $0x18] sm:$0xff] %v3465_v5  ;;  %3306 = vmatmul.f32.gmra.mxu1 %v7240_v4 }
 0x68d   : > { %v2367_v5 = vsel %vm443_vm1, %v7517_v42, %v5638_v47 }
 0x690   : > { %3405 = vmatmul.f32.gmra.mxu2 %v7500_v61 }
 0x691   : > { %v3269_v10 = vpop.f32.mrf.mxu1 }
 0x692   : > { %v3876_v10 = vld [vmem:[#allocation2 + $0xa8] sm:$0xff] }
 0x693   : > { %v3366_v50 = vpop.f32.mrf.mxu2 }
 0x694   : > { %3308 = vmatmul.f32.gmra.mxu1 %v7240_v4 }
 0x698   : > { %3407 = vmatmul.f32.gmra.mxu2 %v7501_v28  ;;  %v7518_v28 = vld [vmem:[#allocation87_spill] sm:$0xff] }
 0x699   : > { %v3271_v19 = vpop.f32.mrf.mxu1 }
 0x69a   : > { %v3272_v20 = vadd.f32 %v3271_v19, %v7502_v26 }
 0x69b   : > { %v3368_v53 = vpop.f32.mrf.mxu2 }
 0x69c   : > { %v3369_v36 = vadd.f32 %v3368_v53, %v3272_v20  ;;  %3665 = vmatmul.msk.f32.gmra.mxu1 %vm6235_vm8, %v7503_v24  ;;  %v7519_v53 = vld [vmem:[#allocation95_spill] sm:$0xff] }
 0x69e   : > { %v3430_v45 = vadd.f32 %v3369_v36, %v6559_v37 }
 0x6a0   : > { %v3450_v62 = vadd.f32 %v6676_v38, %v3430_v45  ;;  %3410 = vmatmul.f32.gmra.mxu2 %v7505_v33  ;;  %v3877_v45 = vld [vmem:[#allocation2 + $0xb0] sm:$0xff] }
 0x6a1   : > { %v3274_v52 = vpop.f32.mrf.mxu1 }
 0x6a2   : > { %v3466_v16 = vadd.f32 %v3874_v35, %v3450_v62  ;;  %v3275_v40 = vadd.f32 %v3274_v52, %v7506_v21  ;;  %v7521_v21 = vld [vmem:[#allocation114_spill] sm:$0xff] }
 0x6a3   : > { %v3371_v32 = vpop.f32.mrf.mxu2 }
 0x6a4   : > { %3482 = vst [vmem:[%s4228_s30 + $0x20] sm:$0xff] %v3466_v16  ;;  %v3372_v27 = vadd.f32 %v3371_v32, %v3275_v40  ;;  %3666 = vmatmul.msk.f32.gmra.mxu1 %vm6235_vm8, %v7507_v56 }
 0x6a6   : > { %v3431_v55 = vadd.f32 %v3372_v27, %v6566_v54 }
 0x6a8   : > { %v3451_v37 = vadd.f32 %v6676_v38, %v3431_v55  ;;  %3413 = vmatmul.f32.gmra.mxu2 %v5638_v47  ;;  %v3878_v55 = vld [vmem:[#allocation2 + $0xc8] sm:$0xff] }
 0x6a9   : > { %v3277_v44 = vpop.f32.mrf.mxu1 }
 0x6aa   : > { %v3467_v30 = vadd.f32 %v3875_v13, %v3451_v37  ;;  %v7522_v44 = vld [vmem:[#allocation103_spill] sm:$0xff] }
 0x6ab   : > { %v3374_v29 = vpop.f32.mrf.mxu2 }
 0x6ac   : > { %3483 = vst [vmem:[%s4228_s30 + $0x28] sm:$0xff] %v3467_v30  ;;  %3316 = vmatmul.f32.gmra.mxu1 %v7240_v4 }
 0x6b0   : > { %3415 = vmatmul.f32.gmra.mxu2 %v2369_v41 }
 0x6b1   : > { %v3279_v6 = vpop.f32.mrf.mxu1 }
 0x6b3   : > { %v3376_v54 = vpop.f32.mrf.mxu2 }
 0x6b4   : > { %3318 = vmatmul.f32.gmra.mxu1 %v7240_v4 }
 0x6b8   : > { %3417 = vmatmul.f32.gmra.mxu2 %v7511_v63 }
 0x6b9   : > { %v3281_v3 = vpop.f32.mrf.mxu1 }
 0x6ba   : > { %v3282_v23 = vadd.f32 %v3281_v3, %v7512_v59  ;;  %v7523_v3 = vld [vmem:[#allocation104_spill] sm:$0xff] }
 0x6bb   : > { %v3378_v58 = vpop.f32.mrf.mxu2 }
 0x6bc   : > { %v3379_v0 = vadd.f32 %v3378_v58, %v3282_v23  ;;  %3667 = vmatmul.msk.f32.gmra.mxu1 %vm6341_vm14, %v7514_v18  ;;  %v3880_v18 = vld [vmem:[#allocation2 + $0xe8] sm:$0xff] }
 0x6be   : > { %v3432_v46 = vadd.f32 %v3379_v0, %v6585_v49  ;;  %v7520_v49 = vmax.f32 %v7519_v53, 0.0 }
 0x6c0   : > { %v3452_v31 = vadd.f32 %v6676_v38, %v3432_v46  ;;  %3420 = vmatmul.f32.gmra.mxu2 %v2367_v5  ;;  %v7524_v46 = vld [vmem:[#allocation89_spill] sm:$0xff] }
 0x6c1   : > { %v3284_v61 = vpop.f32.mrf.mxu1 }
 0x6c2   : > { %v3468_v50 = vadd.f32 %v3876_v10, %v3452_v31  ;;  %v3285_v19 = vadd.f32 %v3284_v61, %v7518_v28 }
 0x6c3   : > { %v3381_v26 = vpop.f32.mrf.mxu2 }
 0x6c4   : > { %3484 = vst [vmem:[%s4228_s30 + $0x30] sm:$0xff] %v3468_v50  ;;  %v3382_v20 = vadd.f32 %v3381_v26, %v3285_v19  ;;  %3668 = vmatmul.msk.f32.gmra.mxu1 %vm6341_vm14, %v7520_v49  ;;  %v3881_v50 = vld [vmem:[#allocation2 + $0xf0] sm:$0xff] }
 0x6c6   : > { %v3433_v36 = vadd.f32 %v3382_v20, %v6592_v43 }
 0x6c8   : > { %v3453_v24 = vadd.f32 %v6676_v38, %v3433_v36  ;;  %3423 = vmatmul.f32.gmra.mxu2 %v5638_v47 }
 0x6c9   : > { %v3287_v48 = vpop.f32.mrf.mxu1 }
 0x6ca   : > { %v3469_v62 = vadd.f32 %v3877_v45, %v3453_v24  ;;  %v3882_v45 = vld [vmem:[#allocation2 + $0x108] sm:$0xff] }
 0x6cb   : > { %v3384_v33 = vpop.f32.mrf.mxu2 }
 0x6cc   : > { %3485 = vst [vmem:[%s4228_s30 + $0x38] sm:$0xff] %v3469_v62  ;;  %3326 = vmatmul.f32.gmra.mxu1 %v7240_v4  ;;  %v7525_v33 = vld [vmem:[#allocation57_spill] sm:$0xff] }
 0x6d1   : > { %v3289_v52 = vpop.f32.mrf.mxu1 }
 0x6d3   : > { %v3386_v35 = vpop.f32.mrf.mxu2 }
 0x6d9   : > { %v3291_v16 = vpop.f32.mrf.mxu1 }
 0x6da   : > { %v3292_v40 = vadd.f32 %v3291_v16, %v7521_v21 }
 0x6db   : > { %v3388_v32 = vpop.f32.mrf.mxu2 }
 0x6dc   : > { %v3389_v27 = vadd.f32 %v3388_v32, %v3292_v40  ;;  %v3883_v32 = vld [vmem:[#allocation2 + $0x110] sm:$0xff] }
 0x6de   : > { %v3434_v43 = vadd.f32 %v3389_v27, %v6609_v34 }
 0x6e0   : > { %v3454_v47 = vadd.f32 %v6676_v38, %v3434_v43 }
 0x6e1   : > { %v3294_v56 = vpop.f32.mrf.mxu1 }
 0x6e2   : > { %v3470_v37 = vadd.f32 %v3878_v55, %v3454_v47  ;;  %v3295_v13 = vadd.f32 %v3294_v56, %v7522_v44 }
 0x6e3   : > { %v3391_v30 = vpop.f32.mrf.mxu2 }
 0x6e4   : > { %3486 = vst [vmem:[%s4228_s30 + $0x40] sm:$0xff] %v3470_v37  ;;  %v3392_v4 = vadd.f32 %v3391_v30, %v3295_v13 }
 0x6e6   : > { %v3435_v29 = vadd.f32 %v3392_v4, %v6613_v51  ;;  %v3884_v4 = vld [vmem:[#allocation2 + $0x128] sm:$0xff] }
 0x6e8   : > { %v3455_v8 = vadd.f32 %v6676_v38, %v3435_v29 }
 0x6e9   : > { %v3297_v39 = vpop.f32.mrf.mxu1 }
 0x6ea   : > { %v3471_v41 = vadd.f32 %v3879_v12, %v3455_v8 }
 0x6eb   : > { %v3394_v6 = vpop.f32.mrf.mxu2 }
 0x6ec   : > { %3487 = vst [vmem:[%s4228_s30 + $0x48] sm:$0xff] %v3471_v41  ;;  %v3885_v6 = vld [vmem:[#allocation2 + $0x130] sm:$0xff] }
 0x6f1   : > { %v3299_v34 = vpop.f32.mrf.mxu1 }
 0x6f3   : > { %v3396_v54 = vpop.f32.mrf.mxu2 }
 0x6f9   : > { %v3301_v63 = vpop.f32.mrf.mxu1 }
 0x6fa   : > { %v3302_v59 = vadd.f32 %v3301_v63, %v7523_v3 }
 0x6fb   : > { %v3398_v23 = vpop.f32.mrf.mxu2 }
 0x6fc   : > { %v3399_v58 = vadd.f32 %v3398_v23, %v3302_v59 }
 0x6fe   : > { %v3436_v0 = vadd.f32 %v3399_v58, %v6627_v7 }
 0x700   : > { %v3456_v51 = vadd.f32 %v6676_v38, %v3436_v0 }
 0x701   : > { %v3304_v57 = vpop.f32.mrf.mxu1 }
 0x702   : > { %v3472_v15 = vadd.f32 %v3880_v18, %v3456_v51  ;;  %v3305_v14 = vadd.f32 %v3304_v57, %v7524_v46 }
 0x703   : > { %v3401_v42 = vpop.f32.mrf.mxu2 }
 0x704   : > { %3488 = vst [vmem:[%s4228_s30 + $0x50] sm:$0xff] %v3472_v15  ;;  %v3402_v5 = vadd.f32 %v3401_v42, %v3305_v14 }
 0x706   : > { %v3437_v31 = vadd.f32 %v3402_v5, %v6631_v11 }
 0x708   : > { %v3457_v61 = vadd.f32 %v6676_v38, %v3437_v31 }
 0x709   : > { %v3307_v10 = vpop.f32.mrf.mxu1 }
 0x70a   : > { %v3473_v28 = vadd.f32 %v3881_v50, %v3457_v61 }
 0x70b   : > { %v3404_v19 = vpop.f32.mrf.mxu2 }
 0x70c   : > { %3489 = vst [vmem:[%s4228_s30 + $0x58] sm:$0xff] %v3473_v28 }
 0x711   : > { %v3309_v7 = vpop.f32.mrf.mxu1 }
 0x713   : > { %v3406_v26 = vpop.f32.mrf.mxu2 }
 0x719   : > { %v3311_v20 = vpop.f32.mrf.mxu1 }
 0x71a   : > { %v3312_v53 = vadd.f32 %v3311_v20, %v6564_v2 }
 0x71b   : > { %v3408_v49 = vpop.f32.mrf.mxu2 }
 0x71c   : > { %v3409_v36 = vadd.f32 %v3408_v49, %v3312_v53 }
 0x71e   : > { %v3438_v24 = vadd.f32 %v3409_v36, %v6645_v1 }
 0x720   : > { %v3458_v11 = vadd.f32 %v6676_v38, %v3438_v24 }
 0x721   : > { %v3314_v48 = vpop.f32.mrf.mxu1 }
 0x722   : > { %v3474_v62 = vadd.f32 %v3882_v45, %v3458_v11  ;;  %v3315_v52 = vadd.f32 %v3314_v48, %v7525_v33 }
 0x723   : > { %v3411_v35 = vpop.f32.mrf.mxu2 }
 0x724   : > { %3490 = vst [vmem:[%s4228_s30 + $0x60] sm:$0xff] %v3474_v62  ;;  %v3412_v16 = vadd.f32 %v3411_v35, %v3315_v52 }
 0x726   : > { %v3439_v21 = vadd.f32 %v3412_v16, %v6649_v60 }
 0x728   : > { %v3459_v2 = vadd.f32 %v6676_v38, %v3439_v21 }
 0x729   : > { %v3317_v40 = vpop.f32.mrf.mxu1 }
 0x72a   : > { %v3475_v27 = vadd.f32 %v3883_v32, %v3459_v2 }
 0x72b   : > { %v3414_v1 = vpop.f32.mrf.mxu2 }
 0x72c   : > { %3491 = vst [vmem:[%s4228_s30 + $0x68] sm:$0xff] %v3475_v27 }
 0x731   : > { %v3319_v43 = vpop.f32.mrf.mxu1 }
 0x733   : > { %v3416_v47 = vpop.f32.mrf.mxu2 }
 0x739   : > { %v3321_v56 = vpop.f32.mrf.mxu1 }
 0x73a   : > { %v3322_v55 = vadd.f32 %v3321_v56, %v6590_v25 }
 0x73b   : > { %v3418_v37 = vpop.f32.mrf.mxu2 }
 0x73c   : > { %v3419_v44 = vadd.f32 %v3418_v37, %v3322_v55 }
 0x73e   : > { %v3440_v60 = vadd.f32 %v3419_v44, %v6663_v17 }
 0x740   : > { %v3460_v13 = vadd.f32 %v6676_v38, %v3440_v60 }
 0x741   : > { %v3324_v30 = vpop.f32.mrf.mxu1 }
 0x742   : > { %v3476_v29 = vadd.f32 %v3884_v4, %v3460_v13  ;;  %v3325_v8 = vadd.f32 %v3324_v30, %v6597_v9 }
 0x743   : > { %v3421_v39 = vpop.f32.mrf.mxu2 }
 0x744   : > { %3492 = vst [vmem:[%s4228_s30 + $0x70] sm:$0xff] %v3476_v29  ;;  %v3422_v25 = vadd.f32 %v3421_v39, %v3325_v8 }
 0x746   : > { %v3441_v12 = vadd.f32 %v3422_v25, %v6667_v22 }
 0x748   : > { %v3461_v17 = vadd.f32 %v6676_v38, %v3441_v12 }
 0x749   : > { %v3327_v41 = vpop.f32.mrf.mxu1 }
 0x74a   : > { %v3477_v9 = vadd.f32 %v3885_v6, %v3461_v17 }
 0x74b   : > { %v3424_v34 = vpop.f32.mrf.mxu2 }
 0x74c   : > { %3493 = vst [vmem:[%s4228_s30 + $0x78] sm:$0xff] %v3477_v9 }
 0x74d   : > { %3997 = shalt.err (!%p3994_p0)
}
 0x74e   : > { %s4082_s30 = smov 128   ;;  %s4083_s15 = smov 8  }
 0x74f   : > { %3735 = dma.vmem_to_hbm [thread:$0]  (%p4166_p3), %s3511_s26, 2048, %s3513_s9, %s3495_s1, %s4082_s30, %s4082_s30, %s4083_s15  }
 0x750 PF: > { %p3752_p1 = scmp.ge.s32.totalorder %s4074_s25, 2  ;;  %s3527_s17 = sand.u32 1, %s4046_s18  }
 0x751   : > { %s3528_s27 = scalar_lea.sflag [#allocation6], %s3527_s17 }
 0x752   : > { %p3745_p2 = pnand %p3752_p1, %p4175_p8 }
 0x754   : > { %p3746_p4 = pneg %p3745_p2 }
 0x756   : > { %4041 = dma.done.wait (%p3746_p4), %s3528_s27, 2048  }
 0x757   : > { %4043 = vsyncadd (%p3746_p4), %s3528_s27, 4294965248  ;;  %s20_s25 = sadd.s32 1, %s4074_s25   ;;  %s7527_s22 = sld [smem:[#allocation18_spill]] }
 0x758   : > { %p17_p5 = scmp.ge.s32.totalorder %s20_s25, 6   ;;  %s7528_s7 = sld [smem:[#allocation19_spill]] }
 0x759   : > { %s7529_s24 = sld [smem:[#allocation20_spill]]  ;;  %s7530_s18 = smov %s4050_s19 }
 0x75a   : > { %s7531_s19 = smov %s4054_s20  ;;  %s7532_s20 = smov %s4196_s16 }
 0x75b   : > { %s7533_s21 = smov %s4066_s23  ;;  %19 = sbr.rel (!%p17_p5) target bundleno = 10 (0xa), region = 86 }
 0x75e   : > { %s7534_s23 = smov %s7528_s7 }
 0x760   :  { %3534 = vsyncpa [#allocation5], 1 }
 0x761   :  { %3536 = vsyncpa [#allocation5 + $0x1], 1 }
 0x762   :  { %3537 = vsyncpa [#allocation8], 1 }
 0x763   :  { %3538 = vsyncpa [#allocation6], 1 }
 0x764   :  { %3540 = vsyncpa [#allocation6 + $0x1], 1 }
 0x765   :  { %3541 = vsyncmov [#allocation3] }
 0x768   :  { %s3542_s8 = vpop.sfrf %3541 }
 0x769   :  { %p3676_p3 = scmp.ne.s32.totalorder %s3542_s8, 0 }
 0x76b   :  { %3546 = shalt.err (%p3676_p3)  }

</bundles_post_ra>
